<compile_context>
chip_gen: v7x
topology: tpu7x:2x2x1
jax: 0.10.0
libtpu: 0.0.40
codegen_flags: <defaults>
</compile_context>

<pallas_src>
import jax
import jax.numpy as jnp
from jax import lax
from jax.experimental import pallas as pl
from jax.experimental.pallas import tpu as pltpu

LRELU_SLOPE = 0.2
IN_EPS = 1e-5


def _lrelu(x):
    return jnp.where(x > 0, x, LRELU_SLOPE * x)


def _instance_norm(y):
    # y: (Bn, S, C) f32; per-sample, per-channel, biased variance, eps=1e-5 (PyTorch).
    m = jnp.mean(y, axis=1, keepdims=True)
    d = y - m
    v = jnp.mean(d * d, axis=1, keepdims=True)
    return d * lax.rsqrt(v + IN_EPS)


def _edge_masks(H, W):
    """0/1 bf16 masks over the padded row axis of the per-sample zero-padded buffer.

    mask_l zeroes every column-(W-1) entry (the values that would leak into a dw=-1
    tap when reading the left neighbour of column 0); mask_r zeroes every column-0
    entry (leak into a dw=+1 tap at column W-1).  Pad rows are zero anyway.
    """
    P = 2 * W
    R = H * W + 2 * P
    r = lax.broadcasted_iota(jnp.int32, (1, R, 1), 1) - P
    if W & (W - 1) == 0:
        col = jnp.bitwise_and(r, W - 1)          # == r % W for power-of-two W (also r<0)
    else:
        col = r % W
    mask_l = (col != W - 1).astype(jnp.bfloat16)  # used by the dw=-1 taps
    mask_r = (col != 0).astype(jnp.bfloat16)      # used by the dw=+1 taps
    return mask_l, mask_r


def _conv3x3_kstacked(x3, w, H, W, mask_l, mask_r):
    """3x3 'same' conv of (Bn, H*W, Cin) bf16 as ONE MXU matmul -> (Bn, H*W, Cout) f32.

    Builds an im2col slab (Bn*HW, 9*Cin) by lane-concatenating the 9 shifted taps of a
    per-sample zero-padded bf16 buffer.  Horizontal edge masks are applied once per
    direction (2 VPU multiplies per conv); vertical out-of-range taps read the zero
    pad rows (P = 2*W >= W+1, multiple of 8 so all sublane concats stay aligned).
    `w` is the host-reshaped (9*Cin, Cout) bf16 weight; accumulation is f32.
    """
    Bn, HW, Cin = x3.shape
    P = 2 * W
    z = jnp.zeros((Bn, P, Cin), jnp.bfloat16)
    xz = jnp.concatenate([z, x3, z], axis=1)      # per-sample pad: taps never cross samples
    src = {-1: xz * mask_l, 0: xz, 1: xz * mask_r}
    taps = [
        src[dw][:, P + dh * W + dw: P + dh * W + dw + HW, :]
        for dh in (-1, 0, 1) for dw in (-1, 0, 1)   # (kh, kw) = (dh+1, dw+1): matches w order
    ]
    slab = jnp.concatenate(taps, axis=-1)         # (Bn, HW, 9*Cin) K-stacked im2col
    out = jnp.dot(slab.reshape(Bn * HW, 9 * Cin), w,
                  preferred_element_type=jnp.float32)
    return out.reshape(Bn, HW, w.shape[-1])


def _make_fused_kernel(H, W, Bn):
    H1, W1 = H // 2, W // 2
    HW, HW1 = H * W, H1 * W1

    def kernel(x0_ref, w0_ref, w1_ref, sel_ref, w2_ref, w3_ref, w4_ref, o_ref):
        # hoisted edge masks: full-res for layer 1, half-res shared by layers 2-4
        ml0, mr0 = _edge_masks(H, W)
        ml1, mr1 = _edge_masks(H1, W1)

        # ---- layer 0: conv3x3(3->32, s1) + lrelu, one matmul on host-im2col'ed patches
        y = jnp.dot(x0_ref[...].reshape(Bn * HW, 32), w0_ref[...],
                    preferred_element_type=jnp.float32)
        y = _lrelu(y).astype(jnp.bfloat16).reshape(Bn, HW, 32)

        # ---- layer 1: conv3x3(32->64, s2) + lrelu: stride-1 K-stacked conv, then one
        #      0/1 block-diagonal selection matmul picks the even (row, col) positions.
        y = _conv3x3_kstacked(y, w1_ref[...], H, W, ml0, mr0)        # (Bn, HW, 64) f32
        y = _lrelu(y).astype(jnp.bfloat16).reshape(Bn * HW, 64)
        y = jnp.dot(sel_ref[...], y, preferred_element_type=jnp.float32)  # (Bn*HW1, 64)
        y = y.astype(jnp.bfloat16).reshape(Bn, HW1, 64)

        # ---- layer 2: conv3x3(64->128, s1) + InstanceNorm + lrelu
        y = _conv3x3_kstacked(y, w2_ref[...], H1, W1, ml1, mr1)
        y = _lrelu(_instance_norm(y)).astype(jnp.bfloat16)

        # ---- layer 3: conv3x3(128->128, s1) + InstanceNorm + lrelu
        y = _conv3x3_kstacked(y, w3_ref[...], H1, W1, ml1, mr1)
        y = _lrelu(_instance_norm(y)).astype(jnp.bfloat16)

        # ---- layer 4: conv3x3(128->1, s1); Cout zero-padded to 128 -> lane-dense store
        y = _conv3x3_kstacked(y, w4_ref[...], H1, W1, ml1, mr1)
        o_ref[...] = y.astype(o_ref.dtype)

    return kernel


def _pick_block_n(n):
    """Samples per grid step.

    Larger blocks grow the matmul M dimension (better MXU fill, fewer per-step fixed
    costs, weight fetch amortized for v5e); the grid is kept even whenever possible so
    both v7x TensorCores get work.  Capped at 8 to keep the block-diagonal stride-2
    selection matrix and the per-step activations small.
    """
    for b in (8, 4, 2, 1):
        if n % b == 0 and (n // b) % 2 == 0:
            return b
    return 1


@jax.jit
def discriminator_forward(img_nchw, w0, w1, w2, w3, w4):
    """img_nchw: (N, 3, H, W) like PyTorch. Returns (N, 1, H//2, W//2) f32.

    Weights are HWIO: w0 (3,3,3,32), w1 (3,3,32,64), w2 (3,3,64,128),
    w3 (3,3,128,128), w4 (3,3,128,1).
    NOTE: stride-2 output size H//2 matches PyTorch Conv2d(k=3,p=1,s=2) only for even H, W.
    """
    N, C, H, W = img_nchw.shape
    assert C == 3
    assert H % 2 == 0 and W % 8 == 0 and (H * W) % 16 == 0 and ((H // 2) * (W // 2)) % 16 == 0
    H1, W1 = H // 2, W // 2
    Bn = _pick_block_n(N)

    x = jnp.transpose(img_nchw, (0, 2, 3, 1)).astype(jnp.float32)   # NHWC

    # ---- host-side layout prep (tiny, fused by XLA) ----
    # layer-0 im2col patches: (N, H*W, 27) zero-padded to 32 lanes, bf16
    xp = jnp.pad(x, ((0, 0), (1, 1), (1, 1), (0, 0)))
    patches = jnp.concatenate(
        [xp[:, kh:kh + H, kw:kw + W, :] for kh in range(3) for kw in range(3)],
        axis=-1).reshape(N, H * W, 27)
    x0 = jnp.pad(patches, ((0, 0), (0, 0), (0, 5))).astype(jnp.bfloat16)

    # weights reshaped ONCE to the K-stacked im2col layout (9*Cin, Cout), bf16
    w0m = jnp.pad(w0.reshape(27, 32), ((0, 5), (0, 0))).astype(jnp.bfloat16)     # (32, 32)
    w1s = w1.reshape(9 * 32, 64).astype(jnp.bfloat16)                            # (288, 64)
    w2s = w2.reshape(9 * 64, 128).astype(jnp.bfloat16)                           # (576, 128)
    w3s = w3.reshape(9 * 128, 128).astype(jnp.bfloat16)                          # (1152, 128)
    w4s = jnp.pad(w4.reshape(9 * 128, 1), ((0, 0), (0, 127))).astype(jnp.bfloat16)

    # stride-2 selection: block-diagonal over the Bn samples of one grid step; exact
    # 0/1 bf16 selection of bf16 values.
    j = jnp.arange(H1 * W1)
    src = (j // W1) * (2 * W) + (j % W1) * 2
    rows = jnp.arange(Bn * H1 * W1)
    src_b = (rows // (H1 * W1)) * (H * W) + src[rows % (H1 * W1)]
    sel = (src_b[:, None] == jnp.arange(Bn * H * W)[None, :]).astype(jnp.bfloat16)

    # TODO(synk): for real image sizes, replace the whole-image-per-sample layout and the
    # O((H*W)^2) selection matmul with H-tiled blocks (1-row halo) and a reshape-based
    # stride-2 downsample, sized against v7x's 64 MiB VMEM; also switch the padded final
    # store to bf16 once output bytes are non-trivial.
    kernel = _make_fused_kernel(H, W, Bn)
    out = pl.pallas_call(
        kernel,
        out_shape=jax.ShapeDtypeStruct((N, H1 * W1, 128), jnp.float32),
        grid=(N // Bn,),
        in_specs=[
            pl.BlockSpec((Bn, H * W, 32), lambda n: (n, 0, 0)),
            # Weights / sel: constant index_map -> fetched once, resident in VMEM across
            # grid steps (optionally pipeline_mode=pl.Buffered(1) to drop the 2nd buffer
            # on v5e; omitted here to keep lowering conservative).
            pl.BlockSpec((32, 32), lambda n: (0, 0)),
            pl.BlockSpec((9 * 32, 64), lambda n: (0, 0)),
            pl.BlockSpec((Bn * H1 * W1, Bn * H * W), lambda n: (0, 0)),
            pl.BlockSpec((9 * 64, 128), lambda n: (0, 0)),
            pl.BlockSpec((9 * 128, 128), lambda n: (0, 0)),
            pl.BlockSpec((9 * 128, 128), lambda n: (0, 0)),
        ],
        out_specs=pl.BlockSpec((Bn, H1 * W1, 128), lambda n: (n, 0, 0)),
        compiler_params=pltpu.CompilerParams(
            dimension_semantics=("parallel",),   # sample blocks -> both v7x TensorCores
        ),
    )(x0, w0m, w1s, sel, w2s, w3s, w4s)

    # only channel 0 of the lane-padded final conv is real
    return out[:, :, 0].reshape(N, 1, H1, W1)


def init_discriminator_params(key, d_layers=1):
    """Deterministic synthetic init (initialize_weights in the original repo is external)."""
    specs = []
    channels = 32
    specs.append((3, channels, 1, False, True))                     # conv 3->32 s1 + lrelu
    for _ in range(d_layers):
        specs.append((channels, channels * 2, 2, False, True))      # s2 + lrelu
        specs.append((channels * 2, channels * 4, 1, True, True))   # s1 + IN + lrelu
        channels *= 4
    specs.append((channels, channels, 1, True, True))               # s1 + IN + lrelu
    specs.append((channels, 1, 1, False, False))                    # final conv -> 1 channel

    params = []
    for (cin, cout, stride, instnorm, lrelu) in specs:
        key, sub = jax.random.split(key)
        scale = (2.0 / (9.0 * cin)) ** 0.5
        w = scale * jax.random.normal(sub, (3, 3, cin, cout), dtype=jnp.float32)
        params.append({"w": w, "stride": stride, "instnorm": instnorm, "lrelu": lrelu})
    return params


# ------------------------- pure-JAX reference (for validation) -------------------------
def _ref_forward(img_nchw, params):
    x = jnp.transpose(img_nchw, (0, 2, 3, 1)).astype(jnp.float32)
    for p in params:
        s = p["stride"]
        x = lax.conv_general_dilated(
            x, p["w"], window_strides=(s, s), padding=((1, 1), (1, 1)),
            dimension_numbers=("NHWC", "HWIO", "NHWC"),
        )
        if p["instnorm"]:
            m = jnp.mean(x, axis=(1, 2), keepdims=True)
            v = jnp.mean((x - m) ** 2, axis=(1, 2), keepdims=True)
            x = (x - m) * lax.rsqrt(v + IN_EPS)
        if p["lrelu"]:
            x = jnp.where(x > 0, x, LRELU_SLOPE * x)
    return jnp.transpose(x, (0, 3, 1, 2))


if __name__ == "__main__":
    key = jax.random.PRNGKey(0)
    key, k_img = jax.random.split(key)

    params = init_discriminator_params(key, d_layers=1)
    assert len(params) == 5  # fused kernel is specialized for d_layers=1
    ws = [p["w"] for p in params]

    # batch=2, 3 channels (RGB), 16x16 spatial, NCHW like PyTorch.
    # (N=2 -> 1 sample per grid step, grid=(2,) parallel: both v7x TensorCores busy.)
    img = jax.random.normal(k_img, (2, 3, 16, 16), dtype=jnp.float32)
    out = jax.block_until_ready(discriminator_forward(img, *ws))
    assert out.shape == (2, 1, 8, 8), (out.shape, (2, 1, 8, 8))
    ref = jax.block_until_ready(_ref_forward(img, params))
    max_err = float(jnp.max(jnp.abs(out - ref)))
    # bf16 matmul operands (f32 accumulation) -> bf16-level agreement with f32 reference
    assert jnp.allclose(out, ref, rtol=2e-2, atol=2e-2), max_err

    # batch=8 exercises the batched path (4 samples per grid step, grid=(2,)).
    key, k_img8 = jax.random.split(key)
    img8 = jax.random.normal(k_img8, (8, 3, 16, 16), dtype=jnp.float32)
    out8 = jax.block_until_ready(discriminator_forward(img8, *ws))
    assert out8.shape == (8, 1, 8, 8), (out8.shape, (8, 1, 8, 8))
    ref8 = jax.block_until_ready(_ref_forward(img8, params))
    max_err8 = float(jnp.max(jnp.abs(out8 - ref8)))
    assert jnp.allclose(out8, ref8, rtol=2e-2, atol=2e-2), max_err8

    print("KERNEL_OK")
</pallas_src>

<mosaic_0001>
module attributes {stable_mosaic.version = 11 : i64} {
  func.func @kernel(%arg0: i32, %arg1: memref<1x256x32xbf16, #tpu.memory_space<vmem>>, %arg2: memref<32x32xbf16, #tpu.memory_space<vmem>>, %arg3: memref<288x64xbf16, #tpu.memory_space<vmem>>, %arg4: memref<64x256xbf16, #tpu.memory_space<vmem>>, %arg5: memref<576x128xbf16, #tpu.memory_space<vmem>>, %arg6: memref<1152x128xbf16, #tpu.memory_space<vmem>>, %arg7: memref<1152x128xbf16, #tpu.memory_space<vmem>>, %arg8: memref<1x64x128xf32, #tpu.memory_space<vmem>>) attributes {dimension_semantics = [#tpu.dimension_semantics<parallel>], iteration_bounds = array<i64: 2>, scalar_prefetch = 0 : i64, scratch_operands = 0 : i64, tpu.core_type = #tpu.core_type<tc>, window_params = [{transform_indices = @transform_0, window_bounds = array<i64: 1, 256, 32>}, {pipeline_mode = #tpu.pipeline_mode<synchronous>, transform_indices = @transform_1, window_bounds = array<i64: 32, 32>}, {pipeline_mode = #tpu.pipeline_mode<synchronous>, transform_indices = @transform_2, window_bounds = array<i64: 288, 64>}, {pipeline_mode = #tpu.pipeline_mode<synchronous>, transform_indices = @transform_3, window_bounds = array<i64: 64, 256>}, {pipeline_mode = #tpu.pipeline_mode<synchronous>, transform_indices = @transform_4, window_bounds = array<i64: 576, 128>}, {pipeline_mode = #tpu.pipeline_mode<synchronous>, transform_indices = @transform_5, window_bounds = array<i64: 1152, 128>}, {pipeline_mode = #tpu.pipeline_mode<synchronous>, transform_indices = @transform_6, window_bounds = array<i64: 1152, 128>}, {transform_indices = @transform_7, window_bounds = array<i64: 1, 64, 128>}]} {
    %0 = tpu.iota {dimensions = array<i32: 1>} : vector<1x320x1xi32>
    %c32_i32 = arith.constant 32 : i32
    %1 = vector.broadcast %c32_i32 : i32 to vector<1x320x1xi32>
    %2 = arith.subi %0, %1 : vector<1x320x1xi32>
    %c15_i32 = arith.constant 15 : i32
    %3 = vector.broadcast %c15_i32 : i32 to vector<1x320x1xi32>
    %4 = arith.andi %2, %3 : vector<1x320x1xi32>
    %c15_i32_0 = arith.constant 15 : i32
    %5 = vector.broadcast %c15_i32_0 : i32 to vector<1x320x1xi32>
    %6 = arith.cmpi ne, %4, %5 : vector<1x320x1xi32>
    %7 = arith.extui %6 : vector<1x320x1xi1> to vector<1x320x1xi32>
    %8 = arith.sitofp %7 : vector<1x320x1xi32> to vector<1x320x1xf32>
    %9 = arith.truncf %8 : vector<1x320x1xf32> to vector<1x320x1xbf16>
    %c0_i32 = arith.constant 0 : i32
    %10 = vector.broadcast %c0_i32 : i32 to vector<1x320x1xi32>
    %11 = arith.cmpi ne, %4, %10 : vector<1x320x1xi32>
    %12 = arith.extui %11 : vector<1x320x1xi1> to vector<1x320x1xi32>
    %13 = arith.sitofp %12 : vector<1x320x1xi32> to vector<1x320x1xf32>
    %14 = arith.truncf %13 : vector<1x320x1xf32> to vector<1x320x1xbf16>
    %15 = tpu.iota {dimensions = array<i32: 1>} : vector<1x96x1xi32>
    %c16_i32 = arith.constant 16 : i32
    %16 = vector.broadcast %c16_i32 : i32 to vector<1x96x1xi32>
    %17 = arith.subi %15, %16 : vector<1x96x1xi32>
    %c7_i32 = arith.constant 7 : i32
    %18 = vector.broadcast %c7_i32 : i32 to vector<1x96x1xi32>
    %19 = arith.andi %17, %18 : vector<1x96x1xi32>
    %c7_i32_1 = arith.constant 7 : i32
    %20 = vector.broadcast %c7_i32_1 : i32 to vector<1x96x1xi32>
    %21 = arith.cmpi ne, %19, %20 : vector<1x96x1xi32>
    %22 = arith.extui %21 : vector<1x96x1xi1> to vector<1x96x1xi32>
    %23 = arith.sitofp %22 : vector<1x96x1xi32> to vector<1x96x1xf32>
    %24 = arith.truncf %23 : vector<1x96x1xf32> to vector<1x96x1xbf16>
    %c0_i32_2 = arith.constant 0 : i32
    %25 = vector.broadcast %c0_i32_2 : i32 to vector<1x96x1xi32>
    %26 = arith.cmpi ne, %19, %25 : vector<1x96x1xi32>
    %27 = arith.extui %26 : vector<1x96x1xi1> to vector<1x96x1xi32>
    %28 = arith.sitofp %27 : vector<1x96x1xi32> to vector<1x96x1xf32>
    %29 = arith.truncf %28 : vector<1x96x1xf32> to vector<1x96x1xbf16>
    %c0 = arith.constant 0 : index
    %c0_3 = arith.constant 0 : index
    %c0_4 = arith.constant 0 : index
    %30 = vector.load %arg1[%c0, %c0_3, %c0_4] : memref<1x256x32xbf16, #tpu.memory_space<vmem>>, vector<1x256x32xbf16>
    %31 = vector.shape_cast %30 : vector<1x256x32xbf16> to vector<256x32xbf16>
    %c0_5 = arith.constant 0 : index
    %c0_6 = arith.constant 0 : index
    %32 = vector.load %arg2[%c0_5, %c0_6] : memref<32x32xbf16, #tpu.memory_space<vmem>>, vector<32x32xbf16>
    %cst = arith.constant dense<0.000000e+00> : vector<256x32xf32>
    %33 = tpu.matmul %31, %32, %cst {dimension_numbers = #tpu.dot_dimension_numbers<[1], [0], [0], [1], [0, 0, 1, 1], [], []>} : vector<256x32xbf16>, vector<32x32xbf16>, vector<256x32xf32> -> vector<256x32xf32>
    %cst_7 = arith.constant 0.000000e+00 : f32
    %34 = vector.broadcast %cst_7 : f32 to vector<256x32xf32>
    %35 = arith.cmpf ogt, %33, %34 : vector<256x32xf32>
    %cst_8 = arith.constant 2.000000e-01 : f32
    %36 = vector.broadcast %cst_8 : f32 to vector<256x32xf32>
    %37 = arith.mulf %36, %33 : vector<256x32xf32>
    %38 = arith.select %35, %33, %37 : vector<256x32xi1>, vector<256x32xf32>
    %39 = arith.truncf %38 : vector<256x32xf32> to vector<256x32xbf16>
    %40 = vector.shape_cast %39 : vector<256x32xbf16> to vector<1x256x32xbf16>
    %c0_9 = arith.constant 0 : index
    %c0_10 = arith.constant 0 : index
    %41 = vector.load %arg3[%c0_9, %c0_10] : memref<288x64xbf16, #tpu.memory_space<vmem>>, vector<288x64xbf16>
    %cst_11 = arith.constant 0.000000e+00 : bf16
    %42 = vector.broadcast %cst_11 : bf16 to vector<1x32x32xbf16>
    %43 = tpu.concatenate %42, %40, %42 in 1 : vector<1x32x32xbf16>, vector<1x256x32xbf16>, vector<1x32x32xbf16> -> vector<1x320x32xbf16>
    %44 = vector.broadcast %9 : vector<1x320x1xbf16> to vector<1x320x32xbf16>
    %45 = arith.mulf %43, %44 : vector<1x320x32xbf16>
    %46 = vector.broadcast %14 : vector<1x320x1xbf16> to vector<1x320x32xbf16>
    %47 = arith.mulf %43, %46 : vector<1x320x32xbf16>
    %48 = vector.extract_strided_slice %45 {offsets = [0, 15, 0], sizes = [1, 256, 32], strides = [1, 1, 1]} : vector<1x320x32xbf16> to vector<1x256x32xbf16>
    %49 = vector.extract_strided_slice %43 {offsets = [0, 16, 0], sizes = [1, 256, 32], strides = [1, 1, 1]} : vector<1x320x32xbf16> to vector<1x256x32xbf16>
    %50 = vector.extract_strided_slice %47 {offsets = [0, 17, 0], sizes = [1, 256, 32], strides = [1, 1, 1]} : vector<1x320x32xbf16> to vector<1x256x32xbf16>
    %51 = vector.extract_strided_slice %45 {offsets = [0, 31, 0], sizes = [1, 256, 32], strides = [1, 1, 1]} : vector<1x320x32xbf16> to vector<1x256x32xbf16>
    %52 = vector.extract_strided_slice %43 {offsets = [0, 32, 0], sizes = [1, 256, 32], strides = [1, 1, 1]} : vector<1x320x32xbf16> to vector<1x256x32xbf16>
    %53 = vector.extract_strided_slice %47 {offsets = [0, 33, 0], sizes = [1, 256, 32], strides = [1, 1, 1]} : vector<1x320x32xbf16> to vector<1x256x32xbf16>
    %54 = vector.extract_strided_slice %45 {offsets = [0, 47, 0], sizes = [1, 256, 32], strides = [1, 1, 1]} : vector<1x320x32xbf16> to vector<1x256x32xbf16>
    %55 = vector.extract_strided_slice %43 {offsets = [0, 48, 0], sizes = [1, 256, 32], strides = [1, 1, 1]} : vector<1x320x32xbf16> to vector<1x256x32xbf16>
    %56 = vector.extract_strided_slice %47 {offsets = [0, 49, 0], sizes = [1, 256, 32], strides = [1, 1, 1]} : vector<1x320x32xbf16> to vector<1x256x32xbf16>
    %57 = tpu.concatenate %48, %49, %50, %51, %52, %53, %54, %55, %56 in 2 : vector<1x256x32xbf16>, vector<1x256x32xbf16>, vector<1x256x32xbf16>, vector<1x256x32xbf16>, vector<1x256x32xbf16>, vector<1x256x32xbf16>, vector<1x256x32xbf16>, vector<1x256x32xbf16>, vector<1x256x32xbf16> -> vector<1x256x288xbf16>
    %58 = vector.shape_cast %57 : vector<1x256x288xbf16> to vector<256x288xbf16>
    %cst_12 = arith.constant dense<0.000000e+00> : vector<256x64xf32>
    %59 = tpu.matmul %58, %41, %cst_12 {dimension_numbers = #tpu.dot_dimension_numbers<[1], [0], [0], [1], [0, 0, 1, 1], [], []>} : vector<256x288xbf16>, vector<288x64xbf16>, vector<256x64xf32> -> vector<256x64xf32>
    %60 = vector.shape_cast %59 : vector<256x64xf32> to vector<1x256x64xf32>
    %cst_13 = arith.constant 0.000000e+00 : f32
    %61 = vector.broadcast %cst_13 : f32 to vector<1x256x64xf32>
    %62 = arith.cmpf ogt, %60, %61 : vector<1x256x64xf32>
    %cst_14 = arith.constant 2.000000e-01 : f32
    %63 = vector.broadcast %cst_14 : f32 to vector<1x256x64xf32>
    %64 = arith.mulf %63, %60 : vector<1x256x64xf32>
    %65 = arith.select %62, %60, %64 : vector<1x256x64xi1>, vector<1x256x64xf32>
    %66 = arith.truncf %65 : vector<1x256x64xf32> to vector<1x256x64xbf16>
    %67 = vector.shape_cast %66 : vector<1x256x64xbf16> to vector<256x64xbf16>
    %c0_15 = arith.constant 0 : index
    %c0_16 = arith.constant 0 : index
    %68 = vector.load %arg4[%c0_15, %c0_16] : memref<64x256xbf16, #tpu.memory_space<vmem>>, vector<64x256xbf16>
    %cst_17 = arith.constant dense<0.000000e+00> : vector<64x64xf32>
    %69 = tpu.matmul %68, %67, %cst_17 {dimension_numbers = #tpu.dot_dimension_numbers<[1], [0], [0], [1], [0, 0, 1, 1], [], []>} : vector<64x256xbf16>, vector<256x64xbf16>, vector<64x64xf32> -> vector<64x64xf32>
    %70 = arith.truncf %69 : vector<64x64xf32> to vector<64x64xbf16>
    %71 = vector.shape_cast %70 : vector<64x64xbf16> to vector<1x64x64xbf16>
    %c0_18 = arith.constant 0 : index
    %c0_19 = arith.constant 0 : index
    %72 = vector.load %arg5[%c0_18, %c0_19] : memref<576x128xbf16, #tpu.memory_space<vmem>>, vector<576x128xbf16>
    %cst_20 = arith.constant 0.000000e+00 : bf16
    %73 = vector.broadcast %cst_20 : bf16 to vector<1x16x64xbf16>
    %74 = tpu.concatenate %73, %71, %73 in 1 : vector<1x16x64xbf16>, vector<1x64x64xbf16>, vector<1x16x64xbf16> -> vector<1x96x64xbf16>
    %75 = vector.broadcast %24 : vector<1x96x1xbf16> to vector<1x96x64xbf16>
    %76 = arith.mulf %74, %75 : vector<1x96x64xbf16>
    %77 = vector.broadcast %29 : vector<1x96x1xbf16> to vector<1x96x64xbf16>
    %78 = arith.mulf %74, %77 : vector<1x96x64xbf16>
    %79 = vector.extract_strided_slice %76 {offsets = [0, 7, 0], sizes = [1, 64, 64], strides = [1, 1, 1]} : vector<1x96x64xbf16> to vector<1x64x64xbf16>
    %80 = vector.extract_strided_slice %74 {offsets = [0, 8, 0], sizes = [1, 64, 64], strides = [1, 1, 1]} : vector<1x96x64xbf16> to vector<1x64x64xbf16>
    %81 = vector.extract_strided_slice %78 {offsets = [0, 9, 0], sizes = [1, 64, 64], strides = [1, 1, 1]} : vector<1x96x64xbf16> to vector<1x64x64xbf16>
    %82 = vector.extract_strided_slice %76 {offsets = [0, 15, 0], sizes = [1, 64, 64], strides = [1, 1, 1]} : vector<1x96x64xbf16> to vector<1x64x64xbf16>
    %83 = vector.extract_strided_slice %74 {offsets = [0, 16, 0], sizes = [1, 64, 64], strides = [1, 1, 1]} : vector<1x96x64xbf16> to vector<1x64x64xbf16>
    %84 = vector.extract_strided_slice %78 {offsets = [0, 17, 0], sizes = [1, 64, 64], strides = [1, 1, 1]} : vector<1x96x64xbf16> to vector<1x64x64xbf16>
    %85 = vector.extract_strided_slice %76 {offsets = [0, 23, 0], sizes = [1, 64, 64], strides = [1, 1, 1]} : vector<1x96x64xbf16> to vector<1x64x64xbf16>
    %86 = vector.extract_strided_slice %74 {offsets = [0, 24, 0], sizes = [1, 64, 64], strides = [1, 1, 1]} : vector<1x96x64xbf16> to vector<1x64x64xbf16>
    %87 = vector.extract_strided_slice %78 {offsets = [0, 25, 0], sizes = [1, 64, 64], strides = [1, 1, 1]} : vector<1x96x64xbf16> to vector<1x64x64xbf16>
    %88 = tpu.concatenate %79, %80, %81, %82, %83, %84, %85, %86, %87 in 2 : vector<1x64x64xbf16>, vector<1x64x64xbf16>, vector<1x64x64xbf16>, vector<1x64x64xbf16>, vector<1x64x64xbf16>, vector<1x64x64xbf16>, vector<1x64x64xbf16>, vector<1x64x64xbf16>, vector<1x64x64xbf16> -> vector<1x64x576xbf16>
    %89 = vector.shape_cast %88 : vector<1x64x576xbf16> to vector<64x576xbf16>
    %cst_21 = arith.constant dense<0.000000e+00> : vector<64x128xf32>
    %90 = tpu.matmul %89, %72, %cst_21 {dimension_numbers = #tpu.dot_dimension_numbers<[1], [0], [0], [1], [0, 0, 1, 1], [], []>} : vector<64x576xbf16>, vector<576x128xbf16>, vector<64x128xf32> -> vector<64x128xf32>
    %91 = vector.shape_cast %90 : vector<64x128xf32> to vector<1x64x128xf32>
    %cst_22 = arith.constant dense<0.000000e+00> : vector<1x128xf32>
    %92 = vector.multi_reduction <add>, %91, %cst_22 [1] : vector<1x64x128xf32> to vector<1x128xf32>
    %93 = vector.shape_cast %92 : vector<1x128xf32> to vector<1x1x128xf32>
    %cst_23 = arith.constant 6.400000e+01 : f32
    %94 = vector.broadcast %cst_23 : f32 to vector<1x1x128xf32>
    %95 = arith.divf %93, %94 : vector<1x1x128xf32>
    %96 = vector.broadcast %95 : vector<1x1x128xf32> to vector<1x64x128xf32>
    %97 = arith.subf %91, %96 : vector<1x64x128xf32>
    %98 = arith.mulf %97, %97 : vector<1x64x128xf32>
    %cst_24 = arith.constant dense<0.000000e+00> : vector<1x128xf32>
    %99 = vector.multi_reduction <add>, %98, %cst_24 [1] : vector<1x64x128xf32> to vector<1x128xf32>
    %100 = vector.shape_cast %99 : vector<1x128xf32> to vector<1x1x128xf32>
    %cst_25 = arith.constant 6.400000e+01 : f32
    %101 = vector.broadcast %cst_25 : f32 to vector<1x1x128xf32>
    %102 = arith.divf %100, %101 : vector<1x1x128xf32>
    %cst_26 = arith.constant 9.99999974E-6 : f32
    %103 = vector.broadcast %cst_26 : f32 to vector<1x1x128xf32>
    %104 = arith.addf %102, %103 : vector<1x1x128xf32>
    %105 = math.rsqrt %104 : vector<1x1x128xf32>
    %106 = vector.broadcast %105 : vector<1x1x128xf32> to vector<1x64x128xf32>
    %107 = arith.mulf %97, %106 : vector<1x64x128xf32>
    %cst_27 = arith.constant 0.000000e+00 : f32
    %108 = vector.broadcast %cst_27 : f32 to vector<1x64x128xf32>
    %109 = arith.cmpf ogt, %107, %108 : vector<1x64x128xf32>
    %cst_28 = arith.constant 2.000000e-01 : f32
    %110 = vector.broadcast %cst_28 : f32 to vector<1x64x128xf32>
    %111 = arith.mulf %110, %107 : vector<1x64x128xf32>
    %112 = arith.select %109, %107, %111 : vector<1x64x128xi1>, vector<1x64x128xf32>
    %113 = arith.truncf %112 : vector<1x64x128xf32> to vector<1x64x128xbf16>
    %c0_29 = arith.constant 0 : index
    %c0_30 = arith.constant 0 : index
    %114 = vector.load %arg6[%c0_29, %c0_30] : memref<1152x128xbf16, #tpu.memory_space<vmem>>, vector<1152x128xbf16>
    %cst_31 = arith.constant 0.000000e+00 : bf16
    %115 = vector.broadcast %cst_31 : bf16 to vector<1x16x128xbf16>
    %116 = tpu.concatenate %115, %113, %115 in 1 : vector<1x16x128xbf16>, vector<1x64x128xbf16>, vector<1x16x128xbf16> -> vector<1x96x128xbf16>
    %117 = vector.broadcast %24 : vector<1x96x1xbf16> to vector<1x96x128xbf16>
    %118 = arith.mulf %116, %117 : vector<1x96x128xbf16>
    %119 = vector.broadcast %29 : vector<1x96x1xbf16> to vector<1x96x128xbf16>
    %120 = arith.mulf %116, %119 : vector<1x96x128xbf16>
    %121 = vector.extract_strided_slice %118 {offsets = [0, 7, 0], sizes = [1, 64, 128], strides = [1, 1, 1]} : vector<1x96x128xbf16> to vector<1x64x128xbf16>
    %122 = vector.extract_strided_slice %116 {offsets = [0, 8, 0], sizes = [1, 64, 128], strides = [1, 1, 1]} : vector<1x96x128xbf16> to vector<1x64x128xbf16>
    %123 = vector.extract_strided_slice %120 {offsets = [0, 9, 0], sizes = [1, 64, 128], strides = [1, 1, 1]} : vector<1x96x128xbf16> to vector<1x64x128xbf16>
    %124 = vector.extract_strided_slice %118 {offsets = [0, 15, 0], sizes = [1, 64, 128], strides = [1, 1, 1]} : vector<1x96x128xbf16> to vector<1x64x128xbf16>
    %125 = vector.extract_strided_slice %116 {offsets = [0, 16, 0], sizes = [1, 64, 128], strides = [1, 1, 1]} : vector<1x96x128xbf16> to vector<1x64x128xbf16>
    %126 = vector.extract_strided_slice %120 {offsets = [0, 17, 0], sizes = [1, 64, 128], strides = [1, 1, 1]} : vector<1x96x128xbf16> to vector<1x64x128xbf16>
    %127 = vector.extract_strided_slice %118 {offsets = [0, 23, 0], sizes = [1, 64, 128], strides = [1, 1, 1]} : vector<1x96x128xbf16> to vector<1x64x128xbf16>
    %128 = vector.extract_strided_slice %116 {offsets = [0, 24, 0], sizes = [1, 64, 128], strides = [1, 1, 1]} : vector<1x96x128xbf16> to vector<1x64x128xbf16>
    %129 = vector.extract_strided_slice %120 {offsets = [0, 25, 0], sizes = [1, 64, 128], strides = [1, 1, 1]} : vector<1x96x128xbf16> to vector<1x64x128xbf16>
    %130 = tpu.concatenate %121, %122, %123, %124, %125, %126, %127, %128, %129 in 2 : vector<1x64x128xbf16>, vector<1x64x128xbf16>, vector<1x64x128xbf16>, vector<1x64x128xbf16>, vector<1x64x128xbf16>, vector<1x64x128xbf16>, vector<1x64x128xbf16>, vector<1x64x128xbf16>, vector<1x64x128xbf16> -> vector<1x64x1152xbf16>
    %131 = vector.shape_cast %130 : vector<1x64x1152xbf16> to vector<64x1152xbf16>
    %cst_32 = arith.constant dense<0.000000e+00> : vector<64x128xf32>
    %132 = tpu.matmul %131, %114, %cst_32 {dimension_numbers = #tpu.dot_dimension_numbers<[1], [0], [0], [1], [0, 0, 1, 1], [], []>} : vector<64x1152xbf16>, vector<1152x128xbf16>, vector<64x128xf32> -> vector<64x128xf32>
    %133 = vector.shape_cast %132 : vector<64x128xf32> to vector<1x64x128xf32>
    %cst_33 = arith.constant dense<0.000000e+00> : vector<1x128xf32>
    %134 = vector.multi_reduction <add>, %133, %cst_33 [1] : vector<1x64x128xf32> to vector<1x128xf32>
    %135 = vector.shape_cast %134 : vector<1x128xf32> to vector<1x1x128xf32>
    %cst_34 = arith.constant 6.400000e+01 : f32
    %136 = vector.broadcast %cst_34 : f32 to vector<1x1x128xf32>
    %137 = arith.divf %135, %136 : vector<1x1x128xf32>
    %138 = vector.broadcast %137 : vector<1x1x128xf32> to vector<1x64x128xf32>
    %139 = arith.subf %133, %138 : vector<1x64x128xf32>
    %140 = arith.mulf %139, %139 : vector<1x64x128xf32>
    %cst_35 = arith.constant dense<0.000000e+00> : vector<1x128xf32>
    %141 = vector.multi_reduction <add>, %140, %cst_35 [1] : vector<1x64x128xf32> to vector<1x128xf32>
    %142 = vector.shape_cast %141 : vector<1x128xf32> to vector<1x1x128xf32>
    %cst_36 = arith.constant 6.400000e+01 : f32
    %143 = vector.broadcast %cst_36 : f32 to vector<1x1x128xf32>
    %144 = arith.divf %142, %143 : vector<1x1x128xf32>
    %cst_37 = arith.constant 9.99999974E-6 : f32
    %145 = vector.broadcast %cst_37 : f32 to vector<1x1x128xf32>
    %146 = arith.addf %144, %145 : vector<1x1x128xf32>
    %147 = math.rsqrt %146 : vector<1x1x128xf32>
    %148 = vector.broadcast %147 : vector<1x1x128xf32> to vector<1x64x128xf32>
    %149 = arith.mulf %139, %148 : vector<1x64x128xf32>
    %cst_38 = arith.constant 0.000000e+00 : f32
    %150 = vector.broadcast %cst_38 : f32 to vector<1x64x128xf32>
    %151 = arith.cmpf ogt, %149, %150 : vector<1x64x128xf32>
    %cst_39 = arith.constant 2.000000e-01 : f32
    %152 = vector.broadcast %cst_39 : f32 to vector<1x64x128xf32>
    %153 = arith.mulf %152, %149 : vector<1x64x128xf32>
    %154 = arith.select %151, %149, %153 : vector<1x64x128xi1>, vector<1x64x128xf32>
    %155 = arith.truncf %154 : vector<1x64x128xf32> to vector<1x64x128xbf16>
    %c0_40 = arith.constant 0 : index
    %c0_41 = arith.constant 0 : index
    %156 = vector.load %arg7[%c0_40, %c0_41] : memref<1152x128xbf16, #tpu.memory_space<vmem>>, vector<1152x128xbf16>
    %cst_42 = arith.constant 0.000000e+00 : bf16
    %157 = vector.broadcast %cst_42 : bf16 to vector<1x16x128xbf16>
    %158 = tpu.concatenate %157, %155, %157 in 1 : vector<1x16x128xbf16>, vector<1x64x128xbf16>, vector<1x16x128xbf16> -> vector<1x96x128xbf16>
    %159 = vector.broadcast %24 : vector<1x96x1xbf16> to vector<1x96x128xbf16>
    %160 = arith.mulf %158, %159 : vector<1x96x128xbf16>
    %161 = vector.broadcast %29 : vector<1x96x1xbf16> to vector<1x96x128xbf16>
    %162 = arith.mulf %158, %161 : vector<1x96x128xbf16>
    %163 = vector.extract_strided_slice %160 {offsets = [0, 7, 0], sizes = [1, 64, 128], strides = [1, 1, 1]} : vector<1x96x128xbf16> to vector<1x64x128xbf16>
    %164 = vector.extract_strided_slice %158 {offsets = [0, 8, 0], sizes = [1, 64, 128], strides = [1, 1, 1]} : vector<1x96x128xbf16> to vector<1x64x128xbf16>
    %165 = vector.extract_strided_slice %162 {offsets = [0, 9, 0], sizes = [1, 64, 128], strides = [1, 1, 1]} : vector<1x96x128xbf16> to vector<1x64x128xbf16>
    %166 = vector.extract_strided_slice %160 {offsets = [0, 15, 0], sizes = [1, 64, 128], strides = [1, 1, 1]} : vector<1x96x128xbf16> to vector<1x64x128xbf16>
    %167 = vector.extract_strided_slice %158 {offsets = [0, 16, 0], sizes = [1, 64, 128], strides = [1, 1, 1]} : vector<1x96x128xbf16> to vector<1x64x128xbf16>
    %168 = vector.extract_strided_slice %162 {offsets = [0, 17, 0], sizes = [1, 64, 128], strides = [1, 1, 1]} : vector<1x96x128xbf16> to vector<1x64x128xbf16>
    %169 = vector.extract_strided_slice %160 {offsets = [0, 23, 0], sizes = [1, 64, 128], strides = [1, 1, 1]} : vector<1x96x128xbf16> to vector<1x64x128xbf16>
    %170 = vector.extract_strided_slice %158 {offsets = [0, 24, 0], sizes = [1, 64, 128], strides = [1, 1, 1]} : vector<1x96x128xbf16> to vector<1x64x128xbf16>
    %171 = vector.extract_strided_slice %162 {offsets = [0, 25, 0], sizes = [1, 64, 128], strides = [1, 1, 1]} : vector<1x96x128xbf16> to vector<1x64x128xbf16>
    %172 = tpu.concatenate %163, %164, %165, %166, %167, %168, %169, %170, %171 in 2 : vector<1x64x128xbf16>, vector<1x64x128xbf16>, vector<1x64x128xbf16>, vector<1x64x128xbf16>, vector<1x64x128xbf16>, vector<1x64x128xbf16>, vector<1x64x128xbf16>, vector<1x64x128xbf16>, vector<1x64x128xbf16> -> vector<1x64x1152xbf16>
    %173 = vector.shape_cast %172 : vector<1x64x1152xbf16> to vector<64x1152xbf16>
    %cst_43 = arith.constant dense<0.000000e+00> : vector<64x128xf32>
    %174 = tpu.matmul %173, %156, %cst_43 {dimension_numbers = #tpu.dot_dimension_numbers<[1], [0], [0], [1], [0, 0, 1, 1], [], []>} : vector<64x1152xbf16>, vector<1152x128xbf16>, vector<64x128xf32> -> vector<64x128xf32>
    %175 = vector.shape_cast %174 : vector<64x128xf32> to vector<1x64x128xf32>
    %c0_44 = arith.constant 0 : index
    %c0_45 = arith.constant 0 : index
    %c0_46 = arith.constant 0 : index
    %176 = vector.load %arg8[%c0_44, %c0_45, %c0_46] : memref<1x64x128xf32, #tpu.memory_space<vmem>>, vector<1x64x128xf32>
    tpu.vector_store %arg8[%c0_44, %c0_45, %c0_46], %175 {strides = array<i32>} : memref<1x64x128xf32, #tpu.memory_space<vmem>>, vector<1x64x128xf32>,
    return
  }
  func.func @transform_0(%arg0: i32) -> (i32, i32, i32) {
    %c0_i32 = arith.constant 0 : i32
    %c0_i32_0 = arith.constant 0 : i32
    %c0_i32_1 = arith.constant 0 : i32
    return %arg0, %c0_i32, %c0_i32_0 : i32, i32, i32
  }
  func.func @transform_1(%arg0: i32) -> (i32, i32) {
    %c0_i32 = arith.constant 0 : i32
    %c0_i32_0 = arith.constant 0 : i32
    %c0_i32_1 = arith.constant 0 : i32
    return %c0_i32, %c0_i32_0 : i32, i32
  }
  func.func @transform_2(%arg0: i32) -> (i32, i32) {
    %c0_i32 = arith.constant 0 : i32
    %c0_i32_0 = arith.constant 0 : i32
    %c0_i32_1 = arith.constant 0 : i32
    return %c0_i32, %c0_i32_0 : i32, i32
  }
  func.func @transform_3(%arg0: i32) -> (i32, i32) {
    %c0_i32 = arith.constant 0 : i32
    %c0_i32_0 = arith.constant 0 : i32
    %c0_i32_1 = arith.constant 0 : i32
    return %c0_i32, %c0_i32_0 : i32, i32
  }
  func.func @transform_4(%arg0: i32) -> (i32, i32) {
    %c0_i32 = arith.constant 0 : i32
    %c0_i32_0 = arith.constant 0 : i32
    %c0_i32_1 = arith.constant 0 : i32
    return %c0_i32, %c0_i32_0 : i32, i32
  }
  func.func @transform_5(%arg0: i32) -> (i32, i32) {
    %c0_i32 = arith.constant 0 : i32
    %c0_i32_0 = arith.constant 0 : i32
    %c0_i32_1 = arith.constant 0 : i32
    return %c0_i32, %c0_i32_0 : i32, i32
  }
  func.func @transform_6(%arg0: i32) -> (i32, i32) {
    %c0_i32 = arith.constant 0 : i32
    %c0_i32_0 = arith.constant 0 : i32
    %c0_i32_1 = arith.constant 0 : i32
    return %c0_i32, %c0_i32_0 : i32, i32
  }
  func.func @transform_7(%arg0: i32) -> (i32, i32, i32) {
    %c0_i32 = arith.constant 0 : i32
    %c0_i32_0 = arith.constant 0 : i32
    %c0_i32_1 = arith.constant 0 : i32
    return %arg0, %c0_i32, %c0_i32_0 : i32, i32, i32
  }
}

</mosaic_0001>

<bundles_post_ra>
// kernel: squeeze.1
= control target key start
LH: loop header
LB: loop body
LE: loop exit
PB: predicated region body
PF: predicated region fallthrough
CT: control target
= control target key end

     0   :  { %s135_s0 = inlined_call_operand.vmem [shape: f32[2,64], index: 0, kind: input, shape index: {}]   ;;  %s136_s1 = inlined_call_operand.hbm [shape: f32[2,1,8,8], index: 1, kind: output, shape index: {}]  }
   0x1   :  { %v5_v0 = vld [vmem:[%s135_s0] sm:$0x3] }
   0x2   :  { %6 = vst [vmem:[#allocation2] sm:$0x3] %v5_v0 }
   0x3   :  { %2 = vsyncpa [#allocation1], 0  ;;  %s94_s0 = smov 120   ;;  %s95_s8 = smov 104   ;;  %vm8_vm0 = vcmask 64512  }
   0x4   :  { %s96_s9 = smov 112   ;;  %s97_s10 = smov 96  }
   0x5   :  { %s98_s11 = smov 88   ;;  %s99_s12 = smov 80  }
   0x6   :  { %s100_s13 = smov 72   ;;  %s101_s14 = smov [#allocation0]  }
   0x7   :  { %s56_s15 = sshll.u32 %s101_s14, 4  ;;  %s57_s15 = int_to_ptr.vmem [resolvable:$true] %s56_s15 }
   0x8   :  { %s70_s16 = scalar_lea.vmem %s57_s15, 256  ;;  %p75_p1 = scmp.lt.s32.totalorder %s57_s15, %s57_s15 }
   0x9   :  { %v10_v1 = vld [vmem:[#allocation2] sm:$0x3]   ;;  %p71_p0 = scmp.ne.s32.totalorder %s57_s15, %s70_s16  ;;  %p76_p2 = scmp.lt.s32.totalorder %s70_s16, %s70_s16 }
   0xa   :  { %v22_v2 = vld [vmem:[#allocation2] sm:$0x3]   ;;  %11 = vrot.lane.b32.xlu0 %v10_v1, %s94_s0 }
   0xb   :  { %23 = vrot.lane.b32.xlu1 %v22_v2, %s95_s8  ;;  %v16_v3 = vld [vmem:[#allocation2] sm:$0x3]   ;;  %p77_p3 = por %p76_p2, %p75_p1 }
   0xc   :  { %v28_v4 = vld [vmem:[#allocation2] sm:$0x3]  }
   0xd   :  { %v7_v5 = vld [vmem:[#allocation2] sm:$0x3]   ;;  %p78_p4 = pnand %p77_p3, %p71_p0 }
   0xe   :  { %9 = vst.msk [vmem:[#allocation0] ss:$8 sm:$0x3] %vm8_vm0, %v7_v5   ;;  %17 = vrot.lane.b32.xlu0 %v16_v3, %s96_s9  ;;  %v34_v6 = vld [vmem:[#allocation2] sm:$0x3]  }
   0xf   :  { %29 = vrot.lane.b32.xlu1 %v28_v4, %s97_s10  ;;  %v40_v7 = vld [vmem:[#allocation2] sm:$0x3]  }
  0x10   :  { %v46_v8 = vld [vmem:[#allocation2] sm:$0x3]  }
  0x12   :  { %35 = vrot.lane.b32.xlu0 %v34_v6, %s98_s11 }
  0x13   :  { %41 = vrot.lane.b32.xlu1 %v40_v7, %s99_s12 }
  0x16   :  { %47 = vrot.lane.b32.xlu0 %v46_v8, %s100_s13 }
  0x7c   :  { %v12_v9 = vpop.permute.xlu0 %11  }
  0x7d   :  { %v24_v10 = vpop.permute.xlu1 %23   ;;  %15 = vst.msk [vmem:[#allocation0 + $0x1] ss:$8 sm:$0x3] %vm8_vm0, %v12_v9  }
  0x7e   :  { %27 = vst.msk [vmem:[#allocation0 + $0x3] ss:$8 sm:$0x3] %vm8_vm0, %v24_v10  }
  0x80   :  { %v18_v11 = vpop.permute.xlu0 %17  }
  0x81   :  { %v30_v12 = vpop.permute.xlu1 %29   ;;  %21 = vst.msk [vmem:[#allocation0 + $0x2] ss:$8 sm:$0x3] %vm8_vm0, %v18_v11  }
  0x82   :  { %33 = vst.msk [vmem:[#allocation0 + $0x4] ss:$8 sm:$0x3] %vm8_vm0, %v30_v12  }
  0x84   :  { %v36_v13 = vpop.permute.xlu0 %35  }
  0x85   :  { %v42_v14 = vpop.permute.xlu1 %41   ;;  %39 = vst.msk [vmem:[#allocation0 + $0x5] ss:$8 sm:$0x3] %vm8_vm0, %v36_v13  }
  0x86   :  { %45 = vst.msk [vmem:[#allocation0 + $0x6] ss:$8 sm:$0x3] %vm8_vm0, %v42_v14  }
  0x88   :  { %v48_v15 = vpop.permute.xlu0 %47  }
  0x89   :  { %51 = vst.msk [vmem:[#allocation0 + $0x7] ss:$8 sm:$0x3] %vm8_vm0, %v48_v15  }
  0x8a   :  { %81 = shalt.err (!%p78_p4)
}
  0x8b   :  { %s82_s19 = scalar_lea.hbm %s136_s1, 256 }
  0x8c   :  { %p83_p5 = scmp.ne.s32.totalorder %s136_s1, %s82_s19  ;;  %p86_p6 = scmp.lt.u32.totalorder %s82_s19, %s136_s1 }
  0x8e   :  { %p88_p7 = pnand %p86_p6, %p83_p5 }
  0x90   :  { %91 = shalt.err (!%p88_p7)
}
  0x91   :  { %59 = dma.vmem_to_hbm [thread:$0]  %s57_s15, 256, %s136_s1, [#allocation1]  }
  0x92   :  { %92 = dma.done.wait [#allocation1], 256  }
  0x93   :  { %93 = vsyncadd [#allocation1], 4294967040 }
  0x94   :  { %61 = vsyncpa [#allocation1], 1 }

// kernel: discriminator_forward.1
= control target key start
LH: loop header
LB: loop body
LE: loop exit
PB: predicated region body
PF: predicated region fallthrough
CT: control target
= control target key end

     0   :  { %s8214_s24 = smov 0   ;;  %s11030_s0 = inlined_call_operand.vmem [shape: bf16[2,256,32], index: 0, kind: input, shape index: {}]   ;;  %s11031_s1 = inlined_call_operand.vmem [shape: bf16[32,32], index: 1, kind: input, shape index: {}]   ;;  %s11032_s2 = inlined_call_operand.vmem [shape: bf16[288,64], index: 2, kind: input, shape index: {}]   ;;  %s11033_s3 = inlined_call_operand.vmem [shape: bf16[64,256], index: 3, kind: input, shape index: {}]   ;;  %s11034_s4 = inlined_call_operand.vmem [shape: bf16[576,128], index: 4, kind: input, shape index: {}]   ;;  %s11035_s5 = inlined_call_operand.vmem [shape: bf16[1152,128], index: 5, kind: input, shape index: {}]   ;;  %s11036_s6 = inlined_call_operand.vmem [shape: bf16[1152,128], index: 6, kind: input, shape index: {}]   ;;  %s11037_s7 = inlined_call_operand.vmem [shape: f32[2,64,128], index: 7, kind: output, shape index: {}]  }
   0x1 LB: > { %s6768_s25 = sadd.s32 4294967295, %s8166_s24   ;;  %p6772_p0 = scmp.ge.s32.totalorder %s8166_s24, 1  ;;  %s8166_s24 = sphi %s8214_s24, %s17_s24  }
   0x2   : > { %p237_p1 = scmp.lt.s32.totalorder %s8166_s24, 3 }
   0x4   : > { %p238_p2 = pnand %p6772_p0, %p237_p1 }
   0x6   : > { %241 = sbr.rel (%p238_p2) target bundleno = 2184 (0x888), region = 48 }
   0xd   : > { %v7928_v0 = vld [vmem:[%s11031_s1] sm:$0xff]   ;;  %p269_p3 = scmp.lt.s32.totalorder %s6768_s25, 1  ;;  %v7929_v1 = vld [vmem:[%s11031_s1 + $0x8] sm:$0xff]   ;;  %vm901_vm0 = vcmask 261120   ;;  %v280_v18 = vlaneseq  ;;  %v11041_v26 = vmov 0.0   ;;  %v11039_v28 = vmov 1.0  }
   0xe   : > { %7773 = vmatprep.subr.bf16.mxu0 %v7928_v0  ;;  %s8170_s11 = smov 96   ;;  %s8171_s12 = smov 64   ;;  %v7946_v35 = vld [vmem:[%s11032_s2 + $0x80] sm:$0xff]   ;;  %v7947_v36 = vld [vmem:[%s11032_s2 + $0x88] sm:$0xff]  }
   0xf   : > { %s11123_s25 = smov (!%p269_p3, %s6768_s25), 1  ;;  %7774 = vmatpush3.bf16.msra.mxu0 %v7928_v0  ;;  %v8268_v19 = vshrl.u32 %v280_v18, 7  ;;  %s8173_s20 = smov 32  }
  0x10   : > { %7775 = vmatprep.subr.bf16.mxu0 %v7929_v1  ;;  %s7151_s30 = sshll.u32 %s11123_s25, 7 }
  0x11   : > { %s8234_s10 = scalar_lea.vmem %s11030_s0, %s7151_s30  ;;  %v8271_v20 = vadd.s32 24, %v8268_v19  ;;  %v283_v22 = vadd.s32 16, %v8268_v19  ;;  %v8296_v37 = vadd.s32 56, %v8268_v19  ;;  %v8299_v38 = vadd.s32 40, %v8268_v19 }
  0x12   : > { %v7930_v2 = vld [vmem:[%s8234_s10] sm:$0xff]   ;;  %v7931_v3 = vld [vmem:[%s8234_s10 + $0x8] sm:$0xff]   ;;  %v7932_v4 = vld [vmem:[%s8234_s10 + $0x10] sm:$0xff]   ;;  %v8304_v41 = vadd.s32 48, %v8268_v19  ;;  %v8307_v42 = vadd.s32 80, %v8268_v19  ;;  %v8310_v43 = vadd.s32 64, %v8268_v19 }
  0x13   : > { %7776 = vmatpush3.bf16.msra.mxu0 %v7929_v1  ;;  %7777 = vmatprep.mubr.msk.bf16.mxu0 %vm901_vm0, %v7930_v2  ;;  %v7933_v5 = vld [vmem:[%s8234_s10 + $0x18] sm:$0xff]   ;;  %v7934_v6 = vld [vmem:[%s8234_s10 + $0x20] sm:$0xff]   ;;  %v7935_v7 = vld [vmem:[%s8234_s10 + $0x28] sm:$0xff]   ;;  %11059 = vst [vmem:[#allocation2_spill] sm:$0xff] %v8271_v20  ;;  %v6780_v21 = vadd.s32 4294967264, %v8271_v20  ;;  %v6779_v24 = vadd.s32 4294967264, %v283_v22 }
  0x14   : > { %v7936_v8 = vld [vmem:[%s8234_s10 + $0x30] sm:$0xff]   ;;  %v7937_v9 = vld [vmem:[%s8234_s10 + $0x38] sm:$0xff]   ;;  %v7938_v10 = vld [vmem:[%s8234_s10 + $0x40] sm:$0xff]   ;;  %7809 = vmatprep.subr.bf16.mxu0 %v7946_v35  ;;  %11060 = vst [vmem:[#allocation3_spill] sm:$0xff] %v8296_v37  ;;  %v6783_v39 = vadd.s32 4294967264, %v8296_v37  ;;  %v6781_v40 = vadd.s32 4294967264, %v8299_v38 }
  0x15   : > { %v7939_v11 = vld [vmem:[%s8234_s10 + $0x48] sm:$0xff]   ;;  %v7940_v12 = vld [vmem:[%s8234_s10 + $0x50] sm:$0xff]   ;;  %v7941_v13 = vld [vmem:[%s8234_s10 + $0x58] sm:$0xff]   ;;  %v362_v23 = vand.u32 15, %v6780_v21  ;;  %v361_v25 = vand.u32 15, %v6779_v24  ;;  %11061 = vst [vmem:[#allocation4_spill] sm:$0xff] %v8299_v38 }
  0x16   : > { %7778 = vmatmul.mubr.msk.bf16.vlgmr.msra.gmra.mrb[0].mxu0 %vm901_vm0, %v7931_v3  ;;  %v7942_v14 = vld [vmem:[%s8234_s10 + $0x60] sm:$0xff]   ;;  %v7943_v15 = vld [vmem:[%s8234_s10 + $0x68] sm:$0xff]   ;;  %v7944_v16 = vld [vmem:[%s8234_s10 + $0x70] sm:$0xff]   ;;  %11062 = vst [vmem:[#allocation5_spill] sm:$0xff] %v8304_v41  ;;  %v366_v44 = vand.u32 15, %v6783_v39  ;;  %v364_v45 = vand.u32 15, %v6781_v40 }
  0x17   : > { %7781 = vmatprep.mubr.msk.bf16.mxu0 %vm901_vm0, %v7932_v4  ;;  %v7945_v17 = vld [vmem:[%s8234_s10 + $0x78] sm:$0xff]   ;;  %vm402_vm1 = vcmp.ne.s32.totalorder %v362_v23, 15  ;;  %vm532_vm2 = vcmp.ne.s32.totalorder %v361_v25, 0  ;;  %7810 = vmatpush3.bf16.msra.mxu0 %v7946_v35  ;;  %11063 = vst [vmem:[#allocation6_spill] sm:$0xff] %v8307_v42  ;;  %11064 = vst [vmem:[#allocation7_spill] sm:$0xff] %v8310_v43  ;;  %v6782_v46 = vadd.s32 4294967264, %v8304_v41 }
  0x18   : > { %v6817_v27 = vsel %vm402_vm1, 1.0, %v11041_v26  ;;  %v6835_v30 = vsel %vm532_vm2, 1.0, %v11041_v26  ;;  %7811 = vmatprep.subr.bf16.mxu0 %v7947_v36  ;;  %v6786_v47 = vadd.s32 4294967264, %v8307_v42  ;;  %v6784_v48 = vadd.s32 4294967264, %v8310_v43 }
  0x19   : > { %v8277_v29 = vpack.c.bf16 %v6817_v27, %v11039_v28  ;;  %v646_v32 = vpack.c.bf16 %v11039_v28, %v6835_v30  ;;  %vm406_vm3 = vcmp.ne.s32.totalorder %v366_v44, 15  ;;  %v363_v49 = vand.u32 15, %v8268_v19 }
  0x1a   : > { %vm404_vm4 = vcmp.ne.s32.totalorder %v364_v45, 15  ;;  %v365_v50 = vand.u32 15, %v6782_v46  ;;  %v8317_v51 = vadd.s32 88, %v8268_v19  ;;  %v369_v52 = vand.u32 15, %v6786_v47 }
  0x1b   : > { %v11038_v31 = vmul.bf16 0, %v8277_v29  ;;  %v1278_v33 = vmul.bf16 0, %v646_v32  ;;  %7812 = vmatpush3.bf16.msra.mxu0 %v7947_v36  ;;  %v294_v53 = vadd.s32 112, %v8268_v19  ;;  %v6819_v54 = vsel %vm406_vm3, 1.0, %v11041_v26 }
  0x1c   : > { %11065 = vst [vmem:[#allocation8_spill] sm:$0xff] %v8317_v51  ;;  %v367_v55 = vand.u32 15, %v6784_v48  ;;  %v6818_v56 = vsel %vm404_vm4, 1.0, %v11041_v26  ;;  %vm534_vm5 = vcmp.ne.s32.totalorder %v363_v49, 0  ;;  %v292_v57 = vadd.s32 96, %v8268_v19 }
  0x1d   : > { %1561 = vrot.lane.b32.xlu0 %v11038_v31, %s8170_s11  ;;  %v8285_v34 = vrot.slane %v1278_v33, 1  ;;  %v8324_v58 = vadd.s32 72, %v8268_v19  ;;  %vm536_vm6 = vcmp.ne.s32.totalorder %v365_v50, 0  ;;  %v6787_v59 = vadd.s32 4294967264, %v8317_v51 }
  0x1e   : > { %7782 = vmatmul.mubr.msk.bf16.gmra.mrb[4].mxu0 %vm901_vm0, %v7933_v5  ;;  %vm540_vm7 = vcmp.ne.s32.totalorder %v369_v52, 0  ;;  %v6790_v60 = vadd.s32 4294967264, %v294_v53  ;;  %v8328_v61 = vpack.c.bf16 %v6819_v54, %v11039_v28  ;;  %vm538_vm8 = vcmp.ne.s32.totalorder %v367_v55, 0 }
  0x1f   : > { %7785 = vmatprep.mubr.msk.bf16.mxu0 %vm901_vm0, %v7934_v6  ;;  %11066 = vst [vmem:[#allocation9_spill] sm:$0xff] %v8324_v58  ;;  %v8331_v62 = vpack.c.bf16 %v6818_v56, %v11039_v28  ;;  %v6836_v63 = vsel %vm534_vm5, 1.0, %v11041_v26  ;;  %v6788_v0 = vadd.s32 4294967264, %v292_v57  ;;  %v6837_v1 = vsel %vm536_vm6, 1.0, %v11041_v26 }
  0x20   : > { %v6785_v2 = vadd.s32 4294967264, %v8324_v58  ;;  %v6839_v3 = vsel %vm540_vm7, 1.0, %v11041_v26  ;;  %v370_v4 = vand.u32 15, %v6787_v59  ;;  %v298_v5 = vadd.s32 144, %v8268_v19 }
  0x21   : > { %1510 = vrot.lane.b32.xlu0 %v8285_v34, %s8171_s12  ;;  %v296_v6 = vadd.s32 128, %v8268_v19  ;;  %v299_v32 = vadd.s32 152, %v8268_v19  ;;  %v297_v36 = vadd.s32 136, %v8268_v19  ;;  %v306_v39 = vadd.s32 208, %v8268_v19 }
  0x22   : > { %v368_v21 = vand.u32 15, %v6785_v2  ;;  %vm8358_vm9 = vcmp.ne.s32.totalorder %v370_v4, 15  ;;  %v6794_v24 = vadd.s32 4294967264, %v298_v5  ;;  %v304_v45 = vadd.s32 192, %v8268_v19 }
  0x23   : > { %v6792_v25 = vadd.s32 4294967264, %v296_v6  ;;  %v310_v46 = vadd.s32 240, %v8268_v19  ;;  %v6821_v48 = vsel %vm8358_vm9, 1.0, %v11041_v26  ;;  %v6795_v54 = vadd.s32 4294967264, %v299_v32 }
  0x24   : > { %vm8369_vm12 = vcmp.ne.s32.totalorder %v368_v21, 15  ;;  %v377_v49 = vand.u32 15, %v6794_v24  ;;  %v308_v55 = vadd.s32 224, %v8268_v19  ;;  %v6793_v59 = vadd.s32 4294967264, %v297_v36  ;;  %v7948_v24 = vld [vmem:[%s11032_s2 + $0x40] sm:$0xff]  }
  0x25   : > { %v375_v50 = vand.u32 15, %v6792_v25  ;;  %v6806_v2 = vadd.s32 4294967264, %v310_v46  ;;  %v6820_v4 = vsel %vm8369_vm12, 1.0, %v11041_v26  ;;  %v378_v5 = vand.u32 15, %v6795_v54  ;;  %7171 = vmatprep.subr.bf16.mxu1 %v7948_v24  ;;  %v7949_v46 = vld [vmem:[%s11032_s2] sm:$0xff]  }
  0x26   : > { %7786 = vmatmul.mubr.msk.bf16.gmra.mrb[8].mxu0 %vm901_vm0, %v7935_v7  ;;  %v6838_v7 = vsel %vm538_vm8, 1.0, %v11041_v26  ;;  %vm548_vm13 = vcmp.ne.s32.totalorder %v377_v49, 0  ;;  %v6804_v6 = vadd.s32 4294967264, %v308_v55  ;;  %7172 = vmatpush3.bf16.msra.mxu1 %v7949_v46  ;;  %v8497_v46 = vadd.s32 256, %v8268_v19 }
  0x27   : > { %7789 = vmatprep.mubr.msk.bf16.mxu0 %vm901_vm0, %v7936_v8  ;;  %v373_v8 = vand.u32 15, %v6790_v60  ;;  %v8356_v22 = vpack.c.bf16 %v11039_v28, %v6838_v7  ;;  %v6802_v60 = vadd.s32 4294967264, %v306_v39  ;;  %vm546_vm14 = vcmp.ne.s32.totalorder %v375_v50, 0 }
  0x28   : > { %v376_v7 = vand.u32 15, %v6793_v59  ;;  %vm418_vm4 = vcmp.ne.s32.totalorder %v378_v5, 15 }
  0x29   : > { %vm544_vm10 = vcmp.ne.s32.totalorder %v373_v8, 0  ;;  %v385_v8 = vand.u32 15, %v6802_v60  ;;  %v6825_v50 = vsel %vm418_vm4, 1.0, %v11041_v26 }
  0x2a   : > { %v6841_v47 = vsel %vm544_vm10, 1.0, %v11041_v26  ;;  %vm8413_vm5 = vcmp.ne.s32.totalorder %v376_v7, 15  ;;  %v7951_v7 = vld [vmem:[%s11032_s2 + $0x8] sm:$0xff]  }
  0x2b   : > { %vm8417_vm6 = vcmp.ne.s32.totalorder %v385_v8, 0 }
  0x2e   : > { %7790 = vmatmul.mubr.msk.bf16.gmra.mrb[12].mxu0 %vm901_vm0, %v7937_v9  ;;  %v295_v9 = vadd.s32 120, %v8268_v19 }
  0x2f   : > { %7793 = vmatprep.mubr.msk.bf16.mxu0 %vm901_vm0, %v7938_v10  ;;  %v293_v10 = vadd.s32 104, %v8268_v19 }
  0x30   : > { %v6791_v27 = vadd.s32 4294967264, %v295_v9  ;;  %v6843_v9 = vsel %vm548_vm13, 1.0, %v11041_v26 }
  0x31   : > { %v6789_v30 = vadd.s32 4294967264, %v293_v10  ;;  %v6842_v10 = vsel %vm546_vm14, 1.0, %v11041_v26  ;;  %v8408_v32 = vpack.c.bf16 %v11039_v28, %v6843_v9 }
  0x32   : > { %v374_v52 = vand.u32 15, %v6791_v27 }
  0x33   : > { %v372_v53 = vand.u32 15, %v6789_v30  ;;  %v387_v30 = vand.u32 15, %v6804_v6  ;;  %v8466_v6 = vpack.c.bf16 %v6825_v50, %v11039_v28 }
  0x34   : > { %vm414_vm15 = vcmp.ne.s32.totalorder %v374_v52, 15  ;;  %v314_v52 = vadd.s32 272, %v8268_v19 }
  0x35   : > { %vm412_vm1 = vcmp.ne.s32.totalorder %v372_v53, 15  ;;  %v6823_v21 = vsel %vm414_vm15, 1.0, %v11041_v26  ;;  %v7950_v53 = vld [vmem:[%s11032_s2 + $0x48] sm:$0xff]   ;;  %vm8455_vm9 = vcmp.ne.s32.totalorder %v387_v30, 0  ;;  %vm1297_vm15 = vsmask.f32 7424 }
  0x36   : > { %7794 = vmatmul.mubr.msk.bf16.gmra.mrb[16].mxu0 %vm901_vm0, %v7939_v11  ;;  %v8343_v11 = vpack.c.bf16 %v11039_v28, %v6836_v63  ;;  %v6822_v23 = vsel %vm412_vm1, 1.0, %v11041_v26  ;;  %v8422_v39 = vpack.c.bf16 %v6823_v21, %v11039_v28  ;;  %7173 = vmatprep.subr.bf16.mxu1 %v7950_v53  ;;  %v6848_v9 = vsel %vm8455_vm9, 1.0, %v11041_v26 }
  0x37   : > { %7797 = vmatprep.mubr.msk.bf16.mxu0 %vm901_vm0, %v7940_v12  ;;  %v8346_v12 = vpack.c.bf16 %v11039_v28, %v6837_v1  ;;  %v6800_v1 = vadd.s32 4294967264, %v304_v45  ;;  %v8425_v40 = vpack.c.bf16 %v6822_v23, %v11039_v28  ;;  %7174 = vmatpush3.bf16.msra.mxu1 %v7951_v7  ;;  %v8494_v45 = vpack.c.bf16 %v11039_v28, %v6848_v9  ;;  %v7955_v7 = vld [vmem:[%s11032_s2 + $0x18] sm:$0xff]  }
  0x3e   : > { %7798 = vmatmul.mubr.msk.bf16.gmra.mrb[20].mxu0 %vm901_vm0, %v7941_v13  ;;  %v302_v13 = vadd.s32 176, %v8268_v19 }
  0x3f   : > { %7801 = vmatprep.mubr.msk.bf16.mxu0 %vm901_vm0, %v7942_v14  ;;  %v300_v14 = vadd.s32 160, %v8268_v19 }
  0x40   : > { %v6798_v33 = vadd.s32 4294967264, %v302_v13  ;;  %v383_v13 = vand.u32 15, %v6800_v1 }
  0x41   : > { %v6796_v35 = vadd.s32 4294967264, %v300_v14  ;;  %v389_v14 = vand.u32 15, %v6806_v2 }
  0x42   : > { %v381_v56 = vand.u32 15, %v6798_v33  ;;  %v8411_v33 = vpack.c.bf16 %v11039_v28, %v6842_v10  ;;  %vm8427_vm7 = vcmp.ne.s32.totalorder %v383_v13, 0  ;;  %v8474_v10 = vadd.s32 4294967264, %v314_v52 }
  0x43   : > { %v379_v57 = vand.u32 15, %v6796_v35  ;;  %vm8431_vm8 = vcmp.ne.s32.totalorder %v389_v14, 0  ;;  %v6846_v1 = vsel %vm8427_vm7, 1.0, %v11041_v26  ;;  %v7952_v35 = vld [vmem:[%s11032_s2 + $0x50] sm:$0xff]  }
  0x44   : > { %vm552_vm2 = vcmp.ne.s32.totalorder %v381_v56, 0  ;;  %v6824_v56 = vsel %vm8413_vm5, 1.0, %v11041_v26  ;;  %v6849_v2 = vsel %vm8431_vm8, 1.0, %v11041_v26  ;;  %v8485_v30 = vpack.c.bf16 %v11039_v28, %v6846_v1  ;;  %7175 = vmatprep.subr.bf16.mxu1 %v7952_v35 }
  0x45   : > { %vm550_vm3 = vcmp.ne.s32.totalorder %v379_v57, 0  ;;  %v6845_v25 = vsel %vm552_vm2, 1.0, %v11041_v26  ;;  %v6847_v57 = vsel %vm8417_vm6, 1.0, %v11041_v26  ;;  %v8478_v21 = vpack.c.bf16 %v6824_v56, %v11039_v28 }
  0x46   : > { %7802 = vmatmul.mubr.msk.bf16.gmra.mrb[24].mxu0 %vm901_vm0, %v7943_v15  ;;  %v8351_v15 = vpack.c.bf16 %v11039_v28, %v6839_v3  ;;  %v8387_v3 = vpack.c.bf16 %v11039_v28, %v6841_v47  ;;  %v6844_v27 = vsel %vm550_vm3, 1.0, %v11041_v26  ;;  %v8481_v23 = vpack.c.bf16 %v11039_v28, %v6847_v57 }
  0x47   : > { %7805 = vmatprep.mubr.msk.bf16.mxu0 %vm901_vm0, %v7944_v16  ;;  %v371_v16 = vand.u32 15, %v6788_v0  ;;  %v8384_v0 = vpack.c.bf16 %v6821_v48, %v11039_v28  ;;  %v8439_v48 = vpack.c.bf16 %v11039_v28, %v6845_v25  ;;  %v8442_v49 = vpack.c.bf16 %v11039_v28, %v6844_v27 }
  0x48   : > { %v8491_v44 = vpack.c.bf16 %v11039_v28, %v6849_v2  ;;  %vm1953_vm6 = vsmask.f32 256 }
  0x49   : > { %vm8365_vm11 = vcmp.ne.s32.totalorder %v371_v16, 0 }
  0x4a   : > { %v6840_v63 = vsel %vm8365_vm11, 1.0, %v11041_v26  ;;  %vm1476_vm11 = vcmask 1046528  }
  0x4b   : > { %v8395_v16 = vpack.c.bf16 %v11039_v28, %v6840_v63 }
  0x4e   : > { %7806 = vmatmul.mubr.msk.bf16.gmra.mrb[28].mxu0 %vm901_vm0, %v7945_v17  ;;  %v8172_v17 = vmov 0  }
  0x4f   : > { %v8353_v18 = vrot.slane %v8172_v17, 1  ;;  %v8398_v17 = vpack.c.bf16 %v6820_v4, %v11039_v28 }
  0x51   : > { %11067 = vst [vmem:[#allocation10_spill] sm:$0xff] %v8353_v18 }
  0xe9   : > { %v7779_v47 = vpop.f32.mrb[0].mxu0 }
  0xea   : > { %v1145_v54 = vmul.f32 0.2, %v7779_v47  ;;  %v984_v55 = vpop.f32.mrb[1].mxu0  ;;  %vm1113_vm10 = vcmp.gt.f32.partialorder %v7779_v47, 0.0 }
  0xeb   : > { %v1143_v60 = vmul.f32 0.2, %v984_v55  ;;  %v7780_v63 = vpop.f32.mrb[2].mxu0  ;;  %vm1111_vm12 = vcmp.gt.f32.partialorder %v984_v55, 0.0 }
  0xec   : > { %vm1114_vm13 = vcmp.gt.f32.partialorder %v7780_v63, 0.0  ;;  %v1146_v4 = vmul.f32 0.2, %v7780_v63  ;;  %v987_v5 = vpop.f32.mrb[3].mxu0  ;;  %v1177_v13 = vsel %vm1113_vm10, %v7779_v47, %v1145_v54  ;;  %v7953_v47 = vld [vmem:[%s11032_s2 + $0x10] sm:$0xff]  }
  0xed   : > { %vm1112_vm14 = vcmp.gt.f32.partialorder %v987_v5, 0.0  ;;  %v1144_v8 = vmul.f32 0.2, %v987_v5  ;;  %v1175_v24 = vsel %vm1111_vm12, %v984_v55, %v1143_v60  ;;  %v393_v55 = vand.u32 15, %v8474_v10  ;;  %7176 = vmatpush3.bf16.msra.mxu1 %v7953_v47 }
  0xee   : > { %v1178_v14 = vsel %vm1114_vm13, %v7780_v63, %v1146_v4 }
  0xef   : > { %v1208_v25 = vpack.c.bf16 %v1178_v14, %v1177_v13  ;;  %v1176_v27 = vsel %vm1112_vm14, %v987_v5, %v1144_v8  ;;  %vm8606_vm10 = vcmp.ne.s32.totalorder %v393_v55, 0 }
  0xf0   : > { %v1207_v36 = vpack.c.bf16 %v1176_v27, %v1175_v24 }
  0xf1   : > { %v7783_v50 = vpop.f32.mrb[4].mxu0  ;;  %v8503_v52 = vmul.bf16 %v1208_v25, %v8328_v61  ;;  %v1314_v53 = vshll.u32 %v1208_v25, 16  ;;  %v1280_v54 = vmul.bf16 %v1208_v25, %v8346_v12  ;;  %v7954_v61 = vld [vmem:[%s11032_s2 + $0x58] sm:$0xff]   ;;  %v1318_v35 = vshrl.u32 %v1208_v25, 16 }
  0xf2   : > { %vm1117_vm1 = vcmp.gt.f32.partialorder %v7783_v50, 0.0  ;;  %v1149_v56 = vmul.f32 0.2, %v7783_v50  ;;  %v1000_v57 = vpop.f32.mrb[5].mxu0  ;;  %v8508_v59 = vmul.bf16 %v1207_v36, %v8331_v62  ;;  %v1279_v60 = vmul.bf16 %v1207_v36, %v8343_v11  ;;  %7177 = vmatprep.subr.bf16.mxu1 %v7954_v61 }
  0xf3   : > { %vm1115_vm2 = vcmp.gt.f32.partialorder %v1000_v57, 0.0  ;;  %v1147_v63 = vmul.f32 0.2, %v1000_v57  ;;  %1565 = vrot.lane.b32.xlu0 %v8503_v52, %s8170_s11  ;;  %1643 = vrot.lane.b32.xlu1 %v8503_v52, %s8171_s12  ;;  %v7784_v12 = vpop.f32.mrb[6].mxu0  ;;  %v1316_v1 = vrot.slane %v1314_v53, 1  ;;  %v8518_v2 = vrot.slane %v1280_v54, 1 }
  0xf4   : > { %v1181_v62 = vsel %vm1117_vm1, %v7783_v50, %v1149_v56  ;;  %vm1118_vm3 = vcmp.gt.f32.partialorder %v7784_v12, 0.0  ;;  %v1150_v11 = vmul.f32 0.2, %v7784_v12  ;;  %v1003_v4 = vpop.f32.mrb[7].mxu0  ;;  %v1478_v5 = vrot.slane %v1279_v60, 1  ;;  %7178 = vmatpush3.bf16.msra.mxu1 %v7955_v7 }
  0xf5   : > { %v1179_v8 = vsel %vm1115_vm2, %v1000_v57, %v1147_v63  ;;  %vm1116_vm4 = vcmp.gt.f32.partialorder %v1003_v4, 0.0  ;;  %v1148_v9 = vmul.f32 0.2, %v1003_v4  ;;  %v1306_v13 = vshll.u32 %v1207_v36, 16 }
  0xf6   : > { %v1182_v14 = vsel %vm1118_vm3, %v7784_v12, %v1150_v11  ;;  %v8525_v24 = vsel %vm1476_vm11, %v1478_v5, %v8518_v2  ;;  %v1975_v27 = vshrl.u32 %v8518_v2, 16  ;;  %v1310_v54 = vshrl.u32 %v1207_v36, 16  ;;  %v7957_v11 = vld [vmem:[%s11032_s2 + $0x20] sm:$0xff]  }
  0xf7   : > { %v8528_v47 = vpack.c.bf16 %v1182_v14, %v1181_v62  ;;  %v1180_v50 = vsel %vm1116_vm4, %v1003_v4, %v1148_v9  ;;  %1641 = vrot.lane.b32.xlu1 %v8508_v59, %s8171_s12  ;;  %1563 = vrot.lane.b32.xlu0 %v8508_v59, %s8170_s11  ;;  %v8534_v53 = vrot.slane %v1306_v13, 1  ;;  %v1479_v57 = vsel %vm1476_vm11, %v8285_v34, %v1478_v5  ;;  %v7956_v34 = vld [vmem:[%s11032_s2 + $0x60] sm:$0xff]  }
  0xf8   : > { %v8536_v56 = vpack.c.bf16 %v1180_v50, %v1179_v8  ;;  %v8540_v60 = vrot.slane %v1975_v27, 7  ;;  %v8542_v25 = vor.u32 %v1318_v35, %v1316_v1  ;;  %7179 = vmatprep.subr.bf16.mxu1 %v7956_v34 }
  0xf9   : > { %v1282_v61 = vmul.bf16 %v8528_v47, %v8351_v15  ;;  %v7787_v63 = vpop.f32.mrb[8].mxu0  ;;  %v1309_v12 = vsel %vm1297_vm15, %v8353_v18, %v8534_v53  ;;  %v8551_v36 = vmul.bf16 %v8528_v47, %v8384_v0  ;;  %v1312_v62 = vor.u32 %v1310_v54, %v8534_v53  ;;  %v7958_v0 = vld [vmem:[%s11032_s2 + $0x68] sm:$0xff]   ;;  %7180 = vmatpush3.bf16.msra.mxu1 %v7957_v11 }
  0xfa   : > { %v1281_v15 = vmul.bf16 %v8536_v56, %v8356_v22  ;;  %vm1121_vm5 = vcmp.gt.f32.partialorder %v7787_v63, 0.0  ;;  %v1153_v4 = vmul.f32 0.2, %v7787_v63  ;;  %v1016_v7 = vpop.f32.mrb[9].mxu0  ;;  %v7923_v8 = vpack.i.bf16 %v8353_v18, %v1309_v12  ;;  %7181 = vmatprep.subr.bf16.mxu1 %v7958_v0 }
  0xfb   : > { %11084 = vst [vmem:[#allocation11_spill] sm:$0xff] %v8551_v36  ;;  %v8566_v9 = vrot.slane %v1282_v61, 1  ;;  %vm1119_vm7 = vcmp.gt.f32.partialorder %v1016_v7, 0.0  ;;  %v1151_v13 = vmul.f32 0.2, %v1016_v7  ;;  %1676 = vrot.lane.b32.xlu1 %v1316_v1, %s8170_s11  ;;  %1606 = vrot.lane.b32.xlu0 %v1478_v5, %s8173_s20  ;;  %v7788_v22 = vpop.f32.mrb[10].mxu0  ;;  %v8572_v14 = vmul.bf16 %v8536_v56, %v8398_v17 }
  0xfc   : > { %v1482_v27 = vrot.slane %v1281_v15, 1  ;;  %v1185_v35 = vsel %vm1121_vm5, %v7787_v63, %v1153_v4  ;;  %vm1122_vm8 = vcmp.gt.f32.partialorder %v7788_v22, 0.0  ;;  %v1154_v50 = vmul.f32 0.2, %v7788_v22  ;;  %v1019_v54 = vpop.f32.mrb[11].mxu0  ;;  %v7959_v5 = vld [vmem:[%s11032_s2 + $0x28] sm:$0xff]  }
  0xfd   : > { %v1183_v61 = vsel %vm1119_vm7, %v1016_v7, %v1151_v13  ;;  %vm1120_vm9 = vcmp.gt.f32.partialorder %v1019_v54, 0.0  ;;  %v1152_v12 = vmul.f32 0.2, %v1019_v54  ;;  %v8575_v31 = vsel %vm1297_vm15, %v1312_v62, %v1316_v1  ;;  %7182 = vmatpush3.bf16.msra.mxu1 %v7959_v5 }
  0xfe   : > { %v8582_v17 = vsel %vm1476_vm11, %v1482_v27, %v8566_v9  ;;  %v1186_v63 = vsel %vm1122_vm8, %v7788_v22, %v1154_v50  ;;  %v8586_v15 = vsel %vm1476_vm11, %v8518_v2, %v1482_v27  ;;  %v1322_v34 = vshll.u32 %v8536_v56, 16 }
  0xff   : > { %v8589_v4 = vpack.c.bf16 %v1186_v63, %v1185_v35  ;;  %v1184_v1 = vsel %vm1120_vm9, %v1019_v54, %v1152_v12  ;;  %1512 = vrot.lane.b32.xlu1 %v1479_v57, %s8171_s12  ;;  %1608 = vrot.lane.b32.xlu0 %v8525_v24, %s8173_s20  ;;  %v1979_v62 = vshrl.u32 %v8586_v15, 16  ;;  %v1982_v11 = vshll.u32 %v8586_v15, 16 }
 0x100   : > { %v8596_v7 = vpack.c.bf16 %v1184_v1, %v1183_v61  ;;  %v2001_v2 = vshrl.u32 %v8582_v17, 16  ;;  %v2004_v13 = vshll.u32 %v8582_v17, 16  ;;  %v1324_v22 = vrot.slane %v1322_v34, 1 }
 0x101   : > { %v1284_v0 = vmul.bf16 %v8589_v4, %v8387_v3  ;;  %v7791_v27 = vpop.f32.mrb[12].mxu0  ;;  %v1981_v35 = vrot.slane %v1979_v62, 7  ;;  %v1326_v57 = vshrl.u32 %v8536_v56, 16  ;;  %v1330_v50 = vshll.u32 %v8528_v47, 16 }
 0x102   : > { %v1283_v61 = vmul.bf16 %v8596_v7, %v8395_v16  ;;  %vm1125_vm12 = vcmp.gt.f32.partialorder %v7791_v27, 0.0  ;;  %v1157_v12 = vmul.f32 0.2, %v7791_v27  ;;  %v8612_v63 = vrot.slane %v2001_v2, 7  ;;  %v1032_v3 = vpop.f32.mrb[13].mxu0  ;;  %v7960_v16 = vld [vmem:[%s11032_s2 + $0x70] sm:$0xff]  }
 0x103   : > { %v8614_v34 = vrot.slane %v1284_v0, 1  ;;  %7924 = vrot.lane.b32.xlu0 %v7923_v8, %s8173_s20  ;;  %1647 = vrot.lane.b32.xlu1 %v8551_v36, %s8171_s12  ;;  %v1984_v10 = vor.u32 %v1982_v11, %v1981_v35  ;;  %vm1123_vm13 = vcmp.gt.f32.partialorder %v1032_v3, 0.0  ;;  %v1155_v55 = vmul.f32 0.2, %v1032_v3  ;;  %v7792_v56 = vpop.f32.mrb[14].mxu0  ;;  %v7961_v8 = vld [vmem:[%s11032_s2 + $0x30] sm:$0xff]  }
 0x104   : > { %v1486_v5 = vrot.slane %v1283_v61, 1  ;;  %v1189_v1 = vsel %vm1125_vm12, %v7791_v27, %v1157_v12  ;;  %v2006_v62 = vor.u32 %v2004_v13, %v8612_v63  ;;  %vm1126_vm14 = vcmp.gt.f32.partialorder %v7792_v56, 0.0  ;;  %v1035_v2 = vpop.f32.mrb[15].mxu0  ;;  %v7962_v11 = vld [vmem:[%s11032_s2 + $0x78] sm:$0xff]   ;;  %7183 = vmatprep.subr.bf16.mxu1 %v7960_v16 }
 0x105   : > { %v1985_v0 = vsel %vm1953_vm6, %v8540_v60, %v1984_v10  ;;  %v1187_v28 = vsel %vm1123_vm13, %v1032_v3, %v1155_v55  ;;  %v1158_v26 = vmul.f32 0.2, %v7792_v56  ;;  %vm1124_vm1 = vcmp.gt.f32.partialorder %v1035_v2, 0.0  ;;  %7184 = vmatpush3.bf16.msra.mxu1 %v7961_v8  ;;  %v7963_v60 = vld [vmem:[%s11032_s2 + $0x38] sm:$0xff]  }
 0x106   : > { %7813 = vmatprep.mubr.msk.bf16.mxu0 %vm901_vm0, %v1985_v0  ;;  %v2007_v13 = vsel %vm1953_vm6, %v1981_v35, %v2006_v62  ;;  %v1156_v27 = vmul.f32 0.2, %v1035_v2  ;;  %v8635_v61 = vsel %vm1297_vm15, %v8542_v25, %v1324_v22  ;;  %v8639_v12 = vsel %vm1476_vm11, %v8566_v9, %v1486_v5  ;;  %7185 = vmatprep.subr.bf16.mxu1 %v7962_v11 }
 0x107   : > { %1514 = vrot.lane.b32.xlu0 %v8525_v24, %s8171_s12  ;;  %7814 = vmatmul.mubr.msk.bf16.vlgmr.msra.gmra.mrb[32].mxu0 %vm901_vm0, %v2007_v13  ;;  %v1190_v35 = vsel %vm1126_vm14, %v7792_v56, %v1158_v26  ;;  %v2023_v3 = vshrl.u32 %v8639_v12, 16  ;;  %v2026_v25 = vshll.u32 %v8639_v12, 16  ;;  %v8652_v9 = vsel %vm1476_vm11, %v1486_v5, %v8614_v34 }
 0x108   : > { %1645 = vrot.lane.b32.xlu1 %v8572_v14, %s8171_s12  ;;  %v8656_v10 = vpack.c.bf16 %v1190_v35, %v1189_v1  ;;  %v1188_v55 = vsel %vm1124_vm1, %v1035_v2, %v1156_v27  ;;  %v2045_v24 = vshrl.u32 %v8652_v9, 16  ;;  %v2048_v16 = vshll.u32 %v8652_v9, 16 }
 0x109   : > { %v8661_v26 = vpack.c.bf16 %v1188_v55, %v1187_v28  ;;  %v2025_v56 = vrot.slane %v2023_v3, 7  ;;  %v1328_v62 = vor.u32 %v1326_v57, %v1324_v22  ;;  %v1332_v8 = vrot.slane %v1330_v50, 1  ;;  %v7795_v0 = vpop.f32.mrb[16].mxu0  ;;  %7186 = vmatpush3.bf16.msra.mxu1 %v7963_v60 }
 0x10a   : > { %v1286_v5 = vmul.bf16 %v8656_v10, %v8408_v32  ;;  %v8665_v13 = vrot.slane %v2045_v24, 7  ;;  %vm1129_vm2 = vcmp.gt.f32.partialorder %v7795_v0, 0.0  ;;  %v1048_v1 = vpop.f32.mrb[17].mxu0  ;;  %v8668_v2 = vadd.s32 4294967264, %v8497_v46 }
 0x10b   : > { %v1285_v11 = vmul.bf16 %v8661_v26, %v8411_v33  ;;  %1429 = vrot.lane.b32.xlu0 %v8575_v31, %s8173_s20  ;;  %v2028_v28 = vor.u32 %v2026_v25, %v2025_v56  ;;  %v8675_v22 = vsel %vm1297_vm15, %v1328_v62, %v1332_v8  ;;  %v1161_v57 = vmul.f32 0.2, %v7795_v0  ;;  %v7796_v32 = vpop.f32.mrb[18].mxu0 }
 0x10c   : > { %v8677_v50 = vrot.slane %v1286_v5, 1  ;;  %1678 = vrot.lane.b32.xlu1 %v8635_v61, %s8170_s11  ;;  %v2050_v46 = vor.u32 %v2048_v16, %v8665_v13  ;;  %vm1127_vm3 = vcmp.gt.f32.partialorder %v1048_v1, 0.0  ;;  %v1051_v27 = vpop.f32.mrb[19].mxu0  ;;  %v11087_v60 = vmov 0.0  }
 0x10d   : > { %v8685_v33 = vsel %vm8606_vm10, 1.0, %v11087_v60  ;;  %v1490_v35 = vrot.slane %v1285_v11, 1  ;;  %v2029_v3 = vsel %vm1953_vm6, %v8612_v63, %v2028_v28  ;;  %v1193_v25 = vsel %vm1129_vm2, %v7795_v0, %v1161_v57 }
 0x10e   : > { %v1159_v55 = vmul.f32 0.2, %v1048_v1  ;;  %7817 = vmatprep.mubr.msk.bf16.mxu0 %vm901_vm0, %v2029_v3  ;;  %v2051_v24 = vsel %vm1953_vm6, %v2025_v56, %v2050_v46  ;;  %vm1130_vm4 = vcmp.gt.f32.partialorder %v7796_v32, 0.0  ;;  %v1162_v16 = vmul.f32 0.2, %v7796_v32 }
 0x10f   : > { %vm1128_vm5 = vcmp.gt.f32.partialorder %v1051_v27, 0.0  ;;  %1569 = vrot.lane.b32.xlu0 %v8551_v36, %s8170_s11  ;;  %7818 = vmatmul.mubr.msk.bf16.gmra.mrb[36].mxu0 %vm901_vm0, %v2051_v24  ;;  %v8697_v54 = vsel %vm1476_vm11, %v8614_v34, %v1490_v35  ;;  %v8701_v63 = vsel %vm1476_vm11, %v1490_v35, %v8677_v50  ;;  %v1160_v0 = vmul.f32 0.2, %v1051_v27 }
 0x110   : > { %v1191_v62 = vsel %vm1127_vm3, %v1048_v1, %v1159_v55  ;;  %1610 = vrot.lane.b32.xlu1 %v8586_v15, %s8173_s20  ;;  %v2067_v56 = vshrl.u32 %v8697_v54, 16  ;;  %v2070_v5 = vshll.u32 %v8697_v54, 16  ;;  %v2089_v11 = vshrl.u32 %v8701_v63, 16 }
 0x111   : > { %v2092_v28 = vshll.u32 %v8701_v63, 16  ;;  %v1194_v34 = vsel %vm1130_vm4, %v7796_v32, %v1162_v16  ;;  %v1192_v57 = vsel %vm1128_vm5, %v1051_v27, %v1160_v0  ;;  %v1334_v46 = vshrl.u32 %v8528_v47, 16  ;;  %v7799_v3 = vpop.f32.mrb[20].mxu0 }
 0x112   : > { %v1338_v35 = vshll.u32 %v8596_v7, 16  ;;  %v2069_v1 = vrot.slane %v2067_v56, 7  ;;  %v8712_v55 = vrot.slane %v2089_v11, 7  ;;  %v8714_v24 = vpack.c.bf16 %v1194_v34, %v1193_v25  ;;  %v1064_v51 = vpop.f32.mrb[21].mxu0 }
 0x113   : > { %v8716_v42 = vpack.c.bf16 %v1192_v57, %v1191_v62  ;;  %1567 = vrot.lane.b32.xlu0 %v8572_v14, %s8170_s11  ;;  %v1336_v43 = vor.u32 %v1334_v46, %v1332_v8  ;;  %v1342_v32 = vshrl.u32 %v8596_v7, 16  ;;  %v1346_v47 = vshll.u32 %v8589_v4, 16  ;;  %v7800_v27 = vpop.f32.mrb[22].mxu0 }
 0x114   : > { %v1340_v58 = vrot.slane %v1338_v35, 1  ;;  %1612 = vrot.lane.b32.xlu1 %v8582_v17, %s8173_s20  ;;  %v2072_v16 = vor.u32 %v2070_v5, %v2069_v1  ;;  %v2094_v25 = vor.u32 %v2092_v28, %v8712_v55  ;;  %v1288_v62 = vmul.bf16 %v8714_v24, %v8439_v48  ;;  %v1067_v56 = vpop.f32.mrb[23].mxu0 }
 0x115   : > { %v1287_v0 = vmul.bf16 %v8716_v42, %v8442_v49  ;;  %v8731_v8 = vmul.bf16 %v8589_v4, %v8422_v39  ;;  %v1348_v57 = vrot.slane %v1346_v47, 1  ;;  %v8746_v39 = vmul.bf16 %v8596_v7, %v8425_v40 }
 0x116   : > { %v8734_v11 = vsel %vm1297_vm15, %v1336_v43, %v1340_v58  ;;  %v1344_v34 = vor.u32 %v1342_v32, %v1340_v58  ;;  %v2073_v5 = vsel %vm1953_vm6, %v8665_v13, %v2072_v16  ;;  %v2095_v28 = vsel %vm1953_vm6, %v2069_v1, %v2094_v25 }
 0x117   : > { %11088 = vst [vmem:[#allocation12_spill] sm:$0xff] %v8731_v8  ;;  %v8739_v46 = vrot.slane %v1288_v62, 1  ;;  %v1494_v48 = vrot.slane %v1287_v0, 1  ;;  %1431 = vrot.lane.b32.xlu0 %v8635_v61, %s8173_s20  ;;  %7821 = vmatprep.mubr.msk.bf16.mxu0 %vm901_vm0, %v2073_v5  ;;  %vm1133_vm7 = vcmp.gt.f32.partialorder %v7799_v3, 0.0  ;;  %v1165_v58 = vmul.f32 0.2, %v7799_v3 }
 0x118   : > { %v8749_v43 = vsel %vm1297_vm15, %v1344_v34, %v1348_v57  ;;  %1680 = vrot.lane.b32.xlu1 %v8675_v22, %s8170_s11  ;;  %7822 = vmatmul.mubr.msk.bf16.gmra.mrb[40].mxu0 %vm901_vm0, %v2095_v28  ;;  %vm1131_vm8 = vcmp.gt.f32.partialorder %v1064_v51, 0.0  ;;  %v1163_v40 = vmul.f32 0.2, %v1064_v51  ;;  %vm1134_vm9 = vcmp.gt.f32.partialorder %v7800_v27, 0.0 }
 0x119   : > { %v8756_v49 = vsel %vm1476_vm11, %v8677_v50, %v1494_v48  ;;  %v8760_v13 = vsel %vm1476_vm11, %v1494_v48, %v8739_v46  ;;  %v7803_v47 = vpop.f32.mrb[24].mxu0  ;;  %v1197_v16 = vsel %vm1133_vm7, %v7799_v3, %v1165_v58  ;;  %v1166_v50 = vmul.f32 0.2, %v7800_v27 }
 0x11a   : > { %v2111_v7 = vshrl.u32 %v8756_v49, 16  ;;  %v2114_v35 = vshll.u32 %v8756_v49, 16  ;;  %v2133_v1 = vshrl.u32 %v8760_v13, 16  ;;  %v2136_v32 = vshll.u32 %v8760_v13, 16  ;;  %v1080_v62 = vpop.f32.mrb[25].mxu0 }
 0x11b   : > { %v1195_v25 = vsel %vm1131_vm8, %v1064_v51, %v1163_v40  ;;  %1516 = vrot.lane.b32.xlu0 %v8586_v15, %s8171_s12  ;;  %vm1132_vm10 = vcmp.gt.f32.partialorder %v1067_v56, 0.0  ;;  %v1164_v5 = vmul.f32 0.2, %v1067_v56  ;;  %v7804_v28 = vpop.f32.mrb[26].mxu0  ;;  %v1198_v48 = vsel %vm1134_vm9, %v7800_v27, %v1166_v50 }
 0x11c   : > { %v2113_v0 = vrot.slane %v2111_v7, 7  ;;  %v8768_v34 = vrot.slane %v2133_v1, 7  ;;  %1651 = vrot.lane.b32.xlu1 %v8731_v8, %s8171_s12  ;;  %v1350_v38 = vshrl.u32 %v8589_v4, 16  ;;  %v1354_v51 = vshll.u32 %v8661_v26, 16  ;;  %v1083_v58 = vpop.f32.mrb[27].mxu0 }
 0x11d   : > { %v1358_v3 = vshrl.u32 %v8661_v26, 16  ;;  %v8776_v7 = vpack.c.bf16 %v1198_v48, %v1197_v16  ;;  %v1196_v1 = vsel %vm1132_vm10, %v1067_v56, %v1164_v5  ;;  %v1362_v18 = vshll.u32 %v8656_v10, 16 }
 0x11e   : > { %v2116_v40 = vor.u32 %v2114_v35, %v2113_v0  ;;  %v2138_v15 = vor.u32 %v2136_v32, %v8768_v34  ;;  %v8778_v20 = vpack.c.bf16 %v1196_v1, %v1195_v25  ;;  %v1352_v41 = vor.u32 %v1350_v38, %v1348_v57 }
 0x11f   : > { %v1356_v37 = vrot.slane %v1354_v51, 1  ;;  %1518 = vrot.lane.b32.xlu0 %v8582_v17, %s8171_s12  ;;  %v1290_v35 = vmul.bf16 %v8776_v7, %v8481_v23  ;;  %v11089_v32 = vmov 1.0   ;;  %v1364_v57 = vrot.slane %v1362_v18, 1 }
 0x120   : > { %v2117_v4 = vsel %vm1953_vm6, %v8712_v55, %v2116_v40  ;;  %v2139_v27 = vsel %vm1953_vm6, %v2113_v0, %v2138_v15  ;;  %v8790_v56 = vpack.c.bf16 %v11089_v32, %v8685_v33  ;;  %1649 = vrot.lane.b32.xlu1 %v8746_v39, %s8171_s12  ;;  %v1289_v38 = vmul.bf16 %v8778_v20, %v8485_v30 }
 0x121   : > { %7825 = vmatprep.mubr.msk.bf16.mxu0 %vm901_vm0, %v2117_v4  ;;  %v8798_v17 = vsel %vm1297_vm15, %v1352_v41, %v1356_v37  ;;  %v1360_v55 = vor.u32 %v1358_v3, %v1356_v37  ;;  %v1500_v23 = vrot.slane %v1290_v35, 1  ;;  %vm1137_vm12 = vcmp.gt.f32.partialorder %v7803_v47, 0.0  ;;  %v8801_v33 = vpop.f32.mrb[28].mxu0 }
 0x122   : > { %7826 = vmatmul.mubr.msk.bf16.gmra.mrb[44].mxu0 %vm901_vm0, %v2139_v27  ;;  %v1169_v16 = vmul.f32 0.2, %v7803_v47  ;;  %v391_v25 = vand.u32 15, %v8668_v2  ;;  %v1498_v50 = vrot.slane %v1289_v38, 1  ;;  %vm1135_vm13 = vcmp.gt.f32.partialorder %v1080_v62, 0.0  ;;  %v1096_v5 = vpop.f32.mrb[29].mxu0 }
 0x123   : > { %v8805_v0 = vsel %vm1297_vm15, %v1360_v55, %v1364_v57  ;;  %v1167_v30 = vmul.f32 0.2, %v1080_v62  ;;  %1433 = vrot.lane.b32.xlu0 %v8675_v22, %s8173_s20  ;;  %vm1138_vm14 = vcmp.gt.f32.partialorder %v7804_v28, 0.0  ;;  %v1170_v41 = vmul.f32 0.2, %v7804_v28  ;;  %v8809_v18 = vpop.f32.mrb[30].mxu0 }
 0x124   : > { %v1201_v37 = vsel %vm1137_vm12, %v7803_v47, %v1169_v16  ;;  %vm1136_vm1 = vcmp.gt.f32.partialorder %v1083_v58, 0.0  ;;  %1682 = vrot.lane.b32.xlu1 %v8734_v11, %s8170_s11  ;;  %v8815_v2 = vsel %vm1476_vm11, %v8739_v46, %v1498_v50  ;;  %v8818_v48 = vsel %vm1476_vm11, %v1498_v50, %v1500_v23  ;;  %v8820_v40 = vpop.f32.mrb[31].mxu0 }
 0x125   : > { %v1199_v51 = vsel %vm1135_vm13, %v1080_v62, %v1167_v30  ;;  %v1168_v3 = vmul.f32 0.2, %v1083_v58  ;;  %v2155_v47 = vshrl.u32 %v8815_v2, 16  ;;  %v2158_v15 = vshll.u32 %v8815_v2, 16 }
 0x126   : > { %v2177_v1 = vshrl.u32 %v8818_v48, 16  ;;  %v2180_v4 = vshll.u32 %v8818_v48, 16  ;;  %v1202_v27 = vsel %vm1138_vm14, %v7804_v28, %v1170_v41  ;;  %v1366_v46 = vshrl.u32 %v8656_v10, 16 }
 0x127   : > { %v1200_v35 = vsel %vm1136_vm1, %v1083_v58, %v1168_v3  ;;  %v1370_v38 = vshll.u32 %v8716_v42, 16  ;;  %1573 = vrot.lane.b32.xlu0 %v8731_v8, %s8170_s11  ;;  %v2157_v62 = vrot.slane %v2155_v47, 7  ;;  %v8830_v16 = vpack.c.bf16 %v1202_v27, %v1201_v37 }
 0x128   : > { %v2179_v55 = vrot.slane %v2177_v1, 7  ;;  %v8832_v50 = vpack.c.bf16 %v1200_v35, %v1199_v51  ;;  %1614 = vrot.lane.b32.xlu1 %v8639_v12, %s8173_s20  ;;  %v1368_v30 = vor.u32 %v1366_v46, %v1364_v57  ;;  %v1374_v28 = vshrl.u32 %v8716_v42, 16 }
 0x129   : > { %v1372_v36 = vrot.slane %v1370_v38, 1  ;;  %v1378_v58 = vshll.u32 %v8714_v24, 16  ;;  %v2160_v41 = vor.u32 %v2158_v15, %v2157_v62  ;;  %v1292_v8 = vmul.bf16 %v8830_v16, %v8491_v44 }
 0x12a   : > { %v2182_v3 = vor.u32 %v2180_v4, %v2179_v55  ;;  %v1291_v37 = vmul.bf16 %v8832_v50, %v8494_v45  ;;  %vm8845_vm2 = vcmp.ne.s32.totalorder %v391_v25, 0  ;;  %vm1141_vm3 = vcmp.gt.f32.partialorder %v8801_v33, 0.0 }
 0x12b   : > { %v8843_v51 = vsel %vm1297_vm15, %v1368_v30, %v1372_v36  ;;  %v1376_v47 = vor.u32 %v1374_v28, %v1372_v36  ;;  %v1380_v1 = vrot.slane %v1378_v58, 1  ;;  %1571 = vrot.lane.b32.xlu0 %v8746_v39, %s8170_s11  ;;  %v2161_v15 = vsel %vm1953_vm6, %v8768_v34, %v2160_v41 }
 0x12c   : > { %v2183_v44 = vsel %vm1953_vm6, %v2157_v62, %v2182_v3  ;;  %v8854_v4 = vrot.slane %v1292_v8, 1  ;;  %v1502_v45 = vrot.slane %v1291_v37, 1  ;;  %1616 = vrot.lane.b32.xlu1 %v8652_v9, %s8173_s20  ;;  %v8860_v36 = vmul.bf16 %v8656_v10, %v8466_v6  ;;  %7829 = vmatprep.mubr.msk.bf16.mxu0 %vm901_vm0, %v2161_v15 }
 0x12d   : > { %v8864_v25 = vsel %vm1297_vm15, %v1376_v47, %v1380_v1  ;;  %v1173_v34 = vmul.f32 0.2, %v8801_v33  ;;  %7830 = vmatmul.mubr.msk.bf16.gmra.mrb[48].mxu0 %vm901_vm0, %v2183_v44  ;;  %vm1139_vm4 = vcmp.gt.f32.partialorder %v1096_v5, 0.0  ;;  %v1171_v6 = vmul.f32 0.2, %v1096_v5 }
 0x12e   : > { %v8870_v8 = vsel %vm1476_vm11, %v1500_v23, %v1502_v45  ;;  %v8874_v27 = vsel %vm1476_vm11, %v1502_v45, %v8854_v4  ;;  %vm1142_vm5 = vcmp.gt.f32.partialorder %v8809_v18, 0.0  ;;  %v1174_v30 = vmul.f32 0.2, %v8809_v18 }
 0x12f   : > { %v2199_v10 = vshrl.u32 %v8870_v8, 16  ;;  %v2202_v35 = vshll.u32 %v8870_v8, 16  ;;  %v2221_v46 = vshrl.u32 %v8874_v27, 16  ;;  %v2224_v38 = vshll.u32 %v8874_v27, 16  ;;  %1435 = vrot.lane.b32.xlu0 %v8734_v11, %s8173_s20 }
 0x130   : > { %v1205_v23 = vsel %vm1141_vm3, %v8801_v33, %v1173_v34  ;;  %v1203_v62 = vsel %vm1139_vm4, %v1096_v5, %v1171_v6  ;;  %1684 = vrot.lane.b32.xlu1 %v8749_v43, %s8170_s11  ;;  %v6850_v41 = vsel %vm8845_vm2, 1.0, %v11087_v60  ;;  %vm1140_vm7 = vcmp.gt.f32.partialorder %v8820_v40, 0.0 }
 0x131   : > { %v2201_v28 = vrot.slane %v2199_v10, 7  ;;  %v8887_v58 = vrot.slane %v2221_v46, 7  ;;  %v1206_v3 = vsel %vm1142_vm5, %v8809_v18, %v1174_v30  ;;  %v661_v33 = vpack.c.bf16 %v11089_v32, %v6850_v41 }
 0x132   : > { %v1172_v5 = vmul.f32 0.2, %v8820_v40  ;;  %v1382_v37 = vshrl.u32 %v8714_v24, 16  ;;  %v8898_v44 = vpack.c.bf16 %v1206_v3, %v1205_v23  ;;  %v1386_v45 = vshll.u32 %v8778_v20, 16 }
 0x133   : > { %v2204_v47 = vor.u32 %v2202_v35, %v2201_v28  ;;  %v2226_v15 = vor.u32 %v2224_v38, %v8887_v58  ;;  %1520 = vrot.lane.b32.xlu0 %v8639_v12, %s8171_s12  ;;  %v303_v57 = vadd.s32 184, %v8268_v19  ;;  %v1390_v6 = vshrl.u32 %v8778_v20, 16 }
 0x134   : > { %v1204_v18 = vsel %vm1140_vm7, %v8820_v40, %v1172_v5  ;;  %v1384_v34 = vor.u32 %v1382_v37, %v1380_v1  ;;  %1655 = vrot.lane.b32.xlu1 %v8860_v36, %s8171_s12  ;;  %v1294_v46 = vmul.bf16 %v8898_v44, %v8790_v56  ;;  %v1388_v12 = vrot.slane %v1386_v45, 1 }
 0x135   : > { %v2205_v10 = vsel %vm1953_vm6, %v2179_v55, %v2204_v47  ;;  %v2227_v35 = vsel %vm1953_vm6, %v2201_v28, %v2226_v15  ;;  %v8912_v38 = vpack.c.bf16 %v1204_v18, %v1203_v62  ;;  %v1394_v40 = vshll.u32 %v8776_v7, 16 }
 0x136   : > { %7833 = vmatprep.mubr.msk.bf16.mxu0 %vm901_vm0, %v2205_v10  ;;  %v8918_v1 = vmul.bf16 %v8661_v26, %v8478_v21  ;;  %v8921_v23 = vrot.slane %v1294_v46, 1  ;;  %v6799_v56 = vadd.s32 4294967264, %v303_v57  ;;  %v8927_v62 = vsel %vm1297_vm15, %v1384_v34, %v1388_v12 }
 0x137   : > { %7834 = vmatmul.mubr.msk.bf16.gmra.mrb[52].mxu0 %vm901_vm0, %v2227_v35  ;;  %v1293_v55 = vmul.bf16 %v8912_v38, %v661_v33  ;;  %1522 = vrot.lane.b32.xlu0 %v8652_v9, %s8171_s12  ;;  %v1392_v30 = vor.u32 %v1390_v6, %v1388_v12  ;;  %v1396_v28 = vrot.slane %v1394_v40, 1  ;;  %v301_v21 = vadd.s32 168, %v8268_v19 }
 0x138   : > { %1653 = vrot.lane.b32.xlu1 %v8918_v1, %s8171_s12  ;;  %v1398_v41 = vshrl.u32 %v8776_v7, 16  ;;  %v1402_v5 = vshll.u32 %v8832_v50, 16  ;;  %v382_v37 = vand.u32 15, %v6799_v56  ;;  %v1406_v34 = vshrl.u32 %v8832_v50, 16 }
 0x139   : > { %v1506_v26 = vrot.slane %v1293_v55, 1  ;;  %v8934_v3 = vsel %vm1297_vm15, %v1392_v30, %v1396_v28  ;;  %v1410_v46 = vshll.u32 %v8830_v16, 16  ;;  %v316_v55 = vadd.s32 288, %v8268_v19 }
 0x13a   : > { %v1400_v18 = vor.u32 %v1398_v41, %v1396_v28  ;;  %v1404_v35 = vrot.slane %v1402_v5, 1  ;;  %vm422_vm8 = vcmp.ne.s32.totalorder %v382_v37, 15  ;;  %vm1764_vm4 = vcmask 523264  }
 0x13b   : > { %v8938_v9 = vsel %vm1476_vm11, %v8854_v4, %v1506_v26  ;;  %v8942_v33 = vsel %vm1476_vm11, %v1506_v26, %v8921_v23  ;;  %1437 = vrot.lane.b32.xlu0 %v8749_v43, %s8173_s20  ;;  %v6797_v4 = vadd.s32 4294967264, %v301_v21  ;;  %v1412_v41 = vrot.slane %v1410_v46, 1 }
 0x13c   : > { %v2243_v47 = vshrl.u32 %v8938_v9, 16  ;;  %v2246_v15 = vshll.u32 %v8938_v9, 16  ;;  %v2265_v45 = vshrl.u32 %v8942_v33, 16  ;;  %1686 = vrot.lane.b32.xlu1 %v8798_v17, %s8170_s11  ;;  %v2268_v57 = vshll.u32 %v8942_v33, 16 }
 0x13d   : > { %v380_v56 = vand.u32 15, %v6797_v4  ;;  %v8964_v30 = vsel %vm1297_vm15, %v1400_v18, %v1404_v35  ;;  %v1408_v28 = vor.u32 %v1406_v34, %v1404_v35  ;;  %v6812_v5 = vadd.s32 4294967264, %v316_v55 }
 0x13e   : > { %v2245_v6 = vrot.slane %v2243_v47, 7  ;;  %v8954_v10 = vrot.slane %v2265_v45, 7  ;;  %v318_v47 = vadd.s32 304, %v8268_v19  ;;  %v6827_v37 = vsel %vm422_vm8, 1.0, %v11087_v60 }
 0x13f   : > { %1577 = vrot.lane.b32.xlu0 %v8860_v36, %s8170_s11  ;;  %v1418_v45 = vshll.u32 %v8912_v38, 16  ;;  %vm420_vm9 = vcmp.ne.s32.totalorder %v380_v56, 15  ;;  %v395_v4 = vand.u32 15, %v6812_v5  ;;  %v524_v35 = vpack.c.bf16 %v6827_v37, %v11089_v32 }
 0x140   : > { %v2248_v12 = vor.u32 %v2246_v15, %v2245_v6  ;;  %v2270_v40 = vor.u32 %v2268_v57, %v8954_v10  ;;  %1618 = vrot.lane.b32.xlu1 %v8697_v54, %s8173_s20  ;;  %v8976_v15 = vsel %vm1297_vm15, %v1408_v28, %v1412_v41  ;;  %v6814_v57 = vadd.s32 4294967264, %v318_v47 }
 0x141   : > { %v1420_v34 = vrot.slane %v1418_v45, 1  ;;  %vm566_vm10 = vcmp.ne.s32.totalorder %v395_v4, 0  ;;  %v9001_v5 = vmul.bf16 %v8714_v24, %v524_v35  ;;  %v307_v4 = vadd.s32 216, %v8268_v19 }
 0x142   : > { %v2249_v21 = vsel %vm1953_vm6, %v8887_v58, %v2248_v12  ;;  %v2271_v26 = vsel %vm1953_vm6, %v2245_v6, %v2270_v40  ;;  %v1414_v58 = vshrl.u32 %v8830_v16, 16  ;;  %v1422_v6 = vshrl.u32 %v8912_v38, 16 }
 0x143   : > { %7837 = vmatprep.mubr.msk.bf16.mxu0 %vm901_vm0, %v2249_v21  ;;  %1575 = vrot.lane.b32.xlu0 %v8918_v1, %s8170_s11  ;;  %v397_v46 = vand.u32 15, %v6814_v57  ;;  %v1596_v12 = vshll.u32 %v8898_v44, 16  ;;  %v6826_v40 = vsel %vm420_vm9, 1.0, %v11087_v60  ;;  %v6852_v55 = vsel %vm566_vm10, 1.0, %v11087_v60  ;;  %11092 = vst [vmem:[#allocation13_spill] sm:$0xff] %v9001_v5 }
 0x144   : > { %7838 = vmatmul.mubr.msk.bf16.gmra.mrb[56].mxu0 %vm901_vm0, %v2271_v26  ;;  %1620 = vrot.lane.b32.xlu1 %v8701_v63, %s8173_s20  ;;  %v1416_v18 = vor.u32 %v1414_v58, %v1412_v41  ;;  %v663_v28 = vpack.c.bf16 %v11089_v32, %v6852_v55  ;;  %v8995_v21 = vor.u32 %v1422_v6, %v1420_v34  ;;  %vm1799_vm5 = vcmask 785408  }
 0x145   : > { %vm568_vm12 = vcmp.ne.s32.totalorder %v397_v46, 0  ;;  %v8998_v41 = vrot.slane %v1596_v12, 1  ;;  %v523_v47 = vpack.c.bf16 %v6826_v40, %v11089_v32  ;;  %v6803_v46 = vadd.s32 4294967264, %v307_v4 }
 0x146   : > { %v8990_v56 = vsel %vm1297_vm15, %v1416_v18, %v1420_v34  ;;  %v6853_v26 = vsel %vm568_vm12, 1.0, %v11087_v60  ;;  %v1295_v37 = vmul.bf16 0, %v663_v28  ;;  %v305_v12 = vadd.s32 200, %v8268_v19 }
 0x147   : > { %1439 = vrot.lane.b32.xlu0 %v8798_v17, %s8173_s20  ;;  %v664_v58 = vpack.c.bf16 %v11089_v32, %v6853_v26  ;;  %v9010_v45 = vsel %vm1297_vm15, %v8995_v21, %v8998_v41  ;;  %v9016_v18 = vmul.bf16 %v8716_v42, %v523_v47  ;;  %v386_v26 = vand.u32 15, %v6803_v46 }
 0x148   : > { %1688 = vrot.lane.b32.xlu1 %v8805_v0, %s8170_s11  ;;  %v1604_v24 = vrot.slane %v1295_v37, 1  ;;  %v6801_v47 = vadd.s32 4294967264, %v305_v12 }
 0x149   : > { %v1296_v57 = vmul.bf16 0, %v664_v58  ;;  %vm426_vm13 = vcmp.ne.s32.totalorder %v386_v26, 15 }
 0x14a   : > { %v9020_v34 = vsel %vm1476_vm11, %v8921_v23, %v1604_v24 }
 0x14b   : > { %1524 = vrot.lane.b32.xlu0 %v8697_v54, %s8171_s12  ;;  %v1711_v54 = vrot.slane %v1296_v57, 1  ;;  %v2287_v6 = vshrl.u32 %v9020_v34, 16  ;;  %v2290_v35 = vshll.u32 %v9020_v34, 16  ;;  %v9043_v57 = vpop.permute.xlu0 %1561 }
 0x14c   : > { %1659 = vrot.lane.b32.xlu1 %v9001_v5, %s8171_s12 }
 0x14d   : > { %v1712_v42 = vsel %vm1476_vm11, %v1604_v24, %v1711_v54  ;;  %v2289_v40 = vrot.slane %v2287_v6, 7  ;;  %v384_v24 = vand.u32 15, %v6801_v47  ;;  %v9052_v6 = vadd.s32 8, %v8268_v19 }
 0x14e   : > { %v2309_v55 = vshrl.u32 %v1712_v42, 16  ;;  %v2312_v23 = vshll.u32 %v1712_v42, 16 }
 0x14f   : > { %1526 = vrot.lane.b32.xlu0 %v8701_v63, %s8171_s12  ;;  %v2292_v28 = vor.u32 %v2290_v35, %v2289_v40  ;;  %vm424_vm14 = vcmp.ne.s32.totalorder %v384_v24, 15  ;;  %11093 = vst [vmem:[#allocation14_spill] sm:$0xff] %v9052_v6  ;;  %v1511_v35 = vpop.permute.xlu0 %1510 }
 0x150   : > { %1657 = vrot.lane.b32.xlu1 %v9016_v18, %s8171_s12  ;;  %v2311_v63 = vrot.slane %v2309_v55, 7  ;;  %v6828_v46 = vsel %vm424_vm14, 1.0, %v11087_v60  ;;  %v311_v55 = vadd.s32 248, %v8268_v19 }
 0x151   : > { %v2293_v37 = vsel %vm1953_vm6, %v8954_v10, %v2292_v28  ;;  %v6829_v10 = vsel %vm426_vm13, 1.0, %v11087_v60  ;;  %v525_v42 = vpack.c.bf16 %v6828_v46, %v11089_v32 }
 0x152   : > { %v2314_v58 = vor.u32 %v2312_v23, %v2311_v63  ;;  %7841 = vmatprep.mubr.msk.bf16.mxu0 %vm901_vm0, %v2293_v37  ;;  %v526_v54 = vpack.c.bf16 %v6829_v10, %v11089_v32  ;;  %v6807_v26 = vadd.s32 4294967264, %v311_v55 }
 0x153   : > { %1441 = vrot.lane.b32.xlu0 %v8805_v0, %s8173_s20  ;;  %v9072_v63 = vmul.bf16 %v8778_v20, %v525_v42 }
 0x154   : > { %1690 = vrot.lane.b32.xlu1 %v8843_v51, %s8170_s11  ;;  %v2315_v4 = vsel %vm1953_vm6, %v2289_v40, %v2314_v58  ;;  %v9060_v12 = vmul.bf16 %v8776_v7, %v526_v54  ;;  %v6778_v40 = vadd.s32 4294967264, %v9052_v6  ;;  %v390_v20 = vand.u32 15, %v6807_v26 }
 0x155   : > { %7842 = vmatmul.mubr.msk.bf16.gmra.mrb[60].mxu0 %vm901_vm0, %v2315_v4  ;;  %11095 = vst [vmem:[#allocation16_spill] sm:$0xff] %v9072_v63 }
 0x156   : > { %11094 = vst [vmem:[#allocation15_spill] sm:$0xff] %v9060_v12  ;;  %v360_v7 = vand.u32 15, %v6778_v40  ;;  %vm430_vm2 = vcmp.ne.s32.totalorder %v390_v20, 15 }
 0x157   : > { %1581 = vrot.lane.b32.xlu0 %v9001_v5, %s8170_s11  ;;  %v6831_v40 = vsel %vm430_vm2, 1.0, %v11087_v60 }
 0x158   : > { %1622 = vrot.lane.b32.xlu1 %v8756_v49, %s8173_s20  ;;  %vm400_vm1 = vcmp.ne.s32.totalorder %v360_v7, 15  ;;  %v528_v20 = vpack.c.bf16 %v6831_v40, %v11089_v32 }
 0x15b   : > { %1579 = vrot.lane.b32.xlu0 %v9016_v18, %s8170_s11 }
 0x15c   : > { %1624 = vrot.lane.b32.xlu1 %v8760_v13, %s8173_s20 }
 0x15f   : > { %1443 = vrot.lane.b32.xlu0 %v8843_v51, %s8173_s20 }
 0x160   : > { %1692 = vrot.lane.b32.xlu1 %v8864_v25, %s8170_s11 }
 0x163   : > { %1528 = vrot.lane.b32.xlu0 %v8756_v49, %s8171_s12  ;;  %v309_v49 = vadd.s32 232, %v8268_v19 }
 0x164   : > { %1663 = vrot.lane.b32.xlu1 %v9060_v12, %s8171_s12 }
 0x165   : > { %v9069_v23 = vpop.permute.xlu0 %1565  ;;  %v1644_v28 = vpop.permute.xlu1 %1643  ;;  %v6805_v58 = vadd.s32 4294967264, %v309_v49 }
 0x167   : > { %1530 = vrot.lane.b32.xlu0 %v8760_v13, %s8171_s12  ;;  %v6816_v13 = vsel %vm400_vm1, 1.0, %v11087_v60  ;;  %v388_v54 = vand.u32 15, %v6805_v58 }
 0x168   : > { %1661 = vrot.lane.b32.xlu1 %v9072_v63, %s8171_s12  ;;  %v513_v10 = vpack.c.bf16 %v6816_v13, %v11089_v32 }
 0x169   : > { %v1642_v47 = vpop.permute.xlu1 %1641  ;;  %v1564_v37 = vpop.permute.xlu0 %1563  ;;  %vm428_vm3 = vcmp.ne.s32.totalorder %v388_v54, 15 }
 0x16a   : > { %v1259_v55 = vmul.bf16 0, %v513_v10  ;;  %v6830_v13 = vsel %vm428_vm3, 1.0, %v11087_v60  ;;  %v11096_v10 = vmul.bf16 0, %v8277_v29 }
 0x16b   : > { %1445 = vrot.lane.b32.xlu0 %v8864_v25, %s8173_s20  ;;  %v527_v5 = vpack.c.bf16 %v6830_v13, %v11089_v32 }
 0x16c   : > { %1694 = vrot.lane.b32.xlu1 %v8927_v62, %s8170_s11 }
 0x16d   : > { %v1677_v4 = vpop.permute.xlu1 %1676  ;;  %v1607_v24 = vpop.permute.xlu0 %1606 }
 0x16e   : > { %v1836_v58 = vsel %vm901_vm0, %v8534_v53, %v1607_v24 }
 0x16f   : > { %1585 = vrot.lane.b32.xlu0 %v9060_v12, %s8170_s11  ;;  %v1886_v53 = vsel %vm1764_vm4, %v1836_v58, %v1642_v47 }
 0x170   : > { %1626 = vrot.lane.b32.xlu1 %v8815_v2, %s8173_s20  ;;  %v1920_v47 = vsel %vm1799_vm5, %v1886_v53, %v1677_v4 }
 0x171   : > { %v1513_v46 = vpop.permute.xlu1 %1512  ;;  %v1609_v42 = vpop.permute.xlu0 %1608 }
 0x172   : > { %v1839_v29 = vsel %vm901_vm0, %v8575_v31, %v1609_v42  ;;  %v9128_v42 = vmul.bf16 %v8832_v50, %v527_v5 }
 0x173   : > { %1583 = vrot.lane.b32.xlu0 %v9072_v63, %s8170_s11  ;;  %v9111_v63 = vmul.bf16 %v8830_v16, %v528_v20  ;;  %v1888_v20 = vsel %vm1764_vm4, %v1839_v29, %v1644_v28  ;;  %v313_v28 = vadd.s32 264, %v8268_v19 }
 0x174   : > { %1628 = vrot.lane.b32.xlu1 %v8818_v48, %s8173_s20 }
 0x175   : > { %v7925_v7 = vpop.permute.xlu0 %7924  ;;  %v9094_v26 = vpop.permute.xlu1 %1647 }
 0x176   : > { %v7927_v49 = vunpack.i.h.bf16 %v7925_v7  ;;  %v7926_v6 = vunpack.i.l.bf16 %v7925_v7 }
 0x177   : > { %1447 = vrot.lane.b32.xlu0 %v8927_v62, %s8173_s20 }
 0x178   : > { %v1715_v12 = vsel %vm901_vm0, %v1259_v55, %v7927_v49  ;;  %v1718_v54 = vsel %vm901_vm0, %v11096_v10, %v7926_v6  ;;  %1696 = vrot.lane.b32.xlu1 %v8934_v3, %s8170_s11  ;;  %v315_v49 = vadd.s32 280, %v8268_v19 }
 0x179   : > { %v1768_v40 = vsel %vm1764_vm4, %v1718_v54, %v1513_v46  ;;  %v1515_v7 = vpop.permute.xlu0 %1514  ;;  %v1766_v6 = vsel %vm1764_vm4, %v1715_v12, %v1511_v35 }
 0x17a   : > { %v1646_v24 = vpop.permute.xlu1 %1645  ;;  %v1803_v55 = vsel %vm1799_vm5, %v1768_v40, %v1564_v37  ;;  %v6811_v4 = vadd.s32 4294967264, %v315_v49 }
 0x17b   : > { %1532 = vrot.lane.b32.xlu0 %v8815_v2, %s8171_s12  ;;  %v1957_v46 = vshrl.u32 %v1803_v55, 16  ;;  %v1801_v2 = vsel %vm1799_vm5, %v1766_v6, %v9043_v57  ;;  %v1960_v13 = vshll.u32 %v1803_v55, 16 }
 0x17c   : > { %1667 = vrot.lane.b32.xlu1 %v9111_v63, %s8171_s12  ;;  %v1954_v57 = vshrl.u32 %v1801_v2, 16  ;;  %v394_v53 = vand.u32 15, %v6811_v4 }
 0x17d   : > { %v1430_v16 = vpop.permute.xlu0 %1429  ;;  %v9135_v12 = vrot.slane %v1957_v46, 7  ;;  %v6809_v46 = vadd.s32 4294967264, %v313_v28 }
 0x17e   : > { %v1721_v37 = vsel %vm901_vm0, %v8508_v59, %v1430_v16  ;;  %v1679_v31 = vpop.permute.xlu1 %1678  ;;  %v1964_v59 = vshrl.u32 %v1920_v47, 16  ;;  %v1956_v55 = vrot.slane %v1954_v57, 7  ;;  %vm434_vm7 = vcmp.ne.s32.totalorder %v394_v53, 15 }
 0x17f   : > { %v1922_v35 = vsel %vm1799_vm5, %v1888_v20, %v1679_v31  ;;  %1534 = vrot.lane.b32.xlu0 %v8818_v48, %s8171_s12  ;;  %v1770_v50 = vsel %vm1764_vm4, %v1721_v37, %v1515_v7  ;;  %v1962_v48 = vor.u32 %v1960_v13, %v9135_v12 }
 0x180   : > { %v1967_v58 = vshrl.u32 %v1922_v35, 16  ;;  %1665 = vrot.lane.b32.xlu1 %v9128_v42, %s8171_s12  ;;  %v1970_v54 = vshll.u32 %v1922_v35, 16  ;;  %v1805_v29 = vsel %vm1799_vm5, %v1770_v50, %v9069_v23  ;;  %v1966_v7 = vrot.slane %v1964_v59, 7 }
 0x181   : > { %v9141_v5 = vpop.permute.xlu0 %1569  ;;  %v1986_v37 = vshrl.u32 %v1805_v29, 16  ;;  %v1963_v31 = vsel %vm1953_vm6, %v1956_v55, %v1962_v48  ;;  %v392_v23 = vand.u32 15, %v6809_v46  ;;  %v6833_v59 = vsel %vm434_vm7, 1.0, %v11087_v60 }
 0x182   : > { %v1969_v10 = vrot.slane %v1967_v58, 7  ;;  %v1611_v40 = vpop.permute.xlu1 %1610  ;;  %v1989_v50 = vshll.u32 %v1805_v29, 16  ;;  %v530_v53 = vpack.c.bf16 %v6833_v59, %v11089_v32 }
 0x183   : > { %1449 = vrot.lane.b32.xlu0 %v8934_v3, %s8173_s20  ;;  %v1842_v20 = vsel %vm901_vm0, %v8635_v61, %v1611_v40  ;;  %v9159_v58 = vrot.slane %v1986_v37, 7  ;;  %vm432_vm8 = vcmp.ne.s32.totalorder %v392_v23, 15 }
 0x184   : > { %1698 = vrot.lane.b32.xlu1 %v8964_v30, %s8170_s11  ;;  %v1972_v6 = vor.u32 %v1970_v54, %v1969_v10  ;;  %v1890_v35 = vsel %vm1764_vm4, %v1842_v20, %v1646_v24  ;;  %v9182_v37 = vmul.bf16 %v8898_v44, %v530_v53 }
 0x185   : > { %v1568_v49 = vpop.permute.xlu0 %1567 }
 0x186   : > { %v1613_v16 = vpop.permute.xlu1 %1612  ;;  %v1973_v47 = vsel %vm1953_vm6, %v1966_v7, %v1972_v6  ;;  %v1991_v7 = vor.u32 %v1989_v50, %v9159_v58  ;;  %v6832_v6 = vsel %vm432_vm8, 1.0, %v11087_v60 }
 0x187   : > { %2536 = vmatprep.mubr.bf16.mxu1 %v1973_v47  ;;  %1589 = vrot.lane.b32.xlu0 %v9111_v63, %s8170_s11  ;;  %v529_v20 = vpack.c.bf16 %v6832_v6, %v11089_v32 }
 0x188   : > { %2537 = vmatmul.mubr.bf16.vlgmr.msra.gmra.mrb[0].mxu1 %v1963_v31  ;;  %1630 = vrot.lane.b32.xlu1 %v8870_v8, %s8173_s20  ;;  %v1845_v31 = vsel %vm901_vm0, %v8675_v22, %v1613_v16 }
 0x189   : > { %v1432_v2 = vpop.permute.xlu0 %1431  ;;  %v9198_v16 = vmul.bf16 %v8912_v38, %v529_v20  ;;  %v317_v38 = vadd.s32 296, %v8268_v19 }
 0x18a   : > { %v1681_v4 = vpop.permute.xlu1 %1680  ;;  %v1724_v57 = vsel %vm901_vm0, %v8503_v52, %v1432_v2 }
 0x18b   : > { %v1924_v61 = vsel %vm1799_vm5, %v1890_v35, %v1681_v4  ;;  %1587 = vrot.lane.b32.xlu0 %v9128_v42, %s8170_s11  ;;  %v1892_v35 = vsel %vm1764_vm4, %v1845_v31, %v9094_v26 }
 0x18c   : > { %v1993_v28 = vshrl.u32 %v1924_v61, 16  ;;  %1632 = vrot.lane.b32.xlu1 %v8874_v27, %s8173_s20  ;;  %v1996_v54 = vshll.u32 %v1924_v61, 16 }
 0x18d   : > { %v1517_v24 = vpop.permute.xlu0 %1516 }
 0x18e   : > { %v1995_v13 = vrot.slane %v1993_v28, 7  ;;  %v1772_v40 = vsel %vm1764_vm4, %v1724_v57, %v1517_v24  ;;  %v9170_v48 = vpop.permute.xlu1 %1651 }
 0x18f   : > { %1451 = vrot.lane.b32.xlu0 %v8964_v30, %s8173_s20  ;;  %v1807_v46 = vsel %vm1799_vm5, %v1772_v40, %v1568_v49  ;;  %v1992_v49 = vsel %vm1953_vm6, %v9135_v12, %v1991_v7  ;;  %v6813_v7 = vadd.s32 4294967264, %v317_v38 }
 0x190   : > { %v1998_v29 = vor.u32 %v1996_v54, %v1995_v13  ;;  %1700 = vrot.lane.b32.xlu1 %v8976_v15, %s8170_s11  ;;  %v2008_v23 = vshrl.u32 %v1807_v46, 16  ;;  %v2011_v61 = vshll.u32 %v1807_v46, 16 }
 0x191   : > { %v1519_v52 = vpop.permute.xlu0 %1518 }
 0x192   : > { %v1650_v55 = vpop.permute.xlu1 %1649  ;;  %v1999_v47 = vsel %vm1953_vm6, %v1969_v10, %v1998_v29  ;;  %v2010_v4 = vrot.slane %v2008_v23, 7 }
 0x193   : > { %2544 = vmatprep.mubr.bf16.mxu1 %v1999_v47  ;;  %1536 = vrot.lane.b32.xlu0 %v8870_v8, %s8171_s12  ;;  %v396_v47 = vand.u32 15, %v6813_v7 }
 0x194   : > { %2545 = vmatmul.mubr.bf16.gmra.mrb[4].mxu1 %v1992_v49  ;;  %1671 = vrot.lane.b32.xlu1 %v9182_v37, %s8171_s12  ;;  %v2013_v57 = vor.u32 %v2011_v61, %v2010_v4  ;;  %v11097_v49 = vld [vmem:[#allocation11_spill] sm:$0xff] }
 0x195   : > { %v1434_v10 = vpop.permute.xlu0 %1433  ;;  %vm436_vm9 = vcmp.ne.s32.totalorder %v396_v47, 15 }
 0x196   : > { %v1727_v2 = vsel %vm901_vm0, %v8572_v14, %v1434_v10  ;;  %v1683_v22 = vpop.permute.xlu1 %1682  ;;  %v2014_v46 = vsel %vm1953_vm6, %v9159_v58, %v2013_v57 }
 0x197   : > { %v1926_v12 = vsel %vm1799_vm5, %v1892_v35, %v1683_v22  ;;  %1538 = vrot.lane.b32.xlu0 %v8874_v27, %s8171_s12  ;;  %v1774_v14 = vsel %vm1764_vm4, %v1727_v2, %v1519_v52 }
 0x198   : > { %v2015_v8 = vshrl.u32 %v1926_v12, 16  ;;  %1669 = vrot.lane.b32.xlu1 %v9198_v16, %s8171_s12  ;;  %v2018_v28 = vshll.u32 %v1926_v12, 16  ;;  %v1809_v27 = vsel %vm1799_vm5, %v1774_v14, %v9141_v5 }
 0x199   : > { %v9206_v59 = vpop.permute.xlu0 %1573  ;;  %v2030_v6 = vshrl.u32 %v1809_v27, 16  ;;  %v2033_v23 = vshll.u32 %v1809_v27, 16 }
 0x19a   : > { %v2017_v26 = vrot.slane %v2015_v8, 7  ;;  %v1615_v50 = vpop.permute.xlu1 %1614 }
 0x19b   : > { %1453 = vrot.lane.b32.xlu0 %v8976_v15, %s8173_s20  ;;  %v1848_v29 = vsel %vm901_vm0, %v8734_v11, %v1615_v50  ;;  %v2032_v20 = vrot.slane %v2030_v6, 7  ;;  %v1600_v11 = vshrl.u32 %v8898_v44, 16 }
 0x19c   : > { %v2020_v24 = vor.u32 %v2018_v28, %v2017_v26  ;;  %1702 = vrot.lane.b32.xlu1 %v8990_v56, %s8170_s11  ;;  %v1894_v52 = vsel %vm1764_vm4, %v1848_v29, %v1650_v55  ;;  %v6834_v28 = vsel %vm436_vm9, 1.0, %v11087_v60 }
 0x19d   : > { %v1572_v54 = vpop.permute.xlu0 %1571  ;;  %v2035_v44 = vor.u32 %v2033_v23, %v2032_v20 }
 0x19e   : > { %v1617_v40 = vpop.permute.xlu1 %1616  ;;  %v2021_v53 = vsel %vm1953_vm6, %v1995_v13, %v2020_v24  ;;  %v11098_v24 = vld [vmem:[#allocation10_spill] sm:$0xff] }
 0x19f   : > { %2552 = vmatprep.mubr.bf16.mxu1 %v2021_v53  ;;  %1455 = vrot.lane.b32.xlu0 %v8990_v56, %s8173_s20  ;;  %v1851_v57 = vsel %vm901_vm0, %v8749_v43, %v1617_v40  ;;  %v531_v53 = vpack.c.bf16 %v6834_v28, %v11089_v32 }
 0x1a0   : > { %2553 = vmatmul.mubr.bf16.gmra.mrb[8].mxu1 %v2014_v46  ;;  %1634 = vrot.lane.b32.xlu1 %v8938_v9, %s8173_s20  ;;  %v1896_v40 = vsel %vm1764_vm4, %v1851_v57, %v9170_v48 }
 0x1a1   : > { %v1436_v5 = vpop.permute.xlu0 %1435  ;;  %v1277_v29 = vmul.bf16 0, %v531_v53 }
 0x1a2   : > { %v1685_v13 = vpop.permute.xlu1 %1684  ;;  %v1730_v10 = vsel %vm901_vm0, %v11097_v49, %v1436_v5 }
 0x1a3   : > { %v1928_v31 = vsel %vm1799_vm5, %v1894_v52, %v1685_v13  ;;  %1540 = vrot.lane.b32.xlu0 %v8938_v9, %s8171_s12  ;;  %v9239_v9 = vor.u32 %v1600_v11, %v8998_v41  ;;  %v2036_v41 = vsel %vm1953_vm6, %v2010_v4, %v2035_v44  ;;  %v11099_v44 = vld [vmem:[#allocation12_spill] sm:$0xff] }
 0x1a4   : > { %v2037_v58 = vshrl.u32 %v1928_v31, 16  ;;  %1636 = vrot.lane.b32.xlu1 %v8942_v33, %s8173_s20  ;;  %v2040_v35 = vshll.u32 %v1928_v31, 16 }
 0x1a5   : > { %v1521_v2 = vpop.permute.xlu0 %1520 }
 0x1a6   : > { %v2039_v55 = vrot.slane %v2037_v58, 7  ;;  %v1776_v22 = vsel %vm1764_vm4, %v1730_v10, %v1521_v2  ;;  %v9234_v12 = vpop.permute.xlu1 %1655 }
 0x1a7   : > { %1591 = vrot.lane.b32.xlu0 %v9198_v16, %s8170_s11  ;;  %v1811_v61 = vsel %vm1799_vm5, %v1776_v22, %v1572_v54  ;;  %v1675_v54 = vsel %vm1297_vm15, %v9239_v9, %v11098_v24 }
 0x1a8   : > { %v2042_v8 = vor.u32 %v2040_v35, %v2039_v55  ;;  %1704 = vrot.lane.b32.xlu1 %v9010_v45, %s8170_s11  ;;  %v2052_v27 = vshrl.u32 %v1811_v61, 16  ;;  %v2055_v32 = vshll.u32 %v1811_v61, 16 }
 0x1a9   : > { %v1523_v14 = vpop.permute.xlu0 %1522 }
 0x1aa   : > { %v1654_v50 = vpop.permute.xlu1 %1653  ;;  %v2043_v38 = vsel %vm1953_vm6, %v2017_v26, %v2042_v8  ;;  %v2054_v7 = vrot.slane %v2052_v27, 7 }
 0x1ab   : > { %2560 = vmatprep.mubr.bf16.mxu1 %v2043_v38  ;;  %1457 = vrot.lane.b32.xlu0 %v8995_v21, %s8173_s20 }
 0x1ac   : > { %2561 = vmatmul.mubr.bf16.gmra.mrb[12].mxu1 %v2036_v41  ;;  %1706 = vrot.lane.b32.xlu1 %v1675_v54, %s8170_s11  ;;  %v2057_v48 = vor.u32 %v2055_v32, %v2054_v7 }
 0x1ad   : > { %v1438_v26 = vpop.permute.xlu0 %1437 }
 0x1ae   : > { %v1733_v43 = vsel %vm901_vm0, %v8746_v39, %v1438_v26  ;;  %v1687_v4 = vpop.permute.xlu1 %1686  ;;  %v2058_v49 = vsel %vm1953_vm6, %v2032_v20, %v2057_v48 }
 0x1af   : > { %v1930_v21 = vsel %vm1799_vm5, %v1896_v40, %v1687_v4  ;;  %1542 = vrot.lane.b32.xlu0 %v8942_v33, %s8171_s12  ;;  %v1778_v46 = vsel %vm1764_vm4, %v1733_v43, %v1523_v14 }
 0x1b0   : > { %v2059_v6 = vshrl.u32 %v1930_v21, 16  ;;  %1638 = vrot.lane.b32.xlu1 %v9020_v34, %s8173_s20  ;;  %v2062_v52 = vshll.u32 %v1930_v21, 16  ;;  %v1813_v47 = vsel %vm1799_vm5, %v1778_v46, %v9206_v59 }
 0x1b1   : > { %v1578_v5 = vpop.permute.xlu0 %1577  ;;  %v2074_v58 = vshrl.u32 %v1813_v47, 16 }
 0x1b2   : > { %v2061_v39 = vrot.slane %v2059_v6, 7  ;;  %v1619_v13 = vpop.permute.xlu1 %1618 }
 0x1b3   : > { %1593 = vrot.lane.b32.xlu0 %v9182_v37, %s8170_s11  ;;  %v1854_v23 = vsel %vm901_vm0, %v8798_v17, %v1619_v13  ;;  %v2076_v2 = vrot.slane %v2074_v58, 7 }
 0x1b4   : > { %v2064_v33 = vor.u32 %v2062_v52, %v2061_v39  ;;  %1673 = vrot.lane.b32.xlu1 %v1277_v29, %s8171_s12  ;;  %v1898_v59 = vsel %vm1764_vm4, %v1854_v23, %v1654_v50 }
 0x1b5   : > { %v1576_v31 = vpop.permute.xlu0 %1575 }
 0x1b6   : > { %v1621_v34 = vpop.permute.xlu1 %1620  ;;  %v2065_v11 = vsel %vm1953_vm6, %v2039_v55, %v2064_v33  ;;  %v2077_v55 = vshll.u32 %v1813_v47, 16 }
 0x1b7   : > { %2568 = vmatprep.mubr.bf16.mxu1 %v2065_v11  ;;  %v1857_v53 = vsel %vm901_vm0, %v8805_v0, %v1621_v34 }
 0x1b8   : > { %2569 = vmatmul.mubr.bf16.gmra.mrb[16].mxu1 %v2058_v49  ;;  %1708 = vrot.lane.b32.xlu1 %v11098_v24, %s8170_s11  ;;  %v2079_v38 = vor.u32 %v2077_v55, %v2076_v2  ;;  %v1900_v21 = vsel %vm1764_vm4, %v1857_v53, %v9234_v12 }
 0x1b9   : > { %v1440_v37 = vpop.permute.xlu0 %1439 }
 0x1ba   : > { %v1689_v10 = vpop.permute.xlu1 %1688  ;;  %v1736_v8 = vsel %vm901_vm0, %v11099_v44, %v1440_v37  ;;  %v2080_v43 = vsel %vm1953_vm6, %v2054_v7, %v2079_v38 }
 0x1bb   : > { %v1932_v35 = vsel %vm1799_vm5, %v1898_v59, %v1689_v10 }
 0x1bc   : > { %v2081_v22 = vshrl.u32 %v1932_v35, 16  ;;  %v2084_v14 = vshll.u32 %v1932_v35, 16 }
 0x1bd   : > { %v1525_v17 = vpop.permute.xlu0 %1524 }
 0x1be   : > { %v2083_v61 = vrot.slane %v2081_v22, 7  ;;  %v1780_v20 = vsel %vm1764_vm4, %v1736_v8, %v1525_v17  ;;  %v9282_v28 = vpop.permute.xlu1 %1659 }
 0x1bf   : > { %v1815_v50 = vsel %vm1799_vm5, %v1780_v20, %v1576_v31 }
 0x1c0   : > { %v2086_v57 = vor.u32 %v2084_v14, %v2083_v61  ;;  %v2096_v26 = vshrl.u32 %v1815_v50, 16 }
 0x1c1   : > { %v1527_v27 = vpop.permute.xlu0 %1526 }
 0x1c2   : > { %v1658_v41 = vpop.permute.xlu1 %1657  ;;  %v2087_v54 = vsel %vm1953_vm6, %v2061_v39, %v2086_v57  ;;  %v2098_v29 = vrot.slane %v2096_v26, 7  ;;  %v2099_v39 = vshll.u32 %v1815_v50, 16 }
 0x1c3   : > { %2576 = vmatprep.mubr.bf16.mxu1 %v2087_v54 }
 0x1c4   : > { %2577 = vmatmul.mubr.bf16.gmra.mrb[20].mxu1 %v2080_v43  ;;  %v2101_v47 = vor.u32 %v2099_v39, %v2098_v29 }
 0x1c5   : > { %v1442_v40 = vpop.permute.xlu0 %1441 }
 0x1c6   : > { %v1739_v4 = vsel %vm901_vm0, %v8918_v1, %v1442_v40  ;;  %v1691_v6 = vpop.permute.xlu1 %1690  ;;  %v2102_v23 = vsel %vm1953_vm6, %v2076_v2, %v2101_v47 }
 0x1c7   : > { %v1934_v32 = vsel %vm1799_vm5, %v1900_v21, %v1691_v6  ;;  %v1782_v0 = vsel %vm1764_vm4, %v1739_v4, %v1527_v27 }
 0x1c8   : > { %v2103_v46 = vshrl.u32 %v1934_v32, 16  ;;  %v2106_v48 = vshll.u32 %v1934_v32, 16  ;;  %v1817_v33 = vsel %vm1799_vm5, %v1782_v0, %v1578_v5 }
 0x1c9   : > { %v1582_v52 = vpop.permute.xlu0 %1581  ;;  %v2118_v11 = vshrl.u32 %v1817_v33, 16  ;;  %v2121_v22 = vshll.u32 %v1817_v33, 16 }
 0x1ca   : > { %v2105_v13 = vrot.slane %v2103_v46, 7  ;;  %v1623_v7 = vpop.permute.xlu1 %1622 }
 0x1cb   : > { %v1860_v58 = vsel %vm901_vm0, %v8843_v51, %v1623_v7  ;;  %v2120_v10 = vrot.slane %v2118_v11, 7 }
 0x1cc   : > { %v2108_v31 = vor.u32 %v2106_v48, %v2105_v13  ;;  %v1902_v37 = vsel %vm1764_vm4, %v1860_v58, %v1658_v41 }
 0x1cd   : > { %v1580_v1 = vpop.permute.xlu0 %1579  ;;  %v2123_v2 = vor.u32 %v2121_v22, %v2120_v10 }
 0x1ce   : > { %v1625_v34 = vpop.permute.xlu1 %1624  ;;  %v2109_v12 = vsel %vm1953_vm6, %v2083_v61, %v2108_v31 }
 0x1cf   : > { %2584 = vmatprep.mubr.bf16.mxu1 %v2109_v12  ;;  %v2124_v54 = vsel %vm1953_vm6, %v2098_v29, %v2123_v2 }
 0x1d0   : > { %2585 = vmatmul.mubr.bf16.gmra.mrb[24].mxu1 %v2102_v23 }
 0x1d1   : > { %v1444_v49 = vpop.permute.xlu0 %1443 }
 0x1d2   : > { %v1693_v59 = vpop.permute.xlu1 %1692  ;;  %v1742_v55 = vsel %vm901_vm0, %v8860_v36, %v1444_v49  ;;  %v1863_v36 = vsel %vm901_vm0, %v8864_v25, %v1625_v34 }
 0x1d3   : > { %v1936_v5 = vsel %vm1799_vm5, %v1902_v37, %v1693_v59  ;;  %v1904_v21 = vsel %vm1764_vm4, %v1863_v36, %v9282_v28 }
 0x1d4   : > { %v2125_v35 = vshrl.u32 %v1936_v5, 16  ;;  %v2128_v17 = vshll.u32 %v1936_v5, 16 }
 0x1d5   : > { %v1529_v44 = vpop.permute.xlu0 %1528 }
 0x1d6   : > { %v2127_v8 = vrot.slane %v2125_v35, 7  ;;  %v1784_v51 = vsel %vm1764_vm4, %v1742_v55, %v1529_v44  ;;  %v9305_v61 = vpop.permute.xlu1 %1663 }
 0x1d7   : > { %v1819_v20 = vsel %vm1799_vm5, %v1784_v51, %v1580_v1  ;;  %v11100_v51 = vld [vmem:[#allocation13_spill] sm:$0xff] }
 0x1d8   : > { %v2130_v14 = vor.u32 %v2128_v17, %v2127_v8  ;;  %v2140_v41 = vshrl.u32 %v1819_v20, 16  ;;  %v2143_v29 = vshll.u32 %v1819_v20, 16 }
 0x1d9   : > { %v1531_v38 = vpop.permute.xlu0 %1530 }
 0x1da   : > { %v1662_v57 = vpop.permute.xlu1 %1661  ;;  %v2131_v50 = vsel %vm1953_vm6, %v2105_v13, %v2130_v14  ;;  %v9309_v27 = vpop.f32.mrb[32].mxu0  ;;  %v2142_v25 = vrot.slane %v2140_v41, 7 }
 0x1db   : > { %2592 = vmatprep.mubr.bf16.mxu1 %v2131_v50  ;;  %v9314_v53 = vpop.f32.mrb[33].mxu0 }
 0x1dc   : > { %2593 = vmatmul.mubr.bf16.gmra.mrb[28].mxu1 %v2124_v54  ;;  %v9316_v26 = vpop.f32.mrb[34].mxu0 }
 0x1dd   : > { %v1446_v43 = vpop.permute.xlu0 %1445  ;;  %v9318_v40 = vpop.f32.mrb[35].mxu0 }
 0x1de   : > { %v1745_v4 = vsel %vm901_vm0, %v9016_v18, %v1446_v43  ;;  %v1695_v6 = vpop.permute.xlu1 %1694  ;;  %v2145_v18 = vor.u32 %v2143_v29, %v2142_v25 }
 0x1df   : > { %v1938_v32 = vsel %vm1799_vm5, %v1904_v21, %v1695_v6  ;;  %v1786_v39 = vsel %vm1764_vm4, %v1745_v4, %v1531_v38 }
 0x1e0   : > { %v2147_v46 = vshrl.u32 %v1938_v32, 16  ;;  %v2150_v48 = vshll.u32 %v1938_v32, 16  ;;  %v1821_v28 = vsel %vm1799_vm5, %v1786_v39, %v1582_v52  ;;  %v2146_v37 = vsel %vm1953_vm6, %v2120_v10, %v2145_v18 }
 0x1e1   : > { %v9326_v0 = vpop.permute.xlu0 %1585  ;;  %v2162_v23 = vshrl.u32 %v1821_v28, 16 }
 0x1e2   : > { %v2149_v13 = vrot.slane %v2147_v46, 7  ;;  %v1627_v7 = vpop.permute.xlu1 %1626  ;;  %v9328_v47 = vpop.f32.mrb[36].mxu0 }
 0x1e3   : > { %v9330_v33 = vpop.f32.mrb[37].mxu0  ;;  %v1866_v49 = vsel %vm901_vm0, %v8927_v62, %v1627_v7  ;;  %v2164_v35 = vrot.slane %v2162_v23, 7  ;;  %v11101_v7 = vld [vmem:[#allocation16_spill] sm:$0xff] }
 0x1e4   : > { %v2152_v31 = vor.u32 %v2150_v48, %v2149_v13  ;;  %v9333_v1 = vpop.f32.mrb[38].mxu0  ;;  %v1906_v52 = vsel %vm1764_vm4, %v1866_v49, %v1662_v57 }
 0x1e5   : > { %v1584_v34 = vpop.permute.xlu0 %1583  ;;  %v9335_v12 = vpop.f32.mrb[39].mxu0 }
 0x1e6   : > { %v1629_v11 = vpop.permute.xlu1 %1628  ;;  %v2153_v58 = vsel %vm1953_vm6, %v2127_v8, %v2152_v31  ;;  %v2165_v8 = vshll.u32 %v1821_v28, 16 }
 0x1e7   : > { %2600 = vmatprep.mubr.bf16.mxu1 %v2153_v58  ;;  %v1869_v6 = vsel %vm901_vm0, %v8934_v3, %v1629_v11 }
 0x1e8   : > { %2601 = vmatmul.mubr.bf16.gmra.mrb[32].mxu1 %v2146_v37  ;;  %v2167_v36 = vor.u32 %v2165_v8, %v2164_v35  ;;  %v1908_v28 = vsel %vm1764_vm4, %v1869_v6, %v9305_v61 }
 0x1e9   : > { %v1448_v59 = vpop.permute.xlu0 %1447 }
 0x1ea   : > { %v1697_v5 = vpop.permute.xlu1 %1696  ;;  %v1748_v62 = vsel %vm901_vm0, %v11100_v51, %v1448_v59  ;;  %v2168_v46 = vsel %vm1953_vm6, %v2142_v25, %v2167_v36 }
 0x1eb   : > { %v1940_v22 = vsel %vm1799_vm5, %v1906_v52, %v1697_v5  ;;  %v9343_v55 = vpop.f32.mrb[40].mxu0 }
 0x1ec   : > { %v2169_v44 = vshrl.u32 %v1940_v22, 16  ;;  %v9345_v17 = vpop.f32.mrb[41].mxu0  ;;  %v2172_v20 = vshll.u32 %v1940_v22, 16 }
 0x1ed   : > { %v1533_v2 = vpop.permute.xlu0 %1532  ;;  %v9349_v14 = vpop.f32.mrb[42].mxu0 }
 0x1ee   : > { %v2171_v10 = vrot.slane %v2169_v44, 7  ;;  %v1788_v38 = vsel %vm1764_vm4, %v1748_v62, %v1533_v2  ;;  %v9352_v57 = vpop.permute.xlu1 %1667  ;;  %v9354_v50 = vpop.f32.mrb[43].mxu0 }
 0x1ef   : > { %v1823_v54 = vsel %vm1799_vm5, %v1788_v38, %v1584_v34 }
 0x1f0   : > { %v2174_v41 = vor.u32 %v2172_v20, %v2171_v10  ;;  %v2184_v32 = vshrl.u32 %v1823_v54, 16  ;;  %v2187_v58 = vshll.u32 %v1823_v54, 16 }
 0x1f1   : > { %v1535_v43 = vpop.permute.xlu0 %1534 }
 0x1f2   : > { %v1666_v4 = vpop.permute.xlu1 %1665  ;;  %v2175_v21 = vsel %vm1953_vm6, %v2149_v13, %v2174_v41  ;;  %v2186_v3 = vrot.slane %v2184_v32, 7 }
 0x1f3   : > { %2608 = vmatprep.mubr.bf16.mxu1 %v2175_v21 }
 0x1f4   : > { %2609 = vmatmul.mubr.bf16.gmra.mrb[36].mxu1 %v2168_v46  ;;  %v2189_v5 = vor.u32 %v2187_v58, %v2186_v3  ;;  %v11102_v46 = vld [vmem:[#allocation15_spill] sm:$0xff] }
 0x1f5   : > { %v9361_v29 = vpop.f32.mrb[44].mxu0  ;;  %v1450_v39 = vpop.permute.xlu0 %1449 }
 0x1f6   : > { %v9363_v48 = vpop.f32.mrb[45].mxu0  ;;  %v1751_v18 = vsel %vm901_vm0, %v11101_v7, %v1450_v39  ;;  %v1699_v13 = vpop.permute.xlu1 %1698  ;;  %v2190_v20 = vsel %vm1953_vm6, %v2164_v35, %v2189_v5 }
 0x1f7   : > { %v9369_v31 = vpop.f32.mrb[46].mxu0  ;;  %v1942_v34 = vsel %vm1799_vm5, %v1908_v28, %v1699_v13  ;;  %v1790_v23 = vsel %vm1764_vm4, %v1751_v18, %v1535_v43 }
 0x1f8   : > { %v9372_v11 = vpop.f32.mrb[47].mxu0  ;;  %v2191_v25 = vshrl.u32 %v1942_v34, 16  ;;  %v2194_v59 = vshll.u32 %v1942_v34, 16  ;;  %v1825_v61 = vsel %vm1799_vm5, %v1790_v23, %v9326_v0 }
 0x1f9   : > { %v1590_v49 = vpop.permute.xlu0 %1589  ;;  %v2206_v62 = vshrl.u32 %v1825_v61, 16  ;;  %v2209_v32 = vshll.u32 %v1825_v61, 16 }
 0x1fa   : > { %v2193_v37 = vrot.slane %v2191_v25, 7  ;;  %v1631_v52 = vpop.permute.xlu1 %1630 }
 0x1fb   : > { %v1872_v2 = vsel %vm901_vm0, %v8964_v30, %v1631_v52  ;;  %v2208_v21 = vrot.slane %v2206_v62, 7 }
 0x1fc   : > { %v2196_v22 = vor.u32 %v2194_v59, %v2193_v37  ;;  %v1910_v0 = vsel %vm1764_vm4, %v1872_v2, %v1666_v4 }
 0x1fd   : > { %v1588_v44 = vpop.permute.xlu0 %1587  ;;  %v2211_v4 = vor.u32 %v2209_v32, %v2208_v21 }
 0x1fe   : > { %v1633_v8 = vpop.permute.xlu1 %1632  ;;  %v2197_v51 = vsel %vm1953_vm6, %v2171_v10, %v2196_v22 }
 0x1ff   : > { %2616 = vmatprep.mubr.bf16.mxu1 %v2197_v51  ;;  %v1875_v61 = vsel %vm901_vm0, %v8976_v15, %v1633_v8  ;;  %v2212_v51 = vsel %vm1953_vm6, %v2186_v3, %v2211_v4 }
 0x200   : > { %2617 = vmatmul.mubr.bf16.gmra.mrb[40].mxu1 %v2190_v20  ;;  %v9381_v38 = vpop.f32.mrb[48].mxu0 }
 0x201   : > { %v1452_v36 = vpop.permute.xlu0 %1451  ;;  %v9383_v41 = vpop.f32.mrb[49].mxu0 }
 0x202   : > { %v1701_v54 = vpop.permute.xlu1 %1700  ;;  %v9386_v43 = vpop.f32.mrb[50].mxu0  ;;  %v1754_v35 = vsel %vm901_vm0, %v11102_v46, %v1452_v36 }
 0x203   : > { %v1944_v10 = vsel %vm1799_vm5, %v1910_v0, %v1701_v54  ;;  %v9389_v6 = vpop.f32.mrb[51].mxu0 }
 0x204   : > { %v2213_v30 = vshrl.u32 %v1944_v10, 16  ;;  %v2216_v18 = vshll.u32 %v1944_v10, 16 }
 0x205   : > { %v1537_v39 = vpop.permute.xlu0 %1536 }
 0x206   : > { %v2215_v7 = vrot.slane %v2213_v30, 7  ;;  %v1792_v28 = vsel %vm1764_vm4, %v1754_v35, %v1537_v39  ;;  %v1672_v13 = vpop.permute.xlu1 %1671 }
 0x207   : > { %v1827_v25 = vsel %vm1799_vm5, %v1792_v28, %v1588_v44 }
 0x208   : > { %v2218_v34 = vor.u32 %v2216_v18, %v2215_v7  ;;  %v2228_v22 = vshrl.u32 %v1827_v25, 16  ;;  %v2231_v54 = vshll.u32 %v1827_v25, 16 }
 0x209   : > { %v1539_v58 = vpop.permute.xlu0 %1538 }
 0x20a   : > { %v9395_v23 = vpop.f32.mrb[52].mxu0  ;;  %v1670_v59 = vpop.permute.xlu1 %1669  ;;  %v2219_v52 = vsel %vm1953_vm6, %v2193_v37, %v2218_v34  ;;  %v1912_v37 = vsel %vm1764_vm4, %v1875_v61, %v9352_v57  ;;  %v2230_v0 = vrot.slane %v2228_v22, 7 }
 0x20b   : > { %v9398_v5 = vpop.f32.mrb[53].mxu0  ;;  %2624 = vmatprep.mubr.bf16.mxu1 %v2219_v52 }
 0x20c   : > { %v9403_v62 = vpop.f32.mrb[54].mxu0  ;;  %2625 = vmatmul.mubr.bf16.gmra.mrb[44].mxu1 %v2212_v51  ;;  %v2233_v35 = vor.u32 %v2231_v54, %v2230_v0 }
 0x20d   : > { %v9405_v2 = vpop.f32.mrb[55].mxu0  ;;  %v1454_v44 = vpop.permute.xlu0 %1453 }
 0x20e   : > { %v1757_v20 = vsel %vm901_vm0, %v9128_v42, %v1454_v44  ;;  %v1703_v36 = vpop.permute.xlu1 %1702 }
 0x20f   : > { %v1946_v15 = vsel %vm1799_vm5, %v1912_v37, %v1703_v36  ;;  %v1794_v3 = vsel %vm1764_vm4, %v1757_v20, %v1539_v58  ;;  %v2234_v58 = vsel %vm1953_vm6, %v2208_v21, %v2233_v35 }
 0x210   : > { %v2235_v8 = vshrl.u32 %v1946_v15, 16  ;;  %v2238_v32 = vshll.u32 %v1946_v15, 16  ;;  %v1829_v39 = vsel %vm1799_vm5, %v1794_v3, %v1590_v49 }
 0x211   : > { %v1456_v10 = vpop.permute.xlu0 %1455  ;;  %v2250_v34 = vshrl.u32 %v1829_v39, 16 }
 0x212   : > { %v2237_v30 = vrot.slane %v2235_v8, 7  ;;  %v1635_v46 = vpop.permute.xlu1 %1634  ;;  %v2253_v8 = vshll.u32 %v1829_v39, 16 }
 0x213   : > { %v1878_v25 = vsel %vm901_vm0, %v8990_v56, %v1635_v46  ;;  %v2252_v20 = vrot.slane %v2250_v34, 7 }
 0x214   : > { %v2240_v18 = vor.u32 %v2238_v32, %v2237_v30  ;;  %v1914_v51 = vsel %vm1764_vm4, %v1878_v25, %v1670_v59 }
 0x215   : > { %v1541_v42 = vpop.permute.xlu0 %1540  ;;  %v2255_v35 = vor.u32 %v2253_v8, %v2252_v20 }
 0x216   : > { %v1637_v28 = vpop.permute.xlu1 %1636  ;;  %v2241_v57 = vsel %vm1953_vm6, %v2215_v7, %v2240_v18  ;;  %v1760_v7 = vsel %vm901_vm0, %v9111_v63, %v1456_v10 }
 0x217   : > { %v9415_v4 = vpop.f32.mrb[56].mxu0  ;;  %2632 = vmatprep.mubr.bf16.mxu1 %v2241_v57  ;;  %v1796_v56 = vsel %vm1764_vm4, %v1760_v7, %v1541_v42  ;;  %v1881_v21 = vsel %vm901_vm0, %v9010_v45, %v1637_v28  ;;  %v2256_v39 = vsel %vm1953_vm6, %v2230_v0, %v2255_v35 }
 0x218   : > { %v9420_v52 = vpop.f32.mrb[57].mxu0  ;;  %2633 = vmatmul.mubr.bf16.gmra.mrb[48].mxu1 %v2234_v58  ;;  %v1916_v63 = vsel %vm1764_vm4, %v1881_v21, %v1672_v13 }
 0x219   : > { %v9422_v61 = vpop.f32.mrb[58].mxu0  ;;  %v1592_v49 = vpop.permute.xlu0 %1591 }
 0x21a   : > { %v9424_v22 = vpop.f32.mrb[59].mxu0  ;;  %v1705_v44 = vpop.permute.xlu1 %1704  ;;  %v1831_v36 = vsel %vm1799_vm5, %v1796_v56, %v1592_v49 }
 0x21b   : > { %v1948_v37 = vsel %vm1799_vm5, %v1914_v51, %v1705_v44  ;;  %v2272_v59 = vshrl.u32 %v1831_v36, 16  ;;  %v2275_v7 = vshll.u32 %v1831_v36, 16 }
 0x21c   : > { %v2257_v15 = vshrl.u32 %v1948_v37, 16  ;;  %v2260_v32 = vshll.u32 %v1948_v37, 16 }
 0x21d   : > { %v1458_v54 = vpop.permute.xlu0 %1457  ;;  %v2274_v58 = vrot.slane %v2272_v59, 7 }
 0x21e   : > { %v2259_v3 = vrot.slane %v2257_v15, 7  ;;  %v1707_v10 = vpop.permute.xlu1 %1706  ;;  %v1763_v13 = vsel %vm901_vm0, %v9198_v16, %v1458_v54 }
 0x21f   : > { %v1950_v46 = vsel %vm1799_vm5, %v1916_v63, %v1707_v10  ;;  %v2277_v15 = vor.u32 %v2275_v7, %v2274_v58 }
 0x220   : > { %v2262_v18 = vor.u32 %v2260_v32, %v2259_v3  ;;  %v2279_v42 = vshrl.u32 %v1950_v46, 16  ;;  %v2282_v28 = vshll.u32 %v1950_v46, 16 }
 0x221   : > { %v1543_v57 = vpop.permute.xlu0 %1542  ;;  %v2278_v32 = vsel %vm1953_vm6, %v2252_v20, %v2277_v15 }
 0x222   : > { %v2281_v45 = vrot.slane %v2279_v42, 7  ;;  %v1639_v34 = vpop.permute.xlu1 %1638  ;;  %v2263_v25 = vsel %vm1953_vm6, %v2237_v30, %v2262_v18  ;;  %v1798_v51 = vsel %vm1764_vm4, %v1763_v13, %v1543_v57 }
 0x223   : > { %2640 = vmatprep.mubr.bf16.mxu1 %v2263_v25  ;;  %v1884_v0 = vsel %vm901_vm0, %v9239_v9, %v1639_v34 }
 0x224   : > { %v2284_v49 = vor.u32 %v2282_v28, %v2281_v45  ;;  %2641 = vmatmul.mubr.bf16.gmra.mrb[52].mxu1 %v2256_v39 }
 0x225   : > { %v1594_v44 = vpop.permute.xlu0 %1593 }
 0x226   : > { %v1833_v56 = vsel %vm1799_vm5, %v1798_v51, %v1594_v44  ;;  %v1674_v21 = vpop.permute.xlu1 %1673  ;;  %v2285_v37 = vsel %vm1953_vm6, %v2259_v3, %v2284_v49 }
 0x227   : > { %v2294_v30 = vshrl.u32 %v1833_v56, 16  ;;  %2648 = vmatprep.mubr.bf16.mxu1 %v2285_v37  ;;  %v1918_v8 = vsel %vm1764_vm4, %v1884_v0, %v1674_v21  ;;  %v2297_v3 = vshll.u32 %v1833_v56, 16 }
 0x228   : > { %v9448_v63 = vpop.f32.mrb[60].mxu0 }
 0x229   : > { %v2296_v54 = vrot.slane %v2294_v30, 7  ;;  %v9450_v59 = vpop.f32.mrb[61].mxu0 }
 0x22a   : > { %v1709_v16 = vpop.permute.xlu1 %1708  ;;  %v9452_v46 = vpop.f32.mrb[62].mxu0 }
 0x22b   : > { %v1952_v36 = vsel %vm1799_vm5, %v1918_v8, %v1709_v16  ;;  %v9454_v9 = vpop.f32.mrb[63].mxu0  ;;  %v2299_v42 = vor.u32 %v2297_v3, %v2296_v54 }
 0x22c   : > { %v2301_v10 = vshrl.u32 %v1952_v36, 16  ;;  %2649 = vmatmul.mubr.bf16.gmra.mrb[56].mxu1 %v2278_v32  ;;  %v2304_v18 = vshll.u32 %v1952_v36, 16 }
 0x22d   : > { %v2300_v20 = vsel %vm1953_vm6, %v2274_v58, %v2299_v42 }
 0x22e   : > { %v2303_v35 = vrot.slane %v2301_v10, 7 }
 0x230   : > { %v2306_v57 = vor.u32 %v2304_v18, %v2303_v35 }
 0x232   : > { %v2307_v28 = vsel %vm1953_vm6, %v2281_v45, %v2306_v57 }
 0x233   : > { %2656 = vmatprep.mubr.bf16.mxu1 %v2307_v28 }
 0x234   : > { %2657 = vmatmul.mubr.bf16.gmra.mrb[60].mxu1 %v2300_v20 }
 0x25b   : > { %v7187_v34 = vpop.f32.mrb[0].mxu1 }
 0x25c   : > { %v7188_v25 = vpop.f32.mrb[1].mxu1 }
 0x25d   : > { %v7189_v39 = vadd.f32 %v7188_v25, %v7187_v34  ;;  %v7190_v13 = vpop.f32.mrb[2].mxu1 }
 0x25e   : > { %v7191_v49 = vpop.f32.mrb[3].mxu1 }
 0x25f   : > { %v2700_v7 = vadd.f32 %v7189_v39, %v9314_v53  ;;  %v7192_v51 = vadd.f32 %v7191_v49, %v7190_v13 }
 0x261   : > { %v2858_v44 = vmul.f32 0.2, %v2700_v7  ;;  %v2703_v56 = vadd.f32 %v7192_v51, %v9318_v40  ;;  %vm2826_vm0 = vcmp.gt.f32.partialorder %v2700_v7, 0.0 }
 0x263   : > { %vm2827_vm10 = vcmp.gt.f32.partialorder %v2703_v56, 0.0  ;;  %v2859_v21 = vmul.f32 0.2, %v2703_v56  ;;  %v9460_v37 = vsel %vm2826_vm0, %v2700_v7, %v2858_v44 }
 0x265   : > { %v9462_v45 = vsel %vm2827_vm10, %v2703_v56, %v2859_v21 }
 0x266   : > { %v2922_v58 = vpack.c.bf16 %v9462_v45, %v9460_v37 }
 0x267   : > { %v7193_v15 = vpop.f32.mrb[4].mxu1 }
 0x268   : > { %v7194_v30 = vpop.f32.mrb[5].mxu1 }
 0x269   : > { %v7195_v0 = vadd.f32 %v7194_v30, %v7193_v15  ;;  %v7196_v8 = vpop.f32.mrb[6].mxu1 }
 0x26a   : > { %v7197_v16 = vpop.f32.mrb[7].mxu1 }
 0x26b   : > { %v2708_v53 = vadd.f32 %v9309_v27, %v7195_v0  ;;  %v7198_v54 = vadd.f32 %v7197_v16, %v7196_v8 }
 0x26d   : > { %v2860_v36 = vmul.f32 0.2, %v2708_v53  ;;  %v2711_v40 = vadd.f32 %v9316_v26, %v7198_v54  ;;  %vm2828_vm6 = vcmp.gt.f32.partialorder %v2708_v53, 0.0 }
 0x26f   : > { %vm2829_vm12 = vcmp.gt.f32.partialorder %v2711_v40, 0.0  ;;  %v2861_v32 = vmul.f32 0.2, %v2711_v40  ;;  %v9468_v10 = vsel %vm2828_vm6, %v2708_v53, %v2860_v36 }
 0x271   : > { %v9470_v3 = vsel %vm2829_vm12, %v2711_v40, %v2861_v32 }
 0x272   : > { %v2923_v35 = vpack.c.bf16 %v9470_v3, %v9468_v10 }
 0x273   : > { %v7199_v18 = vpop.f32.mrb[8].mxu1 }
 0x274   : > { %v7200_v42 = vpop.f32.mrb[9].mxu1 }
 0x275   : > { %v7201_v57 = vadd.f32 %v7200_v42, %v7199_v18  ;;  %v7202_v28 = vpop.f32.mrb[10].mxu1 }
 0x276   : > { %v7203_v20 = vpop.f32.mrb[11].mxu1 }
 0x277   : > { %v2716_v27 = vadd.f32 %v7201_v57, %v9330_v33  ;;  %v7204_v34 = vadd.f32 %v7203_v20, %v7202_v28 }
 0x279   : > { %v2862_v25 = vmul.f32 0.2, %v2716_v27  ;;  %v2719_v26 = vadd.f32 %v7204_v34, %v9335_v12  ;;  %vm2830_vm13 = vcmp.gt.f32.partialorder %v2716_v27, 0.0 }
 0x27b   : > { %vm2831_vm14 = vcmp.gt.f32.partialorder %v2719_v26, 0.0  ;;  %v2863_v39 = vmul.f32 0.2, %v2719_v26  ;;  %v9476_v13 = vsel %vm2830_vm13, %v2716_v27, %v2862_v25  ;;  %v7966_v25 = vld [vmem:[%s11033_s3 + $0x4] ss:$8 sps:$4 sm:$0xff]  }
 0x27c   : > { %3018 = vmatprep.mubr.bf16.mxu0 %v7966_v25 }
 0x27d   : > { %v9478_v49 = vsel %vm2831_vm14, %v2719_v26, %v2863_v39 }
 0x27e   : > { %v2924_v7 = vpack.c.bf16 %v9478_v49, %v9476_v13 }
 0x27f   : > { %v7205_v51 = vpop.f32.mrb[12].mxu1 }
 0x280   : > { %v7206_v44 = vpop.f32.mrb[13].mxu1 }
 0x281   : > { %v7207_v56 = vadd.f32 %v7206_v44, %v7205_v51  ;;  %v7208_v21 = vpop.f32.mrb[14].mxu1 }
 0x282   : > { %v7209_v15 = vpop.f32.mrb[15].mxu1 }
 0x283   : > { %v2724_v33 = vadd.f32 %v9328_v47, %v7207_v56  ;;  %v7210_v30 = vadd.f32 %v7209_v15, %v7208_v21 }
 0x285   : > { %v2864_v0 = vmul.f32 0.2, %v2724_v33  ;;  %v2727_v12 = vadd.f32 %v9333_v1, %v7210_v30  ;;  %vm2832_vm1 = vcmp.gt.f32.partialorder %v2724_v33, 0.0 }
 0x287   : > { %vm2833_vm2 = vcmp.gt.f32.partialorder %v2727_v12, 0.0  ;;  %v2865_v8 = vmul.f32 0.2, %v2727_v12  ;;  %v9484_v16 = vsel %vm2832_vm1, %v2724_v33, %v2864_v0 }
 0x289   : > { %v9486_v53 = vsel %vm2833_vm2, %v2727_v12, %v2865_v8 }
 0x28a   : > { %v2925_v54 = vpack.c.bf16 %v9486_v53, %v9484_v16 }
 0x28b   : > { %v7211_v36 = vpop.f32.mrb[16].mxu1 }
 0x28c   : > { %v7212_v40 = vpop.f32.mrb[17].mxu1 }
 0x28d   : > { %v7213_v32 = vadd.f32 %v7212_v40, %v7211_v36  ;;  %v7214_v18 = vpop.f32.mrb[18].mxu1 }
 0x28e   : > { %v7215_v42 = vpop.f32.mrb[19].mxu1 }
 0x28f   : > { %v2732_v47 = vadd.f32 %v7213_v32, %v9345_v17  ;;  %v7216_v57 = vadd.f32 %v7215_v42, %v7214_v18 }
 0x291   : > { %v2866_v28 = vmul.f32 0.2, %v2732_v47  ;;  %v2735_v1 = vadd.f32 %v7216_v57, %v9354_v50  ;;  %vm2834_vm3 = vcmp.gt.f32.partialorder %v2732_v47, 0.0 }
 0x293   : > { %vm2835_vm5 = vcmp.gt.f32.partialorder %v2735_v1, 0.0  ;;  %v2867_v20 = vmul.f32 0.2, %v2735_v1  ;;  %v9492_v27 = vsel %vm2834_vm3, %v2732_v47, %v2866_v28 }
 0x295   : > { %v9494_v34 = vsel %vm2835_vm5, %v2735_v1, %v2867_v20 }
 0x296   : > { %v2926_v26 = vpack.c.bf16 %v9494_v34, %v9492_v27 }
 0x297   : > { %v7217_v39 = vpop.f32.mrb[20].mxu1 }
 0x298   : > { %v7218_v17 = vpop.f32.mrb[21].mxu1 }
 0x299   : > { %v7219_v51 = vadd.f32 %v7218_v17, %v7217_v39  ;;  %v7220_v44 = vpop.f32.mrb[22].mxu1 }
 0x29a   : > { %v7221_v50 = vpop.f32.mrb[23].mxu1 }
 0x29b   : > { %v2740_v56 = vadd.f32 %v9343_v55, %v7219_v51  ;;  %v7222_v21 = vadd.f32 %v7221_v50, %v7220_v44 }
 0x29d   : > { %v2868_v15 = vmul.f32 0.2, %v2740_v56  ;;  %v2743_v33 = vadd.f32 %v9349_v14, %v7222_v21  ;;  %vm2836_vm7 = vcmp.gt.f32.partialorder %v2740_v56, 0.0 }
 0x29f   : > { %vm2837_vm8 = vcmp.gt.f32.partialorder %v2743_v33, 0.0  ;;  %v2869_v30 = vmul.f32 0.2, %v2743_v33  ;;  %v9503_v0 = vsel %vm2836_vm7, %v2740_v56, %v2868_v15 }
 0x2a1   : > { %v9505_v12 = vsel %vm2837_vm8, %v2743_v33, %v2869_v30 }
 0x2a2   : > { %v2927_v8 = vpack.c.bf16 %v9505_v12, %v9503_v0 }
 0x2a3   : > { %v7223_v36 = vpop.f32.mrb[24].mxu1 }
 0x2a4   : > { %v7224_v40 = vpop.f32.mrb[25].mxu1 }
 0x2a5   : > { %v7225_v32 = vadd.f32 %v7224_v40, %v7223_v36  ;;  %v7226_v18 = vpop.f32.mrb[26].mxu1 }
 0x2a6   : > { %v7227_v42 = vpop.f32.mrb[27].mxu1 }
 0x2a7   : > { %v2748_v55 = vadd.f32 %v7225_v32, %v9363_v48  ;;  %v7228_v47 = vadd.f32 %v7227_v42, %v7226_v18 }
 0x2a9   : > { %v2870_v57 = vmul.f32 0.2, %v2748_v55  ;;  %v2751_v14 = vadd.f32 %v7228_v47, %v9372_v11  ;;  %vm2838_vm9 = vcmp.gt.f32.partialorder %v2748_v55, 0.0 }
 0x2ab   : > { %vm2839_vm0 = vcmp.gt.f32.partialorder %v2751_v14, 0.0  ;;  %v2871_v28 = vmul.f32 0.2, %v2751_v14  ;;  %v9511_v1 = vsel %vm2838_vm9, %v2748_v55, %v2870_v57 }
 0x2ad   : > { %v9513_v20 = vsel %vm2839_vm0, %v2751_v14, %v2871_v28 }
 0x2ae   : > { %v2928_v25 = vpack.c.bf16 %v9513_v20, %v9511_v1  ;;  %v7969_v1 = vld [vmem:[%s11033_s3 + $0x10] ss:$8 sps:$4 sm:$0xff]   ;;  %v7970_v20 = vld [vmem:[%s11033_s3 + $0x24] ss:$8 sps:$4 sm:$0xff]  }
 0x2af   : > { %v7229_v39 = vpop.f32.mrb[28].mxu1 }
 0x2b0   : > { %v7230_v17 = vpop.f32.mrb[29].mxu1 }
 0x2b1   : > { %v7231_v51 = vadd.f32 %v7230_v17, %v7229_v39  ;;  %v7232_v44 = vpop.f32.mrb[30].mxu1 }
 0x2b2   : > { %v7233_v50 = vpop.f32.mrb[31].mxu1 }
 0x2b3   : > { %v2756_v48 = vadd.f32 %v9361_v29, %v7231_v51  ;;  %v7234_v56 = vadd.f32 %v7233_v50, %v7232_v44 }
 0x2b5   : > { %v2872_v21 = vmul.f32 0.2, %v2756_v48  ;;  %v2759_v11 = vadd.f32 %v9369_v31, %v7234_v56  ;;  %vm2840_vm10 = vcmp.gt.f32.partialorder %v2756_v48, 0.0 }
 0x2b7   : > { %vm2841_vm6 = vcmp.gt.f32.partialorder %v2759_v11, 0.0  ;;  %v2873_v15 = vmul.f32 0.2, %v2759_v11  ;;  %v9519_v33 = vsel %vm2840_vm10, %v2756_v48, %v2872_v21 }
 0x2b9   : > { %v9521_v30 = vsel %vm2841_vm6, %v2759_v11, %v2873_v15 }
 0x2ba   : > { %v2929_v36 = vpack.c.bf16 %v9521_v30, %v9519_v33  ;;  %v7973_v33 = vld [vmem:[%s11033_s3 + $0x34] ss:$8 sps:$4 sm:$0xff]   ;;  %v7975_v30 = vld [vmem:[%s11033_s3 + $0x30] ss:$8 sps:$4 sm:$0xff]  }
 0x2bb   : > { %v7235_v40 = vpop.f32.mrb[32].mxu1 }
 0x2bc   : > { %v7236_v32 = vpop.f32.mrb[33].mxu1 }
 0x2bd   : > { %v7237_v18 = vadd.f32 %v7236_v32, %v7235_v40  ;;  %v7238_v42 = vpop.f32.mrb[34].mxu1 }
 0x2be   : > { %v7239_v55 = vpop.f32.mrb[35].mxu1 }
 0x2bf   : > { %v2764_v29 = vadd.f32 %v7237_v18, %v9383_v41  ;;  %v7240_v47 = vadd.f32 %v7239_v55, %v7238_v42 }
 0x2c1   : > { %v2874_v57 = vmul.f32 0.2, %v2764_v29  ;;  %v2767_v31 = vadd.f32 %v7240_v47, %v9389_v6  ;;  %vm2842_vm12 = vcmp.gt.f32.partialorder %v2764_v29, 0.0 }
 0x2c3   : > { %vm2843_vm13 = vcmp.gt.f32.partialorder %v2767_v31, 0.0  ;;  %v2875_v14 = vmul.f32 0.2, %v2767_v31  ;;  %v2906_v28 = vsel %vm2842_vm12, %v2764_v29, %v2874_v57 }
 0x2c5   : > { %v2907_v39 = vsel %vm2843_vm13, %v2767_v31, %v2875_v14 }
 0x2c6   : > { %v2930_v17 = vpack.c.bf16 %v2907_v39, %v2906_v28 }
 0x2c7   : > { %v7241_v51 = vpop.f32.mrb[36].mxu1 }
 0x2c8   : > { %v7242_v44 = vpop.f32.mrb[37].mxu1  ;;  %7301 = vmatprep.subr.bf16.mxu0 %v2930_v17 }
 0x2c9   : > { %v7243_v50 = vadd.f32 %v7242_v44, %v7241_v51  ;;  %v7244_v48 = vpop.f32.mrb[38].mxu1  ;;  %7302 = vmatpush3.bf16.msra.mxu0 %v2922_v58 }
 0x2ca   : > { %v7245_v41 = vpop.f32.mrb[39].mxu1 }
 0x2cb   : > { %v2772_v56 = vadd.f32 %v9381_v38, %v7243_v50  ;;  %v7246_v21 = vadd.f32 %v7245_v41, %v7244_v48 }
 0x2cd   : > { %v2876_v6 = vmul.f32 0.2, %v2772_v56  ;;  %v2775_v11 = vadd.f32 %v9386_v43, %v7246_v21  ;;  %vm2844_vm14 = vcmp.gt.f32.partialorder %v2772_v56, 0.0 }
 0x2cf   : > { %vm2845_vm1 = vcmp.gt.f32.partialorder %v2775_v11, 0.0  ;;  %v2877_v15 = vmul.f32 0.2, %v2775_v11  ;;  %v2908_v40 = vsel %vm2844_vm14, %v2772_v56, %v2876_v6 }
 0x2d1   : > { %v2909_v32 = vsel %vm2845_vm1, %v2775_v11, %v2877_v15 }
 0x2d2   : > { %v2931_v18 = vpack.c.bf16 %v2909_v32, %v2908_v40 }
 0x2d3   : > { %v7247_v42 = vpop.f32.mrb[40].mxu1 }
 0x2d4   : > { %v7248_v55 = vpop.f32.mrb[41].mxu1  ;;  %7303 = vmatprep.subr.bf16.mxu0 %v2931_v18 }
 0x2d5   : > { %v7249_v29 = vadd.f32 %v7248_v55, %v7247_v42  ;;  %v7250_v47 = vpop.f32.mrb[42].mxu1  ;;  %7304 = vmatpush3.bf16.msra.mxu0 %v2923_v35 }
 0x2d6   : > { %v7251_v38 = vpop.f32.mrb[43].mxu1 }
 0x2d7   : > { %v2780_v37 = vadd.f32 %v7249_v29, %v9398_v5  ;;  %v7252_v45 = vadd.f32 %v7251_v38, %v7250_v47 }
 0x2d9   : > { %v2878_v43 = vmul.f32 0.2, %v2780_v37  ;;  %v2783_v58 = vadd.f32 %v7252_v45, %v9405_v2  ;;  %vm2846_vm2 = vcmp.gt.f32.partialorder %v2780_v37, 0.0 }
 0x2db   : > { %vm2847_vm3 = vcmp.gt.f32.partialorder %v2783_v58, 0.0  ;;  %v2879_v57 = vmul.f32 0.2, %v2783_v58  ;;  %v2910_v31 = vsel %vm2846_vm2, %v2780_v37, %v2878_v43 }
 0x2dd   : > { %v2911_v14 = vsel %vm2847_vm3, %v2783_v58, %v2879_v57 }
 0x2de   : > { %v2932_v28 = vpack.c.bf16 %v2911_v14, %v2910_v31 }
 0x2df   : > { %v7253_v39 = vpop.f32.mrb[44].mxu1 }
 0x2e0   : > { %v7254_v17 = vpop.f32.mrb[45].mxu1  ;;  %7305 = vmatprep.subr.bf16.mxu0 %v2932_v28 }
 0x2e1   : > { %v7255_v51 = vadd.f32 %v7254_v17, %v7253_v39  ;;  %v7256_v44 = vpop.f32.mrb[46].mxu1  ;;  %7306 = vmatpush3.bf16.msra.mxu0 %v2924_v7 }
 0x2e2   : > { %v7257_v5 = vpop.f32.mrb[47].mxu1 }
 0x2e3   : > { %v2788_v10 = vadd.f32 %v9395_v23, %v7255_v51  ;;  %v7258_v3 = vadd.f32 %v7257_v5, %v7256_v44 }
 0x2e5   : > { %v2880_v2 = vmul.f32 0.2, %v2788_v10  ;;  %v2791_v35 = vadd.f32 %v9403_v62, %v7258_v3  ;;  %vm2848_vm5 = vcmp.gt.f32.partialorder %v2788_v10, 0.0 }
 0x2e7   : > { %vm2849_vm7 = vcmp.gt.f32.partialorder %v2791_v35, 0.0  ;;  %v2881_v50 = vmul.f32 0.2, %v2791_v35  ;;  %v2912_v48 = vsel %vm2848_vm5, %v2788_v10, %v2880_v2 }
 0x2e9   : > { %v2913_v41 = vsel %vm2849_vm7, %v2791_v35, %v2881_v50 }
 0x2ea   : > { %v2933_v56 = vpack.c.bf16 %v2913_v41, %v2912_v48 }
 0x2eb   : > { %v7259_v21 = vpop.f32.mrb[48].mxu1 }
 0x2ec   : > { %v7260_v6 = vpop.f32.mrb[49].mxu1  ;;  %7307 = vmatprep.subr.bf16.mxu0 %v2933_v56 }
 0x2ed   : > { %v7261_v11 = vadd.f32 %v7260_v6, %v7259_v21  ;;  %v7262_v15 = vpop.f32.mrb[50].mxu1  ;;  %7308 = vmatpush3.bf16.msra.mxu0 %v2925_v54  ;;  %v6854_v21 = vadd.s32 4294967280, %v8268_v19 }
 0x2ee   : > { %v7263_v23 = vpop.f32.mrb[51].mxu1 }
 0x2ef   : > { %v2796_v13 = vadd.f32 %v7261_v11, %v9420_v52  ;;  %v7264_v49 = vadd.f32 %v7263_v23, %v7262_v15  ;;  %v677_v6 = vand.u32 7, %v6854_v21  ;;  %v11104_v15 = vld [vmem:[#allocation3_spill] sm:$0xff]  ;;  %v11112_v21 = vld [vmem:[#allocation8_spill] sm:$0xff] }
 0x2f0   : > { %v6860_v23 = vadd.s32 4294967280, %v11104_v15 }
 0x2f1   : > { %v2882_v62 = vmul.f32 0.2, %v2796_v13  ;;  %v2799_v7 = vadd.f32 %v7264_v49, %v9424_v22  ;;  %vm2850_vm8 = vcmp.gt.f32.partialorder %v2796_v13, 0.0  ;;  %vm731_vm1 = vcmp.ne.s32.totalorder %v677_v6, 0 }
 0x2f3   : > { %vm2851_vm9 = vcmp.gt.f32.partialorder %v2799_v7, 0.0  ;;  %v2883_v40 = vmul.f32 0.2, %v2799_v7  ;;  %v2914_v32 = vsel %vm2850_vm8, %v2796_v13, %v2882_v62  ;;  %v11105_v13 = vld [vmem:[#allocation5_spill] sm:$0xff]  ;;  %v7976_v62 = vld [vmem:[%s11034_s4 + $0x40] sm:$0xff]  }
 0x2f4   : > { %v6859_v49 = vadd.s32 4294967280, %v11105_v13  ;;  %7341 = vmatprep.subr.bf16.mxu1 %v7976_v62 }
 0x2f5   : > { %v2915_v18 = vsel %vm2851_vm9, %v2799_v7, %v2883_v40  ;;  %v9594_v7 = vsel %vm731_vm1, 1.0, %v11087_v60  ;;  %vm689_vm9 = vcmp.ne.s32.totalorder %v677_v6, 7  ;;  %v9673_v6 = vadd.s32 4294967280, %v11112_v21 }
 0x2f6   : > { %v2934_v42 = vpack.c.bf16 %v2915_v18, %v2914_v32  ;;  %v684_v32 = vand.u32 7, %v6860_v23 }
 0x2f7   : > { %v7265_v55 = vpop.f32.mrb[52].mxu1 }
 0x2f8   : > { %v7266_v29 = vpop.f32.mrb[53].mxu1  ;;  %7309 = vmatprep.subr.bf16.mxu0 %v2934_v42  ;;  %v7977_v42 = vld [vmem:[%s11034_s4] sm:$0xff]   ;;  %vm696_vm3 = vcmp.ne.s32.totalorder %v684_v32, 7  ;;  %vm738_vm7 = vcmp.ne.s32.totalorder %v684_v32, 0 }
 0x2f9   : > { %v7267_v47 = vadd.f32 %v7266_v29, %v7265_v55  ;;  %v7268_v38 = vpop.f32.mrb[54].mxu1  ;;  %7310 = vmatpush3.bf16.msra.mxu0 %v2926_v26  ;;  %v683_v55 = vand.u32 7, %v6859_v49  ;;  %7342 = vmatpush3.bf16.msra.mxu1 %v7977_v42  ;;  %v6872_v29 = vsel %vm696_vm3, 1.0, %v11087_v60 }
 0x2fa   : > { %v7269_v52 = vpop.f32.mrb[55].mxu1 }
 0x2fb   : > { %v2804_v16 = vadd.f32 %v9415_v4, %v7267_v47  ;;  %v7270_v53 = vadd.f32 %v7269_v52, %v7268_v38  ;;  %vm695_vm5 = vcmp.ne.s32.totalorder %v683_v55, 7  ;;  %v7978_v52 = vld [vmem:[%s11034_s4 + $0x48] sm:$0xff]   ;;  %vm737_vm8 = vcmp.ne.s32.totalorder %v683_v55, 0 }
 0x2fc   : > { %v6871_v47 = vsel %vm695_vm5, 1.0, %v11087_v60  ;;  %7343 = vmatprep.subr.bf16.mxu1 %v7978_v52  ;;  %vm3200_vm5 = vcmask 1043456  }
 0x2fd   : > { %v2884_v22 = vmul.f32 0.2, %v2804_v16  ;;  %v2807_v54 = vadd.f32 %v9422_v61, %v7270_v53  ;;  %vm2852_vm0 = vcmp.gt.f32.partialorder %v2804_v16, 0.0  ;;  %v9606_v38 = vpack.c.bf16 %v6872_v29, %v6871_v47 }
 0x2fe   : > { %v6883_v53 = vsel %vm737_vm8, 1.0, %v11087_v60 }
 0x2ff   : > { %vm2853_vm10 = vcmp.gt.f32.partialorder %v2807_v54, 0.0  ;;  %v2885_v37 = vmul.f32 0.2, %v2807_v54  ;;  %v7271_v45 = vpop.f32.mrb[56].mxu1  ;;  %v2916_v31 = vsel %vm2852_vm0, %v2804_v16, %v2884_v22  ;;  %v7979_v16 = vld [vmem:[%s11034_s4 + $0x8] sm:$0xff]   ;;  %v6884_v22 = vsel %vm738_vm7, 1.0, %v11087_v60 }
 0x300   : > { %v7272_v43 = vpop.f32.mrb[57].mxu1  ;;  %7344 = vmatpush3.bf16.msra.mxu1 %v7979_v16 }
 0x301   : > { %v7273_v58 = vadd.f32 %v7272_v43, %v7271_v45  ;;  %v7274_v57 = vpop.f32.mrb[58].mxu1  ;;  %v2917_v14 = vsel %vm2853_vm10, %v2807_v54, %v2885_v37  ;;  %v9616_v54 = vpack.c.bf16 %v6884_v22, %v6883_v53  ;;  %v7980_v37 = vld [vmem:[%s11034_s4 + $0x50] sm:$0xff]   ;;  %v7982_v43 = vld [vmem:[%s11034_s4 + $0x58] sm:$0xff]   ;;  %v11113_v22 = vld [vmem:[#allocation6_spill] sm:$0xff] }
 0x302   : > { %v7275_v28 = vpop.f32.mrb[59].mxu1  ;;  %v2935_v39 = vpack.c.bf16 %v2917_v14, %v2916_v31  ;;  %v7981_v45 = vld [vmem:[%s11034_s4 + $0x10] sm:$0xff]   ;;  %7345 = vmatprep.subr.bf16.mxu1 %v7980_v37  ;;  %v7985_v31 = vld [vmem:[%s11034_s4 + $0x20] sm:$0xff]   ;;  %v7986_v14 = vld [vmem:[%s11034_s4 + $0x68] sm:$0xff]   ;;  %v9692_v37 = vadd.s32 4294967280, %v11113_v22 }
 0x303   : > { %v2812_v27 = vadd.f32 %v7273_v58, %v9450_v59  ;;  %v7276_v34 = vadd.f32 %v7275_v28, %v7274_v57  ;;  %v7983_v58 = vld [vmem:[%s11034_s4 + $0x18] sm:$0xff]   ;;  %v7984_v57 = vld [vmem:[%s11034_s4 + $0x60] sm:$0xff]   ;;  %v7987_v28 = vld [vmem:[%s11034_s4 + $0x28] sm:$0xff]  }
 0x304   : > { %7311 = vmatprep.subr.bf16.mxu0 %v2935_v39  ;;  %7346 = vmatpush3.bf16.msra.mxu1 %v7981_v45  ;;  %v7988_v39 = vld [vmem:[%s11034_s4 + $0x70] sm:$0xff]   ;;  %v7990_v45 = vld [vmem:[%s11034_s4 + $0xc0] sm:$0xff]  }
 0x305   : > { %v2886_v4 = vmul.f32 0.2, %v2812_v27  ;;  %v2815_v26 = vadd.f32 %v7276_v34, %v9454_v9  ;;  %7312 = vmatpush3.bf16.msra.mxu0 %v2927_v8  ;;  %vm2854_vm6 = vcmp.gt.f32.partialorder %v2812_v27, 0.0  ;;  %7347 = vmatprep.subr.bf16.mxu1 %v7982_v43  ;;  %v11106_v34 = vld [vmem:[#allocation2_spill] sm:$0xff] }
 0x306   : > { %v7991_v43 = vld [vmem:[%s11034_s4 + $0x80] sm:$0xff]  }
 0x307   : > { %vm2855_vm12 = vcmp.gt.f32.partialorder %v2815_v26, 0.0  ;;  %v2887_v61 = vmul.f32 0.2, %v2815_v26  ;;  %v7277_v17 = vpop.f32.mrb[60].mxu1  ;;  %v2918_v10 = vsel %vm2854_vm6, %v2812_v27, %v2886_v4  ;;  %v7989_v27 = vld [vmem:[%s11034_s4 + $0x30] sm:$0xff]   ;;  %v6856_v4 = vadd.s32 4294967280, %v11106_v34 }
 0x308   : > { %v7278_v51 = vpop.f32.mrb[61].mxu1  ;;  %7348 = vmatpush3.bf16.msra.mxu1 %v7983_v58 }
 0x309   : > { %v7279_v44 = vadd.f32 %v7278_v51, %v7277_v17  ;;  %v7280_v5 = vpop.f32.mrb[62].mxu1  ;;  %v2919_v3 = vsel %vm2855_vm12, %v2815_v26, %v2887_v61  ;;  %7349 = vmatprep.subr.bf16.mxu1 %v7984_v57  ;;  %v665_v26 = vadd.s32 32, %v8268_v19  ;;  %v679_v61 = vand.u32 7, %v8268_v19  ;;  %v11107_v51 = vld [vmem:[#allocation4_spill] sm:$0xff]  ;;  %v11108_v19 = vld [vmem:[#allocation9_spill] sm:$0xff] }
 0x30a   : > { %v7281_v2 = vpop.f32.mrb[63].mxu1  ;;  %v2936_v59 = vpack.c.bf16 %v2919_v3, %v2918_v10  ;;  %v680_v17 = vand.u32 7, %v6856_v4 }
 0x30b   : > { %v2820_v35 = vadd.f32 %v9448_v63, %v7279_v44  ;;  %v7282_v50 = vadd.f32 %v7281_v2, %v7280_v5  ;;  %v7964_v63 = vld [vmem:[%s11033_s3] ss:$8 sps:$4 sm:$0xff]   ;;  %v6858_v44 = vadd.s32 4294967280, %v11107_v51  ;;  %v6865_v5 = vsel %vm689_vm9, 1.0, %v11087_v60 }
 0x30c   : > { %7313 = vmatprep.subr.bf16.mxu0 %v2936_v59  ;;  %7350 = vmatpush3.bf16.msra.mxu1 %v7985_v31  ;;  %v6857_v3 = vadd.s32 4294967280, %v665_v26  ;;  %vm691_vm10 = vcmp.ne.s32.totalorder %v679_v61, 7  ;;  %vm692_vm6 = vcmp.ne.s32.totalorder %v680_v17, 7  ;;  %vm733_vm12 = vcmp.ne.s32.totalorder %v679_v61, 0 }
 0x30d   : > { %v2888_v9 = vmul.f32 0.2, %v2820_v35  ;;  %v2823_v48 = vadd.f32 %v9452_v46, %v7282_v50  ;;  %7314 = vmatpush3.bf16.msra.mxu0 %v2928_v25  ;;  %vm2856_vm13 = vcmp.gt.f32.partialorder %v2820_v35, 0.0  ;;  %v7967_v46 = vld [vmem:[%s11033_s3 + $0x14] ss:$8 sps:$4 sm:$0xff]   ;;  %7351 = vmatprep.subr.bf16.mxu1 %v7986_v14  ;;  %v682_v59 = vand.u32 7, %v6858_v44 }
 0x30e   : > { %v7972_v25 = vld [vmem:[%s11033_s3 + $0x20] ss:$8 sps:$4 sm:$0xff]   ;;  %v6867_v50 = vsel %vm691_vm10, 1.0, %v11087_v60  ;;  %v688_v51 = vand.u32 7, %v9673_v6  ;;  %vm3237_vm9 = vcmask 1042432  }
 0x30f   : > { %vm2857_vm14 = vcmp.gt.f32.partialorder %v2823_v48, 0.0  ;;  %v2889_v0 = vmul.f32 0.2, %v2823_v48  ;;  %v2920_v12 = vsel %vm2856_vm13, %v2820_v35, %v2888_v9  ;;  %v6868_v9 = vsel %vm692_vm6, 1.0, %v11087_v60 }
 0x310   : > { %7352 = vmatpush3.bf16.msra.mxu1 %v7987_v28  ;;  %vm734_vm13 = vcmp.ne.s32.totalorder %v680_v17, 0  ;;  %vm9668_vm1 = vcmp.ne.s32.totalorder %v682_v59, 0  ;;  %vm9763_vm6 = vcmp.ne.s32.totalorder %v688_v51, 0 }
 0x311   : > { %v2921_v8 = vsel %vm2857_vm14, %v2823_v48, %v2889_v0  ;;  %7353 = vmatprep.subr.bf16.mxu1 %v7988_v39  ;;  %v681_v0 = vand.u32 7, %v6857_v3  ;;  %vm694_vm14 = vcmp.ne.s32.totalorder %v682_v59, 7  ;;  %v6882_v53 = vsel %vm9668_vm1, 1.0, %v11087_v60  ;;  %v7993_v3 = vld [vmem:[%s11034_s4 + $0xc8] sm:$0xff]  }
 0x312   : > { %v2937_v41 = vpack.c.bf16 %v2921_v8, %v2920_v12  ;;  %v9657_v12 = vadd.s32 4294967280, %v11108_v19  ;;  %v6870_v13 = vsel %vm694_vm14, 1.0, %v11087_v60  ;;  %vm3314_vm14 = vsmask.f32 4352 }
 0x313   : > { %vm735_vm3 = vcmp.ne.s32.totalorder %v681_v0, 0 }
 0x314   : > { %7315 = vmatprep.subr.bf16.mxu0 %v2937_v41  ;;  %7354 = vmatpush3.bf16.msra.mxu1 %v7989_v27  ;;  %v6881_v16 = vsel %vm735_vm3, 1.0, %v11087_v60 }
 0x315   : > { %7316 = vmatpush3.bf16.msra.mxu0 %v2929_v36  ;;  %v11103_v36 = vld [vmem:[#allocation14_spill] sm:$0xff]  ;;  %v9713_v17 = vpack.c.bf16 %v6882_v53, %v6881_v16 }
 0x316   : > { %v6855_v56 = vadd.s32 4294967280, %v11103_v36  ;;  %v6880_v36 = vsel %vm734_vm13, 1.0, %v11087_v60  ;;  %7381 = vmatprep.subr.bf16.mxu0 %v7990_v45 }
 0x318   : > { %3019 = vmatmul.mubr.bf16.vlgmr.msra.gmra.mrb[64].mxu0 %v7964_v63  ;;  %v678_v11 = vand.u32 7, %v6855_v56 }
 0x319   : > { %3026 = vmatprep.mubr.bf16.mxu0 %v7967_v46  ;;  %7382 = vmatpush3.bf16.msra.mxu0 %v7991_v43 }
 0x31a   : > { %vm732_vm2 = vcmp.ne.s32.totalorder %v678_v11, 0  ;;  %vm690_vm0 = vcmp.ne.s32.totalorder %v678_v11, 7  ;;  %v686_v11 = vand.u32 7, %v9657_v12  ;;  %7383 = vmatprep.subr.bf16.mxu0 %v7993_v3  ;;  %v7999_v12 = vld [vmem:[%s11034_s4 + $0x98] sm:$0xff]  }
 0x31b   : > { %v9597_v40 = vsel %vm732_vm2, 1.0, %v11087_v60  ;;  %v6866_v10 = vsel %vm690_vm0, 1.0, %v11087_v60  ;;  %vm693_vm2 = vcmp.ne.s32.totalorder %v681_v0, 7  ;;  %vm3220_vm0 = vsmask.f32 3328 }
 0x31c   : > { %v767_v18 = vpack.c.bf16 %v9597_v40, %v9594_v7  ;;  %v725_v2 = vpack.c.bf16 %v6866_v10, %v6865_v5  ;;  %v6869_v55 = vsel %vm693_vm2, 1.0, %v11087_v60  ;;  %vm9702_vm7 = vcmp.ne.s32.totalorder %v686_v11, 7  ;;  %v7992_v10 = vld [vmem:[%s11034_s4 + $0x78] sm:$0xff]  }
 0x31d   : > { %v9707_v27 = vpack.c.bf16 %v6870_v13, %v6869_v55  ;;  %v687_v5 = vand.u32 7, %v9692_v37  ;;  %7355 = vmatprep.subr.bf16.mxu1 %v7992_v10  ;;  %v7997_v13 = vld [vmem:[%s11034_s4 + $0x90] sm:$0xff]   ;;  %vm9794_vm13 = vcmp.ne.s32.totalorder %v686_v11, 0  ;;  %v8000_v11 = vld [vmem:[%s11034_s4 + $0xe0] sm:$0xff]   ;;  %vm700_vm2 = vcmp.ne.s32.totalorder %v688_v51, 7  ;;  %v8011_v51 = vld [vmem:[%s11034_s4 + $0x118] sm:$0xff]  }
 0x31e   : > { %v9659_v46 = vmul.bf16 0, %v725_v2  ;;  %v7994_v2 = vld [vmem:[%s11034_s4 + $0x38] sm:$0xff]   ;;  %v6876_v6 = vsel %vm700_vm2, 1.0, %v11087_v60 }
 0x31f   : > { %7356 = vmatpush3.bf16.msra.mxu1 %v7994_v2  ;;  %vm9757_vm10 = vcmp.ne.s32.totalorder %v687_v5, 0  ;;  %vm699_vm1 = vcmp.ne.s32.totalorder %v687_v5, 7 }
 0x320   : > { %3027 = vmatmul.mubr.bf16.gmra.mrb[68].mxu0 %v7969_v1  ;;  %v11109_v1 = vld [vmem:[#allocation7_spill] sm:$0xff]  ;;  %v9677_v23 = vrot.slane %v9659_v46, 4  ;;  %v6875_v37 = vsel %vm699_vm1, 1.0, %v11087_v60 }
 0x321   : > { %3034 = vmatprep.mubr.bf16.mxu0 %v7970_v20  ;;  %v9662_v20 = vadd.s32 4294967280, %v11109_v1 }
 0x323   : > { %v685_v49 = vand.u32 7, %v9662_v20 }
 0x325   : > { %vm697_vm8 = vcmp.ne.s32.totalorder %v685_v49, 7 }
 0x326   : > { %v6873_v0 = vsel %vm697_vm8, 1.0, %v11087_v60 }
 0x328   : > { %3035 = vmatmul.mubr.bf16.gmra.mrb[72].mxu0 %v7972_v25  ;;  %v9664_v25 = vpack.c.bf16 %v6868_v9, %v6867_v50  ;;  %v6874_v50 = vsel %vm9702_vm7, 1.0, %v11087_v60  ;;  %v7995_v9 = vld [vmem:[%s11034_s4 + $0x88] sm:$0xff]  }
 0x329   : > { %3042 = vmatprep.mubr.bf16.mxu0 %v7973_v33  ;;  %7384 = vmatpush3.bf16.msra.mxu0 %v7995_v9 }
 0x330   : > { %3043 = vmatmul.mubr.bf16.gmra.mrb[76].mxu0 %v7975_v30  ;;  %v6879_v30 = vsel %vm733_vm12, 1.0, %v11087_v60  ;;  %vm739_vm12 = vcmp.ne.s32.totalorder %v685_v49, 0  ;;  %v6887_v49 = vsel %vm9757_vm10, 1.0, %v11087_v60 }
 0x331   : > { %v9685_v47 = vpack.c.bf16 %v6880_v36, %v6879_v30  ;;  %v6885_v10 = vsel %vm739_vm12, 1.0, %v11087_v60 }
 0x3eb   : > { %v7317_v35 = vpop.f32.mrb[64].mxu0 }
 0x3ec   : > { %v7318_v48 = vpop.f32.mrb[65].mxu0 }
 0x3ed   : > { %v7319_v8 = vadd.f32 %v7318_v48, %v7317_v35  ;;  %v7320_v41 = vpop.f32.mrb[66].mxu0 }
 0x3ee   : > { %v7321_v63 = vpop.f32.mrb[67].mxu0 }
 0x3ef   : > { %v7322_v33 = vadd.f32 %v7321_v63, %v7320_v41 }
 0x3f1   : > { %v3051_v15 = vpack.c.bf16 %v7322_v33, %v7319_v8 }
 0x3f3   : > { %v7323_v62 = vpop.f32.mrb[68].mxu0  ;;  %v9682_v32 = vmul.bf16 %v3051_v15, %v9664_v25  ;;  %v3140_v42 = vshll.u32 %v3051_v15, 16  ;;  %v3144_v29 = vshrl.u32 %v3051_v15, 16  ;;  %v9718_v44 = vmul.bf16 %v3051_v15, %v9685_v47  ;;  %v7996_v15 = vld [vmem:[%s11034_s4 + $0xd0] sm:$0xff]  }
 0x3f4   : > { %v7324_v52 = vpop.f32.mrb[69].mxu0  ;;  %7385 = vmatprep.subr.bf16.mxu0 %v7996_v15 }
 0x3f5   : > { %v7325_v57 = vadd.f32 %v7324_v52, %v7323_v62  ;;  %v7326_v31 = vpop.f32.mrb[70].mxu0  ;;  %v3202_v14 = vrot.slane %v9682_v32, 4  ;;  %v3142_v39 = vrot.slane %v3140_v42, 1  ;;  %v3221_v34 = vrot.slane %v3144_v29, 4  ;;  %7386 = vmatpush3.bf16.msra.mxu0 %v7997_v13 }
 0x3f6   : > { %v7327_v28 = vpop.f32.mrb[71].mxu0  ;;  %v3222_v4 = vrot.slane %v3140_v42, 5  ;;  %v3238_v36 = vrot.slane %v9718_v44, 5  ;;  %v3187_v53 = vrot.slane %v9718_v44, 1 }
 0x3f7   : > { %v7328_v26 = vadd.f32 %v7327_v28, %v7326_v31  ;;  %v3203_v61 = vsel %vm3200_vm5, %v9677_v23, %v3202_v14  ;;  %v3143_v48 = vsel %vm1297_vm15, %v11098_v24, %v3142_v39  ;;  %v3146_v30 = vor.u32 %v3144_v29, %v3142_v39 }
 0x3f8   : > { %3210 = vrot.lane.b32.xlu1 %v3203_v61, %s8171_s12  ;;  %v9730_v59 = vor.u32 %v3222_v4, %v3221_v34  ;;  %v6888_v4 = vsel %vm9763_vm6, 1.0, %v11087_v60  ;;  %v9813_v61 = vpack.c.bf16 %v6874_v50, %v6873_v0  ;;  %v6886_v0 = vsel %vm9794_vm13, 1.0, %v11087_v60 }
 0x3f9   : > { %v9732_v35 = vpack.c.bf16 %v7328_v26, %v7325_v57  ;;  %v7998_v26 = vld [vmem:[%s11034_s4 + $0xd8] sm:$0xff]  }
 0x3fa   : > { %7387 = vmatprep.subr.bf16.mxu0 %v7998_v26 }
 0x3fb   : > { %v7329_v19 = vpop.f32.mrb[72].mxu0  ;;  %v9745_v8 = vmul.bf16 %v9732_v35, %v9707_v27  ;;  %v3148_v41 = vshll.u32 %v9732_v35, 16  ;;  %v3152_v63 = vshrl.u32 %v9732_v35, 16  ;;  %v9751_v1 = vmul.bf16 %v9732_v35, %v9713_v17  ;;  %7388 = vmatpush3.bf16.msra.mxu0 %v7999_v12 }
 0x3fc   : > { %v7330_v33 = vpop.f32.mrb[73].mxu0  ;;  %3171 = vrot.lane.b32.xlu1 %v3143_v48, %s8171_s12  ;;  %7389 = vmatprep.subr.bf16.mxu0 %v8000_v11 }
 0x3fd   : > { %v7331_v62 = vadd.f32 %v7330_v33, %v7329_v19  ;;  %v7332_v42 = vpop.f32.mrb[74].mxu0  ;;  %v3204_v55 = vrot.slane %v9745_v8, 4  ;;  %v3150_v29 = vrot.slane %v3148_v41, 1  ;;  %v3239_v52 = vrot.slane %v9751_v1, 5 }
 0x3fe   : > { %v7333_v16 = vpop.f32.mrb[75].mxu0  ;;  %v3189_v22 = vrot.slane %v9751_v1, 1  ;;  %v3224_v45 = vrot.slane %v3152_v63, 4  ;;  %v3225_v43 = vrot.slane %v3148_v41, 5  ;;  %v772_v1 = vpack.c.bf16 %v6888_v4, %v6887_v49  ;;  %v8002_v4 = vld [vmem:[%s11034_s4 + $0xe8] sm:$0xff]  }
 0x3ff   : > { %v7334_v58 = vadd.f32 %v7333_v16, %v7332_v42  ;;  %v3205_v57 = vsel %vm3200_vm5, %v3202_v14, %v3204_v55  ;;  %v3151_v31 = vsel %vm1297_vm15, %v3146_v30, %v3150_v29  ;;  %v9785_v28 = vsel %vm3237_vm9, %v3238_v36, %v3239_v52 }
 0x400   : > { %3212 = vrot.lane.b32.xlu0 %v3205_v57, %s8171_s12  ;;  %v9790_v39 = vsel %vm1476_vm11, %v3187_v53, %v3189_v22  ;;  %v3226_v34 = vor.u32 %v3225_v43, %v3224_v45  ;;  %v3154_v50 = vor.u32 %v3152_v63, %v3150_v29  ;;  %v8001_v63 = vld [vmem:[%s11034_s4 + $0xa0] sm:$0xff]  }
 0x401   : > { %v3053_v20 = vpack.c.bf16 %v7334_v58, %v7331_v62  ;;  %v3368_v33 = vshrl.u32 %v9790_v39, 16  ;;  %v3371_v42 = vshll.u32 %v9790_v39, 16  ;;  %7390 = vmatpush3.bf16.msra.mxu0 %v8001_v63 }
 0x402   : > { %v9818_v3 = vsel %vm3220_vm0, %v9730_v59, %v3226_v34  ;;  %7391 = vmatprep.subr.bf16.mxu0 %v8002_v4 }
 0x403   : > { %v7335_v2 = vpop.f32.mrb[76].mxu0  ;;  %v3156_v35 = vshll.u32 %v3053_v20, 16  ;;  %v9821_v9 = vmul.bf16 %v3053_v20, %v9606_v38  ;;  %v3160_v48 = vshrl.u32 %v3053_v20, 16  ;;  %v9824_v19 = vmul.bf16 %v3053_v20, %v9616_v54 }
 0x404   : > { %v7336_v41 = vpop.f32.mrb[77].mxu0  ;;  %3173 = vrot.lane.b32.xlu0 %v3151_v31, %s8171_s12  ;;  %v9840_v31 = vpack.c.bf16 %v6886_v0, %v6885_v10  ;;  %v9847_v20 = vmul.bf16 0, %v772_v1  ;;  %v3370_v10 = vrot.slane %v3368_v33, 3 }
 0x405   : > { %v7337_v30 = vadd.f32 %v7336_v41, %v7335_v2  ;;  %v7338_v56 = vpop.f32.mrb[78].mxu0  ;;  %v3158_v21 = vrot.slane %v3156_v35, 1  ;;  %v3206_v15 = vrot.slane %v9821_v9, 4  ;;  %v3241_v13 = vrot.slane %v9824_v19, 5 }
 0x406   : > { %v7339_v62 = vpop.f32.mrb[79].mxu0  ;;  %v3191_v29 = vrot.slane %v9824_v19, 1  ;;  %v3228_v16 = vrot.slane %v3160_v48, 4  ;;  %v3229_v45 = vrot.slane %v3156_v35, 5  ;;  %v3373_v2 = vrot.slane %v3371_v42, 4 }
 0x407   : > { %v7340_v43 = vadd.f32 %v7339_v62, %v7338_v56  ;;  %v3159_v58 = vsel %vm1297_vm15, %v3154_v50, %v3158_v21  ;;  %v3207_v57 = vsel %vm3200_vm5, %v3204_v55, %v3206_v15  ;;  %v9845_v14 = vsel %vm3237_vm9, %v3239_v52, %v3241_v13  ;;  %v9858_v55 = vld [vmem:[%s11034_s4 + $0x100] sm:$0xff]  }
 0x408   : > { %3175 = vrot.lane.b32.xlu0 %v3159_v58, %s8171_s12  ;;  %3214 = vrot.lane.b32.xlu1 %v3207_v57, %s8171_s12  ;;  %v9850_v49 = vsel %vm1476_vm11, %v3189_v22, %v3191_v29  ;;  %v3230_v26 = vor.u32 %v3229_v45, %v3228_v16  ;;  %v8004_v22 = vld [vmem:[%s11034_s4 + $0xa8] sm:$0xff]   ;;  %v3162_v1 = vor.u32 %v3160_v48, %v3158_v21  ;;  %v8006_v48 = vld [vmem:[%s11034_s4 + $0xb0] sm:$0xff]  }
 0x409   : > { %v3054_v12 = vpack.c.bf16 %v7340_v43, %v7337_v30  ;;  %v3375_v11 = vshrl.u32 %v9850_v49, 16  ;;  %v3378_v52 = vshll.u32 %v9850_v49, 16  ;;  %7845 = vmatprep.subr.bf16.mxu1 %v9858_v55  ;;  %v9874_v30 = vrot.slane %v9847_v20, 1  ;;  %7392 = vmatpush3.bf16.msra.mxu0 %v8004_v22 }
 0x40a   : > { %v9867_v35 = vsel %vm3220_vm0, %v3226_v34, %v3230_v26  ;;  %v8005_v34 = vld [vmem:[%s11034_s4 + $0xf0] sm:$0xff]  }
 0x40b   : > { %v9870_v19 = vmul.bf16 %v3054_v12, %v9813_v61  ;;  %v3164_v41 = vshll.u32 %v3054_v12, 16  ;;  %v3168_v50 = vshrl.u32 %v3054_v12, 16  ;;  %v3137_v0 = vmul.bf16 %v3054_v12, %v9840_v31  ;;  %7393 = vmatprep.subr.bf16.mxu0 %v8005_v34 }
 0x40c   : > { %v3377_v56 = vrot.slane %v3375_v11, 3  ;;  %v3380_v33 = vrot.slane %v3378_v52, 4  ;;  %v3374_v12 = vor.u32 %v3373_v2, %v3370_v10 }
 0x40d   : > { %v3166_v63 = vrot.slane %v3164_v41, 1  ;;  %v3208_v62 = vrot.slane %v9870_v19, 4  ;;  %v3243_v42 = vrot.slane %v3137_v0, 5  ;;  %v9877_v16 = vrot.slane %v3137_v0, 1  ;;  %7394 = vmatpush3.bf16.msra.mxu0 %v8006_v48 }
 0x40e   : > { %v3232_v21 = vrot.slane %v3168_v50, 4  ;;  %v3233_v45 = vrot.slane %v3164_v41, 5  ;;  %v3381_v43 = vor.u32 %v3380_v33, %v3377_v56 }
 0x40f   : > { %v3167_v58 = vsel %vm1297_vm15, %v3162_v1, %v3166_v63  ;;  %v3209_v57 = vsel %vm3200_vm5, %v3206_v15, %v3208_v62  ;;  %v3244_v4 = vsel %vm3237_vm9, %v3241_v13, %v3243_v42  ;;  %v9892_v11 = vsel %vm1476_vm11, %v3191_v29, %v9877_v16  ;;  %v8007_v15 = vld [vmem:[%s11034_s4 + $0xf8] sm:$0xff]  }
 0x410   : > { %3177 = vrot.lane.b32.xlu0 %v3167_v58, %s8171_s12  ;;  %3216 = vrot.lane.b32.xlu1 %v3209_v57, %s8171_s12  ;;  %v9894_v52 = vor.u32 %v3233_v45, %v3232_v21  ;;  %v3407_v22 = vshrl.u32 %v9892_v11, 16  ;;  %v3410_v41 = vshll.u32 %v9892_v11, 16  ;;  %v8009_v13 = vld [vmem:[%s11034_s4 + $0xb8] sm:$0xff]   ;;  %v9905_v10 = vsel %vm3314_vm14, %v3374_v12, %v3381_v43 }
 0x411   : > { %v3263_v2 = vsel %vm1476_vm11, %v9877_v16, %v9874_v30  ;;  %7395 = vmatprep.subr.bf16.mxu0 %v8007_v15  ;;  %v3170_v48 = vor.u32 %v3168_v50, %v3166_v63  ;;  %v9936_v50 = vrot.slane %v9847_v20, 5 }
 0x412   : > { %v9909_v29 = vsel %vm3220_vm0, %v3230_v26, %v9894_v52  ;;  %v3409_v0 = vrot.slane %v3407_v22, 3  ;;  %v3412_v1 = vrot.slane %v3410_v41, 4  ;;  %v3440_v56 = vshrl.u32 %v3263_v2, 16  ;;  %7396 = vmatpush3.bf16.msra.mxu0 %v8009_v13 }
 0x413   : > { %v3443_v33 = vshll.u32 %v3263_v2, 16  ;;  %v3246_v63 = vsel %vm3237_vm9, %v3243_v42, %v9936_v50 }
 0x414   : > { %3249 = vrot.lane.b32.xlu0 %v9785_v28, %s8171_s12  ;;  %3247 = vrot.lane.b32.xlu1 %v3238_v36, %s8171_s12  ;;  %v3413_v34 = vor.u32 %v3412_v1, %v3409_v0  ;;  %v3442_v26 = vrot.slane %v3440_v56, 3  ;;  %v3257_v36 = vsel %vm1297_vm15, %v3170_v48, %v11098_v24 }
 0x415   : > { %v3445_v21 = vrot.slane %v3443_v33, 4 }
 0x416   : > { %v9920_v45 = vsel %vm3314_vm14, %v3381_v43, %v3413_v34 }
 0x417   : > { %v9924_v58 = vor.u32 %v3445_v21, %v3442_v26 }
 0x418   : > { %3179 = vrot.lane.b32.xlu0 %v3170_v48, %s8171_s12  ;;  %3218 = vrot.lane.b32.xlu1 %v3208_v62, %s8171_s12  ;;  %v3133_v62 = vmul.bf16 0, %v767_v18 }
 0x419   : > { %v9928_v28 = vsel %vm3314_vm14, %v3413_v34, %v9924_v58 }
 0x41a   : > { %v9947_v43 = vrot.slane %v3133_v62, 1 }
 0x41c   : > { %3258 = vrot.lane.b32.xlu0 %v3257_v36, %s8171_s12  ;;  %3251 = vrot.lane.b32.xlu1 %v9845_v14, %s8171_s12  ;;  %v3188_v20 = vsel %vm1476_vm11, %v9947_v43, %v3187_v53 }
 0x420   : > { %3260 = vrot.lane.b32.xlu0 %v11098_v24, %s8171_s12  ;;  %3253 = vrot.lane.b32.xlu1 %v3244_v4, %s8171_s12 }
 0x424   : > { %3255 = vrot.lane.b32.xlu1 %v3246_v63, %s8171_s12  ;;  %s7152_s12 = sshll.u32 %s11123_s25, 6 }
 0x425   : > { %s278_s15 = scalar_lea.vmem %s11037_s7, %s7152_s12 }
 0x46a   : > { %v3211_v14 = vpop.permute.xlu1 %3210 }
 0x46b   : > { %v3281_v57 = vsel %vm1764_vm4, %v3188_v20, %v3211_v14 }
 0x46c   : > { %v3330_v12 = vshrl.u32 %v3281_v57, 16  ;;  %v3333_v22 = vshll.u32 %v3281_v57, 16 }
 0x46e   : > { %v3172_v4 = vpop.permute.xlu1 %3171  ;;  %v3332_v18 = vrot.slane %v3330_v12, 3  ;;  %v3335_v13 = vrot.slane %v3333_v22, 4 }
 0x46f   : > { %v3266_v42 = vsel %vm1764_vm4, %v9659_v46, %v3172_v4 }
 0x470   : > { %v3315_v15 = vshrl.u32 %v3266_v42, 16  ;;  %v3318_v7 = vshll.u32 %v3266_v42, 16  ;;  %v3336_v26 = vor.u32 %v3335_v13, %v3332_v18 }
 0x472   : > { %v3213_v41 = vpop.permute.xlu0 %3212  ;;  %v3317_v56 = vrot.slane %v3315_v15, 3  ;;  %v3320_v33 = vrot.slane %v3318_v7, 4  ;;  %v8008_v7 = vld [vmem:[%s11034_s4 + $0x108] sm:$0xff]  }
 0x473   : > { %v3284_v40 = vsel %vm1764_vm4, %v9790_v39, %v3213_v41 }
 0x474   : > { %v3337_v44 = vshrl.u32 %v3284_v40, 16  ;;  %v3340_v2 = vshll.u32 %v3284_v40, 16  ;;  %v3321_v57 = vor.u32 %v3320_v33, %v3317_v56 }
 0x476   : > { %v3339_v0 = vrot.slane %v3337_v44, 3  ;;  %v3342_v53 = vrot.slane %v3340_v2, 4  ;;  %v3174_v1 = vpop.permute.xlu0 %3173 }
 0x477   : > { %v3269_v34 = vsel %vm1764_vm4, %v9682_v32, %v3174_v1 }
 0x478   : > { %v3343_v48 = vor.u32 %v3342_v53, %v3339_v0  ;;  %v3322_v21 = vshrl.u32 %v3269_v34, 16  ;;  %v3325_v36 = vshll.u32 %v3269_v34, 16  ;;  %v8010_v0 = vld [vmem:[%s11034_s4 + $0x110] sm:$0xff]  }
 0x47a   : > { %v3324_v63 = vrot.slane %v3322_v21, 3  ;;  %v3327_v62 = vrot.slane %v3325_v36, 4  ;;  %v3176_v14 = vpop.permute.xlu0 %3175  ;;  %v3215_v39 = vpop.permute.xlu1 %3214  ;;  %v3344_v20 = vsel %vm3314_vm14, %v3336_v26, %v3343_v48 }
 0x47b   : > { %v3272_v4 = vsel %vm1764_vm4, %v9745_v8, %v3176_v14  ;;  %v3287_v12 = vsel %vm1764_vm4, %v9850_v49, %v3215_v39  ;;  %3763 = vmatprep.mubr.bf16.mxu1 %v3344_v20 }
 0x47c   : > { %v3328_v22 = vor.u32 %v3327_v62, %v3324_v63  ;;  %v3360_v32 = vshrl.u32 %v3272_v4, 16  ;;  %v3363_v42 = vshll.u32 %v3272_v4, 16  ;;  %v3383_v41 = vshrl.u32 %v3287_v12, 16 }
 0x47d   : > { %v3386_v15 = vshll.u32 %v3287_v12, 16 }
 0x47e   : > { %v3362_v40 = vrot.slane %v3360_v32, 3  ;;  %v3365_v18 = vrot.slane %v3363_v42, 4  ;;  %v3385_v13 = vrot.slane %v3383_v41, 3  ;;  %v3329_v44 = vsel %vm3314_vm14, %v3321_v57, %v3328_v22 }
 0x47f   : > { %v3388_v2 = vrot.slane %v3386_v15, 4  ;;  %3764 = vmatmul.mubr.bf16.vlgmr.msra.gmra.mrb[64].mxu1 %v3329_v44  ;;  %v730_v32 = vpack.c.bf16 %v6876_v6, %v6875_v37 }
 0x480   : > { %v9969_v8 = vor.u32 %v3365_v18, %v3362_v40  ;;  %7846 = vmatpush3.bf16.msra.mxu1 %v9858_v55 }
 0x481   : > { %v3389_v49 = vor.u32 %v3388_v2, %v3385_v13  ;;  %7847 = vmatprep.subr.bf16.mxu1 %v8008_v7 }
 0x482   : > { %v3178_v53 = vpop.permute.xlu0 %3177  ;;  %v3217_v1 = vpop.permute.xlu1 %3216  ;;  %v3367_v56 = vsel %vm3314_vm14, %v3328_v22, %v9969_v8 }
 0x483   : > { %v3275_v55 = vsel %vm1764_vm4, %v9821_v9, %v3178_v53  ;;  %v3290_v33 = vsel %vm1764_vm4, %v9892_v11, %v3217_v1  ;;  %v3390_v34 = vsel %vm3314_vm14, %v3343_v48, %v3389_v49  ;;  %3828 = vmatprep.mubr.bf16.mxu0 %v3367_v56 }
 0x484   : > { %v3399_v26 = vshrl.u32 %v3275_v55, 16  ;;  %v3402_v21 = vshll.u32 %v3275_v55, 16  ;;  %v3415_v36 = vshrl.u32 %v3290_v33, 16  ;;  %v3418_v63 = vshll.u32 %v3290_v33, 16  ;;  %3771 = vmatprep.mubr.bf16.mxu1 %v3390_v34  ;;  %7848 = vmatpush3.bf16.msra.mxu1 %v8008_v7 }
 0x485   : > { %7849 = vmatprep.subr.bf16.mxu1 %v8010_v0  ;;  %v10000_v33 = vmul.bf16 0, %v730_v32 }
 0x486   : > { %v3401_v5 = vrot.slane %v3399_v26, 3  ;;  %v3404_v9 = vrot.slane %v3402_v21, 4  ;;  %v3417_v11 = vrot.slane %v3415_v36, 3  ;;  %v3420_v48 = vrot.slane %v3418_v63, 4  ;;  %v3250_v62 = vpop.permute.xlu0 %3249  ;;  %v3248_v14 = vpop.permute.xlu1 %3247 }
 0x487   : > { %v3299_v39 = vsel %vm1764_vm4, %v9818_v3, %v3250_v62  ;;  %v3296_v20 = vsel %vm1764_vm4, %v9730_v59, %v3248_v14  ;;  %3772 = vmatmul.mubr.bf16.gmra.mrb[68].mxu1 %v3367_v56 }
 0x488   : > { %v3421_v57 = vor.u32 %v3420_v48, %v3417_v11  ;;  %v3352_v60 = vshrl.u32 %v3299_v39, 16  ;;  %v3355_v4 = vshll.u32 %v3299_v39, 16  ;;  %7850 = vmatpush3.bf16.msra.mxu1 %v8010_v0  ;;  %v3345_v12 = vshrl.u32 %v3296_v20, 16 }
 0x489   : > { %v3348_v22 = vshll.u32 %v3296_v20, 16  ;;  %7851 = vmatprep.subr.bf16.mxu1 %v8011_v51  ;;  %v3405_v42 = vor.u32 %v3404_v9, %v3401_v5 }
 0x48a   : > { %v3354_v41 = vrot.slane %v3352_v60, 3  ;;  %v3357_v15 = vrot.slane %v3355_v4, 4  ;;  %v3180_v7 = vpop.permute.xlu0 %3179  ;;  %v3219_v40 = vpop.permute.xlu1 %3218  ;;  %v3422_v18 = vsel %vm3314_vm14, %v3389_v49, %v3421_v57  ;;  %v3347_v3 = vrot.slane %v3345_v12, 3 }
 0x48b   : > { %v3350_v13 = vrot.slane %v3348_v22, 4  ;;  %v3278_v59 = vsel %vm1764_vm4, %v9870_v19, %v3180_v7  ;;  %v3293_v44 = vsel %vm1764_vm4, %v9877_v16, %v3219_v40  ;;  %3779 = vmatprep.mubr.bf16.mxu1 %v3422_v18  ;;  %v3406_v63 = vsel %vm3314_vm14, %v9969_v8, %v3405_v42 }
 0x48c   : > { %v3358_v2 = vor.u32 %v3357_v15, %v3354_v41  ;;  %v3448_v0 = vshrl.u32 %v3278_v59, 16  ;;  %v3451_v53 = vshll.u32 %v3278_v59, 16  ;;  %v3456_v1 = vshrl.u32 %v3293_v44, 16  ;;  %7852 = vmatpush3.bf16.msra.mxu1 %v8011_v51 }
 0x48d   : > { %v3351_v56 = vor.u32 %v3350_v13, %v3347_v3  ;;  %v3459_v55 = vshll.u32 %v3293_v44, 16 }
 0x48e   : > { %v3450_v34 = vrot.slane %v3448_v0, 3  ;;  %v3453_v49 = vrot.slane %v3451_v53, 4  ;;  %v3458_v26 = vrot.slane %v3456_v1, 3  ;;  %v3259_v21 = vpop.permute.xlu0 %3258  ;;  %v3252_v36 = vpop.permute.xlu1 %3251 }
 0x48f   : > { %v3461_v37 = vrot.slane %v3459_v55, 4  ;;  %v3310_v16 = vsel %vm1764_vm4, %v9870_v19, %v3259_v21  ;;  %v3302_v6 = vsel %vm1764_vm4, %v9867_v35, %v3252_v36  ;;  %3780 = vmatmul.mubr.bf16.gmra.mrb[72].mxu1 %v3406_v63  ;;  %v3359_v51 = vsel %vm3314_vm14, %v3351_v56, %v3358_v2 }
 0x490   : > { %v3431_v5 = vshrl.u32 %v3310_v16, 16  ;;  %v3434_v9 = vshll.u32 %v3310_v16, 16  ;;  %v3391_v11 = vshrl.u32 %v3302_v6, 16  ;;  %3829 = vmatmul.mubr.bf16.vlgmr.msra.gmra.mrb[80].mxu0 %v3359_v51  ;;  %v3394_v62 = vshll.u32 %v3302_v6, 16 }
 0x491   : > { %v3462_v48 = vor.u32 %v3461_v37, %v3458_v26  ;;  %3836 = vmatprep.mubr.bf16.mxu0 %v3406_v63  ;;  %v3454_v14 = vor.u32 %v3453_v49, %v3450_v34  ;;  %v3484_v21 = vshll.u32 %v9874_v30, 16 }
 0x492   : > { %v3433_v39 = vrot.slane %v3431_v5, 3  ;;  %v3436_v8 = vrot.slane %v3434_v9, 4  ;;  %v3393_v20 = vrot.slane %v3391_v11, 3  ;;  %v3261_v60 = vpop.permute.xlu0 %3260  ;;  %v3254_v4 = vpop.permute.xlu1 %3253  ;;  %v3396_v19 = vrot.slane %v3394_v62, 4  ;;  %v8013_v5 = vld [vmem:[%s11035_s5 + $0x80] sm:$0xff]   ;;  %v8016_v9 = vld [vmem:[%s11035_s5 + $0xc8] sm:$0xff]  }
 0x493   : > { %v3313_v35 = vsel %vm1764_vm4, %v10000_v33, %v3261_v60  ;;  %v3305_v12 = vsel %vm1764_vm4, %v9909_v29, %v3254_v4  ;;  %v3463_v22 = vsel %vm3314_vm14, %v3421_v57, %v3462_v48  ;;  %v3455_v59 = vsel %vm3314_vm14, %v3405_v42, %v3454_v14  ;;  %v8017_v11 = vld [vmem:[%s11035_s5 + $0x88] sm:$0xff]   ;;  %v8020_v14 = vld [vmem:[%s11035_s5 + $0xd0] sm:$0xff]   ;;  %v8026_v4 = vld [vmem:[%s11035_s5 + $0x58] sm:$0xff]  }
 0x494   : > { %v3437_v32 = vor.u32 %v3436_v8, %v3433_v39  ;;  %v3472_v41 = vshrl.u32 %v3313_v35, 16  ;;  %v3475_v15 = vshll.u32 %v3313_v35, 16  ;;  %v3423_v7 = vshrl.u32 %v3305_v12, 16  ;;  %3787 = vmatprep.mubr.bf16.mxu1 %v3463_v22  ;;  %v8018_v48 = vld [vmem:[%s11035_s5 + $0x48] sm:$0xff]   ;;  %v8021_v39 = vld [vmem:[%s11035_s5 + $0x90] sm:$0xff]  }
 0x495   : > { %v3397_v40 = vor.u32 %v3396_v19, %v3393_v20  ;;  %v3426_v18 = vshll.u32 %v3305_v12, 16  ;;  %v3486_v16 = vrot.slane %v3484_v21, 4  ;;  %v8019_v62 = vld [vmem:[%s11035_s5 + $0x8] sm:$0xff]   ;;  %v8022_v8 = vld [vmem:[%s11035_s5 + $0x50] sm:$0xff]   ;;  %v8024_v20 = vld [vmem:[%s11035_s5 + $0xd8] sm:$0xff]  }
 0x496   : > { %v3425_v3 = vrot.slane %v3423_v7, 3  ;;  %v3256_v13 = vpop.permute.xlu1 %3255  ;;  %v3438_v44 = vsel %vm3314_vm14, %v3405_v42, %v3437_v32  ;;  %v3474_v57 = vrot.slane %v3472_v41, 3  ;;  %v3477_v1 = vrot.slane %v3475_v15, 4  ;;  %v8023_v60 = vld [vmem:[%s11035_s5 + $0x10] sm:$0xff]   ;;  %v8025_v19 = vld [vmem:[%s11035_s5 + $0x98] sm:$0xff]   ;;  %v8028_v12 = vld [vmem:[%s11035_s5 + $0xe0] sm:$0xff]  }
 0x497   : > { %v3428_v0 = vrot.slane %v3426_v18, 4  ;;  %v3308_v53 = vsel %vm1764_vm4, %v9894_v52, %v3256_v13  ;;  %3788 = vmatmul.mubr.bf16.gmra.mrb[76].mxu1 %v3455_v59  ;;  %v3398_v29 = vsel %vm3314_vm14, %v3358_v2, %v3397_v40  ;;  %v3481_v42 = vshrl.u32 %v9874_v30, 16  ;;  %v8030_v7 = vld [vmem:[%s11035_s5 + $0x60] sm:$0xff]   ;;  %v8032_v13 = vld [vmem:[%s11035_s5 + $0xe8] sm:$0xff]   ;;  %v8040_v21 = vld [vmem:[%s11035_s5 + $0xf8] sm:$0xff]  }
 0x498   : > { %v3464_v56 = vshrl.u32 %v3308_v53, 16  ;;  %v3467_v55 = vshll.u32 %v3308_v53, 16  ;;  %3837 = vmatmul.mubr.bf16.gmra.mrb[84].mxu0 %v3398_v29  ;;  %7853 = vmatprep.mubr.msk.bf16.mxu1 %vm1764_vm4, %v9905_v10  ;;  %v3478_v36 = vor.u32 %v3477_v1, %v3474_v57  ;;  %v8029_v18 = vld [vmem:[%s11035_s5 + $0xa0] sm:$0xff]   ;;  %v8036_v29 = vld [vmem:[%s11035_s5 + $0xf0] sm:$0xff]   ;;  %v8035_v1 = vld [vmem:[%s11035_s5 + $0x28] sm:$0xff]  }
 0x499   : > { %v3429_v34 = vor.u32 %v3428_v0, %v3425_v3  ;;  %3844 = vmatprep.mubr.bf16.mxu0 %v3438_v44  ;;  %v3483_v37 = vrot.slane %v3481_v42, 3  ;;  %v8031_v59 = vld [vmem:[%s11035_s5 + $0x20] sm:$0xff]   ;;  %v8034_v44 = vld [vmem:[%s11035_s5 + $0x68] sm:$0xff]  }
 0x49a   : > { %v3466_v49 = vrot.slane %v3464_v56, 3  ;;  %v3469_v26 = vrot.slane %v3467_v55, 4  ;;  %v3479_v10 = vsel %vm3314_vm14, %v3437_v32, %v3478_v36  ;;  %v8027_v32 = vld [vmem:[%s11035_s5 + $0x18] sm:$0xff]   ;;  %v8033_v0 = vld [vmem:[%s11035_s5 + $0xa8] sm:$0xff]  }
 0x49b   : > { %v3430_v52 = vsel %vm3314_vm14, %v3397_v40, %v3429_v34  ;;  %v10030_v6 = vor.u32 %v3486_v16, %v3483_v37  ;;  %v8042_v36 = vld [vmem:[%s11035_s5 + $0x78] sm:$0xff]   ;;  %v8044_v37 = vld [vmem:[%s11035_s5 + $0x1c0] sm:$0xff]  }
 0x49c   : > { %v3470_v2 = vor.u32 %v3469_v26, %v3466_v49  ;;  %v8037_v26 = vld [vmem:[%s11035_s5 + $0xb0] sm:$0xff]  }
 0x49d   : > { %v3488_v51 = vsel %vm3314_vm14, %v9924_v58, %v10030_v6  ;;  %v8015_v58 = vld [vmem:[%s11035_s5] sm:$0xff]  }
 0x49e   : > { %v3471_v63 = vsel %vm3314_vm14, %v3429_v34, %v3470_v2  ;;  %v8038_v34 = vld [vmem:[%s11035_s5 + $0x70] sm:$0xff]   ;;  %v8041_v2 = vld [vmem:[%s11035_s5 + $0xb8] sm:$0xff]  }
 0x49f   : > { %7854 = vmatmul.mubr.msk.bf16.vlgmr.msra.gmra.mrb[80].mxu1 %vm1764_vm4, %v9920_v45  ;;  %v8012_v45 = vld [vmem:[%s11035_s5 + $0xc0] sm:$0xff]  }
 0x4a0   : > { %3845 = vmatmul.mubr.bf16.gmra.mrb[88].mxu0 %v3430_v52  ;;  %7857 = vmatprep.mubr.msk.bf16.mxu1 %vm1764_vm4, %v9928_v28  ;;  %v8014_v28 = vld [vmem:[%s11035_s5 + $0x40] sm:$0xff]   ;;  %v8039_v52 = vld [vmem:[%s11035_s5 + $0x30] sm:$0xff]  }
 0x4a1   : > { %3852 = vmatprep.mubr.bf16.mxu0 %v3479_v10  ;;  %7469 = vmatprep.subr.bf16.mxu1 %v8012_v45 }
 0x4a2   : > { %7470 = vmatpush3.bf16.msra.mxu1 %v8013_v5  ;;  %7429 = vmatprep.subr.bf16.mxu0 %v8014_v28 }
 0x4a3   : > { %7430 = vmatpush3.bf16.msra.mxu0 %v8015_v58  ;;  %7471 = vmatprep.subr.bf16.mxu1 %v8016_v9  ;;  %v8046_v58 = vld [vmem:[%s11035_s5 + $0x140] sm:$0xff]  }
 0x4a4   : > { %7431 = vmatprep.subr.bf16.mxu0 %v8018_v48 }
 0x4a6   : > { %7472 = vmatpush3.bf16.msra.mxu1 %v8017_v11 }
 0x4a7   : > { %7858 = vmatmul.mubr.msk.bf16.gmra.mrb[84].mxu1 %vm1764_vm4, %v3488_v51  ;;  %7432 = vmatpush3.bf16.msra.mxu0 %v8019_v62  ;;  %v8043_v51 = vld [vmem:[%s11035_s5 + $0x38] sm:$0xff]  }
 0x4a8   : > { %3853 = vmatmul.mubr.bf16.gmra.mrb[92].mxu0 %v3471_v63  ;;  %7473 = vmatprep.subr.bf16.mxu1 %v8020_v14 }
 0x4a9   : > { %7433 = vmatprep.subr.bf16.mxu0 %v8022_v8 }
 0x4aa   : > { %7474 = vmatpush3.bf16.msra.mxu1 %v8021_v39 }
 0x4ab   : > { %7475 = vmatprep.subr.bf16.mxu1 %v8024_v20  ;;  %7434 = vmatpush3.bf16.msra.mxu0 %v8023_v60 }
 0x4ac   : > { %7435 = vmatprep.subr.bf16.mxu0 %v8026_v4 }
 0x4ae   : > { %7476 = vmatpush3.bf16.msra.mxu1 %v8025_v19 }
 0x4af   : > { %7477 = vmatprep.subr.bf16.mxu1 %v8028_v12  ;;  %7436 = vmatpush3.bf16.msra.mxu0 %v8027_v32 }
 0x4b0   : > { %7437 = vmatprep.subr.bf16.mxu0 %v8030_v7 }
 0x4b2   : > { %7478 = vmatpush3.bf16.msra.mxu1 %v8029_v18 }
 0x4b3   : > { %7479 = vmatprep.subr.bf16.mxu1 %v8032_v13  ;;  %7438 = vmatpush3.bf16.msra.mxu0 %v8031_v59 }
 0x4b4   : > { %7439 = vmatprep.subr.bf16.mxu0 %v8034_v44 }
 0x4b6   : > { %7480 = vmatpush3.bf16.msra.mxu1 %v8033_v0 }
 0x4b7   : > { %7481 = vmatprep.subr.bf16.mxu1 %v8036_v29  ;;  %7440 = vmatpush3.bf16.msra.mxu0 %v8035_v1 }
 0x4b8   : > { %7441 = vmatprep.subr.bf16.mxu0 %v8038_v34 }
 0x4ba   : > { %7482 = vmatpush3.bf16.msra.mxu1 %v8037_v26 }
 0x4bb   : > { %7483 = vmatprep.subr.bf16.mxu1 %v8040_v21  ;;  %7442 = vmatpush3.bf16.msra.mxu0 %v8039_v52 }
 0x4bc   : > { %7443 = vmatprep.subr.bf16.mxu0 %v8042_v36 }
 0x4be   : > { %7484 = vmatpush3.bf16.msra.mxu1 %v8041_v2 }
 0x4bf   : > { %7549 = vmatprep.subr.bf16.mxu1 %v8044_v37  ;;  %7444 = vmatpush3.bf16.msra.mxu0 %v8043_v51 }
 0x4c0   : > { %7509 = vmatprep.subr.bf16.mxu0 %v8046_v58 }
 0x552   : > { %v7357_v35 = vpop.f32.mrb[64].mxu1 }
 0x553   : > { %v7358_v22 = vpop.f32.mrb[65].mxu1 }
 0x554   : > { %v7359_v41 = vadd.f32 %v7358_v22, %v7357_v35  ;;  %v7360_v15 = vpop.f32.mrb[66].mxu1 }
 0x555   : > { %v7361_v40 = vpop.f32.mrb[67].mxu1 }
 0x556   : > { %v7362_v3 = vadd.f32 %v7361_v40, %v7360_v15 }
 0x55a   : > { %v7363_v53 = vpop.f32.mrb[68].mxu1 }
 0x55b   : > { %v7364_v57 = vpop.f32.mrb[69].mxu1 }
 0x55c   : > { %v7365_v56 = vadd.f32 %v7364_v57, %v7363_v53  ;;  %v7366_v55 = vpop.f32.mrb[70].mxu1 }
 0x55d   : > { %v7367_v49 = vpop.f32.mrb[71].mxu1 }
 0x55e   : > { %v7368_v42 = vadd.f32 %v7367_v49, %v7366_v55 }
 0x562   : > { %v7369_v63 = vpop.f32.mrb[72].mxu1 }
 0x563   : > { %v7397_v16 = vpop.f32.mrb[80].mxu0  ;;  %v7370_v10 = vpop.f32.mrb[73].mxu1 }
 0x564   : > { %v7371_v45 = vadd.f32 %v7370_v10, %v7369_v63  ;;  %v7398_v5 = vpop.f32.mrb[81].mxu0  ;;  %v7372_v28 = vpop.f32.mrb[74].mxu1 }
 0x565   : > { %v7399_v9 = vadd.f32 %v7398_v5, %v7397_v16  ;;  %v7400_v11 = vpop.f32.mrb[82].mxu0  ;;  %v7373_v48 = vpop.f32.mrb[75].mxu1 }
 0x566   : > { %v7374_v62 = vadd.f32 %v7373_v48, %v7372_v28  ;;  %v7401_v14 = vpop.f32.mrb[83].mxu0 }
 0x567   : > { %v7402_v39 = vadd.f32 %v7401_v14, %v7400_v11  ;;  %v3831_v8 = vadd.f32 %v7399_v9, %v7359_v41 }
 0x569   : > { %v3834_v20 = vadd.f32 %v7402_v39, %v7362_v3 }
 0x56a   : > { %v7375_v60 = vpop.f32.mrb[76].mxu1 }
 0x56b   : > { %v7403_v4 = vpop.f32.mrb[84].mxu0  ;;  %v7376_v19 = vpop.f32.mrb[77].mxu1 }
 0x56c   : > { %v7377_v35 = vadd.f32 %v7376_v19, %v7375_v60  ;;  %v7404_v12 = vpop.f32.mrb[85].mxu0  ;;  %v7378_v22 = vpop.f32.mrb[78].mxu1 }
 0x56d   : > { %v7405_v32 = vadd.f32 %v7404_v12, %v7403_v4  ;;  %v7406_v15 = vpop.f32.mrb[86].mxu0  ;;  %v7379_v7 = vpop.f32.mrb[79].mxu1 }
 0x56e   : > { %v7380_v40 = vadd.f32 %v7379_v7, %v7378_v22  ;;  %v7407_v18 = vpop.f32.mrb[87].mxu0 }
 0x56f   : > { %v7408_v13 = vadd.f32 %v7407_v18, %v7406_v15  ;;  %v3839_v59 = vadd.f32 %v7405_v32, %v7365_v56 }
 0x571   : > { %v3842_v44 = vadd.f32 %v7408_v13, %v7368_v42 }
 0x572   : > { %v7855_v0 = vpop.f32.mrb[80].mxu1 }
 0x573   : > { %v7409_v53 = vpop.f32.mrb[88].mxu0  ;;  %v3904_v41 = vadd.f32 %v7855_v0, %v3839_v59  ;;  %v3895_v29 = vpop.f32.mrb[81].mxu1 }
 0x574   : > { %v7410_v57 = vpop.f32.mrb[89].mxu0  ;;  %v3896_v3 = vadd.f32 %v3895_v29, %v3831_v8  ;;  %v7856_v1 = vpop.f32.mrb[82].mxu1 }
 0x575   : > { %v7411_v55 = vadd.f32 %v7410_v57, %v7409_v53  ;;  %v7412_v34 = vpop.f32.mrb[90].mxu0  ;;  %v3907_v49 = vadd.f32 %v7856_v1, %v3842_v44  ;;  %v3898_v26 = vpop.f32.mrb[83].mxu1 }
 0x576   : > { %v7413_v21 = vpop.f32.mrb[91].mxu0  ;;  %v3899_v52 = vadd.f32 %v3898_v26, %v3834_v20 }
 0x577   : > { %v7414_v36 = vadd.f32 %v7413_v21, %v7412_v34  ;;  %v3847_v2 = vadd.f32 %v7411_v55, %v7371_v45 }
 0x578   : > { %v3926_v63 = vadd.f32 %v3899_v52, %v3896_v3 }
 0x579   : > { %v3850_v37 = vadd.f32 %v7414_v36, %v7374_v62 }
 0x57a   : > { %v3927_v16 = vadd.f32 %v3926_v63, %v3904_v41  ;;  %v7859_v56 = vpop.f32.mrb[84].mxu1 }
 0x57b   : > { %v7415_v42 = vpop.f32.mrb[92].mxu0  ;;  %v3911_v10 = vpop.f32.mrb[85].mxu1 }
 0x57c   : > { %v7416_v51 = vpop.f32.mrb[93].mxu0  ;;  %v3912_v5 = vadd.f32 %v3911_v10, %v3847_v2  ;;  %v3928_v28 = vadd.f32 %v3927_v16, %v3907_v49  ;;  %v7860_v58 = vpop.f32.mrb[86].mxu1 }
 0x57d   : > { %v7417_v9 = vadd.f32 %v7416_v51, %v7415_v42  ;;  %v7418_v11 = vpop.f32.mrb[94].mxu0  ;;  %v3914_v48 = vpop.f32.mrb[87].mxu1 }
 0x57e   : > { %v3929_v14 = vadd.f32 %v3928_v28, %v3912_v5  ;;  %v7419_v39 = vpop.f32.mrb[95].mxu0  ;;  %v3915_v8 = vadd.f32 %v3914_v48, %v3850_v37 }
 0x57f   : > { %v3855_v60 = vadd.f32 %v7417_v9, %v7377_v35  ;;  %v7420_v20 = vadd.f32 %v7419_v39, %v7418_v11  ;;  %v4242_v39 = vshrl.u32 %v9659_v46, 16 }
 0x580   : > { %v3930_v4 = vadd.f32 %v3929_v14, %v3915_v8 }
 0x581   : > { %v3920_v45 = vadd.f32 %v7859_v56, %v3855_v60  ;;  %v3858_v19 = vadd.f32 %v7420_v20, %v7380_v40  ;;  %v4244_v20 = vrot.slane %v4242_v39, 3 }
 0x583   : > { %v3923_v62 = vadd.f32 %v7860_v58, %v3858_v19  ;;  %v3931_v12 = vadd.f32 %v3930_v4, %v3920_v45 }
 0x585   : > { %v3932_v22 = vadd.f32 %v3931_v12, %v3923_v62 }
 0x587   : > { %v3933_v32 = vrot.slane %v3932_v22, 4 }
 0x589   : > { %v3934_v15 = vadd.f32 %v3933_v32, %v3932_v22 }
 0x58b   : > { %v3935_v7 = vrot.slane %v3934_v15, 2 }
 0x58d   : > { %v3936_v18 = vadd.f32 %v3935_v7, %v3934_v15 }
 0x58f   : > { %v3937_v13 = vrot.slane %v3936_v18, 1 }
 0x591   : > { %v3938_v59 = vadd.f32 %v3937_v13, %v3936_v18 }
 0x593   : > { %v3940_v44 = vmul.f32 0.015625, %v3938_v59 }
 0x595   : > { %v3941_v0 = vsub.f32 %v3896_v3, %v3940_v44  ;;  %v3942_v53 = vsub.f32 %v3899_v52, %v3940_v44  ;;  %v3943_v29 = vsub.f32 %v3904_v41, %v3940_v44  ;;  %v3944_v57 = vsub.f32 %v3907_v49, %v3940_v44 }
 0x596   : > { %v3945_v1 = vsub.f32 %v3912_v5, %v3940_v44  ;;  %v3946_v35 = vsub.f32 %v3915_v8, %v3940_v44  ;;  %v3947_v55 = vsub.f32 %v3920_v45, %v3940_v44  ;;  %v3948_v34 = vsub.f32 %v3923_v62, %v3940_v44 }
 0x597   : > { %v3949_v26 = vmul.f32 %v3941_v0, %v3941_v0  ;;  %v3950_v40 = vmul.f32 %v3942_v53, %v3942_v53  ;;  %v3951_v21 = vmul.f32 %v3943_v29, %v3943_v29  ;;  %v3952_v2 = vmul.f32 %v3944_v57, %v3944_v57 }
 0x598   : > { %v3953_v37 = vmul.f32 %v3945_v1, %v3945_v1  ;;  %v3954_v56 = vmul.f32 %v3946_v35, %v3946_v35  ;;  %v3955_v10 = vmul.f32 %v3947_v55, %v3947_v55  ;;  %v3956_v3 = vmul.f32 %v3948_v34, %v3948_v34 }
 0x599   : > { %v3957_v36 = vadd.f32 %v3950_v40, %v3949_v26  ;;  %v4245_v8 = vshll.u32 %v9659_v46, 16 }
 0x59b   : > { %v3958_v63 = vadd.f32 %v3957_v36, %v3951_v21  ;;  %v4247_v4 = vrot.slane %v4245_v8, 4 }
 0x59d   : > { %v3959_v16 = vadd.f32 %v3958_v63, %v3952_v2 }
 0x59f   : > { %v3960_v42 = vadd.f32 %v3959_v16, %v3953_v37  ;;  %v10154_v16 = vor.u32 %v4247_v4, %v4244_v20 }
 0x5a1   : > { %v3961_v51 = vadd.f32 %v3960_v42, %v3954_v56 }
 0x5a3   : > { %v3962_v52 = vadd.f32 %v3961_v51, %v3955_v10 }
 0x5a5   : > { %v3963_v41 = vadd.f32 %v3962_v52, %v3956_v3 }
 0x5a7   : > { %v3964_v49 = vrot.slane %v3963_v41, 4 }
 0x5a9   : > { %v3965_v5 = vadd.f32 %v3964_v49, %v3963_v41 }
 0x5ab   : > { %v3966_v28 = vrot.slane %v3965_v5, 2 }
 0x5ad   : > { %v3967_v58 = vadd.f32 %v3966_v28, %v3965_v5 }
 0x5af   : > { %v3968_v9 = vrot.slane %v3967_v58, 1 }
 0x5b1   : > { %v3969_v11 = vadd.f32 %v3968_v9, %v3967_v58 }
 0x5b3   : > { %v3970_v48 = vmul.f32 0.015625, %v3969_v11 }
 0x5b5   : > { %v3971_v14 = vadd.f32 1e-05, %v3970_v48 }
 0x5b7   : > { %8156 = vrsqrt.f32 %v3971_v14 }
 0x5c1   : > { %v8157_v60 = vpop.eup %8156 }
 0x5c2   : > { %v3973_v45 = vmul.f32 %v8157_v60, %v3941_v0  ;;  %v3974_v19 = vmul.f32 %v8157_v60, %v3942_v53  ;;  %v3975_v62 = vmul.f32 %v8157_v60, %v3943_v29  ;;  %v3976_v12 = vmul.f32 %v8157_v60, %v3944_v57 }
 0x5c3   : > { %v3977_v22 = vmul.f32 %v8157_v60, %v3945_v1  ;;  %v3978_v32 = vmul.f32 %v8157_v60, %v3946_v35  ;;  %v3979_v15 = vmul.f32 %v8157_v60, %v3947_v55  ;;  %v3980_v7 = vmul.f32 %v8157_v60, %v3948_v34 }
 0x5c4   : > { %vm3981_vm4 = vcmp.gt.f32.partialorder %v3973_v45, 0.0  ;;  %vm3982_vm3 = vcmp.gt.f32.partialorder %v3974_v19, 0.0  ;;  %vm3983_vm7 = vcmp.gt.f32.partialorder %v3975_v62, 0.0  ;;  %vm3984_vm8 = vcmp.gt.f32.partialorder %v3976_v12, 0.0 }
 0x5c5   : > { %vm3985_vm10 = vcmp.gt.f32.partialorder %v3977_v22, 0.0  ;;  %vm3986_vm6 = vcmp.gt.f32.partialorder %v3978_v32, 0.0  ;;  %vm3987_vm12 = vcmp.gt.f32.partialorder %v3979_v15, 0.0  ;;  %vm3988_vm13 = vcmp.gt.f32.partialorder %v3980_v7, 0.0 }
 0x5c6   : > { %v3989_v46 = vmul.f32 0.2, %v3973_v45  ;;  %v3990_v18 = vmul.f32 0.2, %v3974_v19  ;;  %v3991_v13 = vmul.f32 0.2, %v3975_v62 }
 0x5c7   : > { %v3992_v59 = vmul.f32 0.2, %v3976_v12  ;;  %v3993_v44 = vmul.f32 0.2, %v3977_v22  ;;  %v3994_v0 = vmul.f32 0.2, %v3978_v32 }
 0x5c8   : > { %v3995_v53 = vmul.f32 0.2, %v3979_v15  ;;  %v3996_v29 = vmul.f32 0.2, %v3980_v7  ;;  %v3997_v57 = vsel %vm3981_vm4, %v3973_v45, %v3989_v46  ;;  %v3998_v1 = vsel %vm3982_vm3, %v3974_v19, %v3990_v18 }
 0x5c9   : > { %v3999_v35 = vsel %vm3983_vm7, %v3975_v62, %v3991_v13  ;;  %v4000_v55 = vsel %vm3984_vm8, %v3976_v12, %v3992_v59  ;;  %v4001_v34 = vsel %vm3985_vm10, %v3977_v22, %v3993_v44  ;;  %v4002_v26 = vsel %vm3986_vm6, %v3978_v32, %v3994_v0 }
 0x5ca   : > { %v4003_v40 = vsel %vm3987_vm12, %v3979_v15, %v3995_v53  ;;  %v4004_v21 = vsel %vm3988_vm13, %v3980_v7, %v3996_v29  ;;  %v4005_v36 = vpack.c.bf16 %v3998_v1, %v3997_v57  ;;  %v10148_v2 = vpack.c.bf16 %v4000_v55, %v3999_v35 }
 0x5cb   : > { %v10150_v63 = vpack.c.bf16 %v4002_v26, %v4001_v34  ;;  %v10152_v37 = vpack.c.bf16 %v4004_v21, %v4003_v40 }
 0x5cc   : > { %v10157_v56 = vmul.bf16 %v4005_v36, %v9664_v25  ;;  %v10161_v42 = vmul.bf16 %v10148_v2, %v9707_v27  ;;  %v10164_v10 = vmul.bf16 %v4005_v36, %v9685_v47  ;;  %v10168_v51 = vmul.bf16 %v10148_v2, %v9713_v17 }
 0x5cd   : > { %v10172_v3 = vmul.bf16 %v10150_v63, %v9606_v38  ;;  %v4162_v52 = vshll.u32 %v4005_v36, 16  ;;  %v4166_v41 = vshrl.u32 %v4005_v36, 16  ;;  %v4170_v49 = vshll.u32 %v10148_v2, 16  ;;  %v8045_v36 = vld [vmem:[%s11035_s5 + $0x180] sm:$0xff]  }
 0x5ce   : > { %v4209_v5 = vrot.slane %v10157_v56, 4  ;;  %v4211_v28 = vrot.slane %v10161_v42, 4  ;;  %v4197_v58 = vrot.slane %v10164_v10, 1  ;;  %v4199_v9 = vrot.slane %v10168_v51, 1 }
 0x5cf   : > { %v4164_v11 = vrot.slane %v4162_v52, 1  ;;  %v10179_v48 = vrot.slane %v4170_v49, 1  ;;  %v10181_v14 = vrot.slane %v4166_v41, 4  ;;  %v10183_v39 = vrot.slane %v4162_v52, 5 }
 0x5d0   : > { %v4210_v8 = vsel %vm3200_vm5, %v9677_v23, %v4209_v5  ;;  %v4212_v60 = vsel %vm3200_vm5, %v4209_v5, %v4211_v28  ;;  %v4198_v20 = vsel %vm1476_vm11, %v9947_v43, %v4197_v58  ;;  %v4200_v4 = vsel %vm1476_vm11, %v4197_v58, %v4199_v9 }
 0x5d1   : > { %v4293_v45 = vshrl.u32 %v4210_v8, 16  ;;  %v4296_v19 = vshll.u32 %v4210_v8, 16  ;;  %v4301_v62 = vshrl.u32 %v4212_v60, 16  ;;  %v4304_v12 = vshll.u32 %v4212_v60, 16 }
 0x5d2   : > { %v4276_v22 = vshrl.u32 %v4198_v20, 16  ;;  %v4279_v32 = vshll.u32 %v4198_v20, 16  ;;  %v4284_v15 = vshrl.u32 %v4200_v4, 16  ;;  %v4287_v7 = vshll.u32 %v4200_v4, 16 }
 0x5d3   : > { %v4295_v46 = vrot.slane %v4293_v45, 3  ;;  %v4298_v18 = vrot.slane %v4296_v19, 4  ;;  %v4303_v13 = vrot.slane %v4301_v62, 3  ;;  %v4306_v59 = vrot.slane %v4304_v12, 4 }
 0x5d4   : > { %v4278_v44 = vrot.slane %v4276_v22, 3  ;;  %v4281_v0 = vrot.slane %v4279_v32, 4  ;;  %v4286_v53 = vrot.slane %v4284_v15, 3  ;;  %v4289_v29 = vrot.slane %v4287_v7, 4  ;;  %v8049_v7 = vld [vmem:[%s11035_s5 + $0x188] sm:$0xff]  }
 0x5d5   : > { %v4299_v57 = vor.u32 %v4298_v18, %v4295_v46  ;;  %v4307_v1 = vor.u32 %v4306_v59, %v4303_v13  ;;  %v4165_v35 = vsel %vm1297_vm15, %v11098_v24, %v4164_v11  ;;  %v4168_v55 = vor.u32 %v4166_v41, %v4164_v11  ;;  %v8048_v41 = vld [vmem:[%s11035_s5 + $0x1c8] sm:$0xff]  }
 0x5d6   : > { %v4282_v34 = vor.u32 %v4281_v0, %v4278_v44  ;;  %v10195_v26 = vor.u32 %v4289_v29, %v4286_v53  ;;  %v10197_v40 = vrot.slane %v4170_v49, 5  ;;  %v4259_v21 = vshrl.u32 %v4165_v35, 16 }
 0x5d7   : > { %v4308_v52 = vsel %vm3314_vm14, %v4299_v57, %v4307_v1  ;;  %v4173_v5 = vsel %vm1297_vm15, %v4168_v55, %v10179_v48  ;;  %v4262_v58 = vshll.u32 %v4165_v35, 16  ;;  %v4213_v8 = vrot.slane %v10172_v3, 4 }
 0x5d8   : > { %5099 = vmatprep.mubr.bf16.mxu1 %v4308_v52  ;;  %v4291_v49 = vsel %vm3314_vm14, %v4282_v34, %v10195_v26  ;;  %v4261_v11 = vrot.slane %v4259_v21, 3  ;;  %v4267_v60 = vshrl.u32 %v4173_v5, 16  ;;  %v4270_v20 = vshll.u32 %v4173_v5, 16  ;;  %v8053_v5 = vld [vmem:[%s11035_s5 + $0x190] sm:$0xff]  }
 0x5d9   : > { %5100 = vmatmul.mubr.bf16.vlgmr.msra.gmra.mrb[88].mxu1 %v4291_v49  ;;  %v4264_v4 = vrot.slane %v4262_v58, 4  ;;  %v4214_v45 = vsel %vm3200_vm5, %v4211_v28, %v4213_v8  ;;  %v4250_v19 = vshrl.u32 %v10157_v56, 16  ;;  %v4253_v62 = vshll.u32 %v10157_v56, 16  ;;  %v8052_v28 = vld [vmem:[%s11035_s5 + $0x1d0] sm:$0xff]  }
 0x5da   : > { %v4269_v12 = vrot.slane %v4267_v60, 3  ;;  %v4272_v22 = vrot.slane %v4270_v20, 4  ;;  %v4371_v32 = vshrl.u32 %v4214_v45, 16  ;;  %v4374_v15 = vshll.u32 %v4214_v45, 16  ;;  %7550 = vmatpush3.bf16.msra.mxu1 %v8045_v36  ;;  %v8056_v60 = vld [vmem:[%s11035_s5 + $0x1d8] sm:$0xff]  }
 0x5db   : > { %v4265_v46 = vor.u32 %v4264_v4, %v4261_v11  ;;  %v4252_v18 = vrot.slane %v4250_v19, 3  ;;  %v4255_v13 = vrot.slane %v4253_v62, 4  ;;  %v4174_v59 = vshrl.u32 %v10148_v2, 16  ;;  %7551 = vmatprep.subr.bf16.mxu1 %v8048_v41  ;;  %v8047_v2 = vld [vmem:[%s11035_s5 + $0x100] sm:$0xff]  }
 0x5dc   : > { %v10223_v56 = vor.u32 %v4272_v22, %v4269_v12  ;;  %v4373_v44 = vrot.slane %v4371_v32, 3  ;;  %v4376_v0 = vrot.slane %v4374_v15, 4  ;;  %v4178_v53 = vshll.u32 %v10150_v63, 16 }
 0x5dd   : > { %v4256_v29 = vor.u32 %v4255_v13, %v4252_v18  ;;  %v4176_v57 = vor.u32 %v4174_v59, %v10179_v48  ;;  %v10227_v35 = vrot.slane %v4174_v59, 4  ;;  %v10234_v55 = vmul.bf16 %v10150_v63, %v9616_v54  ;;  %v8050_v48 = vld [vmem:[%s11035_s5 + $0x148] sm:$0xff]   ;;  %v8054_v18 = vld [vmem:[%s11035_s5 + $0x150] sm:$0xff]   ;;  %v8057_v13 = vld [vmem:[%s11035_s5 + $0x198] sm:$0xff]  }
 0x5de   : > { %v4274_v34 = vsel %vm3314_vm14, %v4265_v46, %v10223_v56  ;;  %v10238_v21 = vor.u32 %v4376_v0, %v4373_v44  ;;  %v4180_v36 = vrot.slane %v4178_v53, 1  ;;  %7552 = vmatpush3.bf16.msra.mxu1 %v8049_v7  ;;  %v10247_v52 = vmul.bf16 %v10152_v37, %v9813_v61  ;;  %v8060_v0 = vld [vmem:[%s11035_s5 + $0x1e0] sm:$0xff]  }
 0x5df   : > { %5034 = vmatprep.mubr.bf16.mxu0 %v4274_v34  ;;  %v4257_v58 = vsel %vm3314_vm14, %v10154_v16, %v4256_v29  ;;  %v4201_v41 = vrot.slane %v10234_v55, 1  ;;  %7553 = vmatprep.subr.bf16.mxu1 %v8052_v28  ;;  %v4344_v49 = vshrl.u32 %v10161_v42, 16  ;;  %v4347_v11 = vshll.u32 %v10161_v42, 16  ;;  %v8051_v42 = vld [vmem:[%s11035_s5 + $0x108] sm:$0xff]  }
 0x5e0   : > { %v4378_v20 = vsel %vm3314_vm14, %v4307_v1, %v10238_v21  ;;  %5035 = vmatmul.mubr.bf16.vlgmr.msra.gmra.mrb[96].mxu0 %v4257_v58  ;;  %v4181_v4 = vsel %vm1297_vm15, %v4176_v57, %v4180_v36  ;;  %v4215_v45 = vrot.slane %v10247_v52, 4  ;;  %v4182_v19 = vshrl.u32 %v10150_v63, 16 }
 0x5e1   : > { %5107 = vmatprep.mubr.bf16.mxu1 %v4378_v20  ;;  %v4353_v62 = vshrl.u32 %v4181_v4, 16  ;;  %v4356_v12 = vshll.u32 %v4181_v4, 16  ;;  %7510 = vmatpush3.bf16.msra.mxu0 %v8047_v2  ;;  %v4202_v1 = vsel %vm1476_vm11, %v4199_v9, %v4201_v41  ;;  %v4346_v22 = vrot.slane %v4344_v49, 3  ;;  %v8055_v20 = vld [vmem:[%s11035_s5 + $0x110] sm:$0xff]  }
 0x5e2   : > { %7511 = vmatprep.subr.bf16.mxu0 %v8050_v48  ;;  %v4362_v32 = vshrl.u32 %v4202_v1, 16  ;;  %v4365_v15 = vshll.u32 %v4202_v1, 16  ;;  %v4216_v7 = vsel %vm3200_vm5, %v4213_v8, %v4215_v45  ;;  %7554 = vmatpush3.bf16.msra.mxu1 %v8053_v5  ;;  %v4349_v46 = vrot.slane %v4347_v11, 4 }
 0x5e3   : > { %v4355_v59 = vrot.slane %v4353_v62, 3  ;;  %v4358_v9 = vrot.slane %v4356_v12, 4  ;;  %v4425_v28 = vshrl.u32 %v4216_v7, 16  ;;  %v4428_v44 = vshll.u32 %v4216_v7, 16  ;;  %7555 = vmatprep.subr.bf16.mxu1 %v8056_v60 }
 0x5e4   : > { %v4364_v8 = vrot.slane %v4362_v32, 3  ;;  %v4367_v57 = vrot.slane %v4365_v15, 4  ;;  %v10285_v2 = vor.u32 %v4349_v46, %v4346_v22  ;;  %v4184_v34 = vor.u32 %v4182_v19, %v4180_v36  ;;  %v8061_v22 = vld [vmem:[%s11035_s5 + $0x1a0] sm:$0xff]  }
 0x5e5   : > { %v10289_v48 = vor.u32 %v4358_v9, %v4355_v59  ;;  %7512 = vmatpush3.bf16.msra.mxu0 %v8051_v42  ;;  %v4427_v5 = vrot.slane %v4425_v28, 3  ;;  %v4430_v58 = vrot.slane %v4428_v44, 4  ;;  %v4186_v49 = vshll.u32 %v10152_v37, 16  ;;  %v8058_v42 = vld [vmem:[%s11035_s5 + $0x158] sm:$0xff]  }
 0x5e6   : > { %v10292_v11 = vor.u32 %v4367_v57, %v4364_v8  ;;  %v10296_v60 = vsel %vm3314_vm14, %v4256_v29, %v10285_v2  ;;  %7513 = vmatprep.subr.bf16.mxu0 %v8054_v18  ;;  %7556 = vmatpush3.bf16.msra.mxu1 %v8057_v13  ;;  %v10303_v36 = vmul.bf16 %v10152_v37, %v9840_v31  ;;  %v4497_v4 = vshrl.u32 %v4215_v45, 16  ;;  %v8059_v28 = vld [vmem:[%s11035_s5 + $0x118] sm:$0xff]  }
 0x5e7   : > { %v10308_v62 = vsel %vm3314_vm14, %v10223_v56, %v10289_v48  ;;  %v4431_v12 = vor.u32 %v4430_v58, %v4427_v5  ;;  %v4188_v29 = vrot.slane %v4186_v49, 1  ;;  %7557 = vmatprep.subr.bf16.mxu1 %v8060_v0  ;;  %v4500_v1 = vshll.u32 %v4215_v45, 16  ;;  %v8064_v45 = vld [vmem:[%s11035_s5 + $0x1e8] sm:$0xff]  }
 0x5e8   : > { %5042 = vmatprep.mubr.bf16.mxu0 %v10308_v62  ;;  %v10322_v56 = vsel %vm3314_vm14, %v10195_v26, %v10292_v11  ;;  %v10325_v32 = vrot.slane %v10303_v36, 1  ;;  %v4499_v15 = vrot.slane %v4497_v4, 3  ;;  %v4398_v7 = vshrl.u32 %v10172_v3, 16  ;;  %v8065_v5 = vld [vmem:[%s11035_s5 + $0x1a8] sm:$0xff]  }
 0x5e9   : > { %5108 = vmatmul.mubr.bf16.gmra.mrb[92].mxu1 %v10322_v56  ;;  %v4432_v46 = vsel %vm3314_vm14, %v10238_v21, %v4431_v12  ;;  %5043 = vmatmul.mubr.bf16.gmra.mrb[100].mxu0 %v10296_v60  ;;  %v4189_v26 = vsel %vm1297_vm15, %v4184_v34, %v4188_v29  ;;  %v4502_v18 = vrot.slane %v4500_v1, 4  ;;  %v4401_v13 = vshll.u32 %v10172_v3, 16  ;;  %v8062_v34 = vld [vmem:[%s11035_s5 + $0x160] sm:$0xff]  }
 0x5ea   : > { %5115 = vmatprep.mubr.bf16.mxu1 %v4432_v46  ;;  %v4407_v59 = vshrl.u32 %v4189_v26, 16  ;;  %v4410_v9 = vshll.u32 %v4189_v26, 16  ;;  %7514 = vmatpush3.bf16.msra.mxu0 %v8055_v20  ;;  %v4204_v21 = vsel %vm1476_vm11, %v4201_v41, %v10325_v32  ;;  %v4400_v44 = vrot.slane %v4398_v7, 3 }
 0x5eb   : > { %7515 = vmatprep.subr.bf16.mxu0 %v8058_v42  ;;  %v4416_v0 = vshrl.u32 %v4204_v21, 16  ;;  %v4419_v8 = vshll.u32 %v4204_v21, 16  ;;  %v4503_v57 = vor.u32 %v4502_v18, %v4499_v15  ;;  %7558 = vmatpush3.bf16.msra.mxu1 %v8061_v22  ;;  %v4403_v3 = vrot.slane %v4401_v13, 4  ;;  %v8068_v42 = vld [vmem:[%s11035_s5 + $0x1f0] sm:$0xff]  }
 0x5ec   : > { %v4409_v58 = vrot.slane %v4407_v59, 3  ;;  %v4412_v20 = vrot.slane %v4410_v9, 4  ;;  %v4190_v4 = vshrl.u32 %v10152_v37, 16  ;;  %7559 = vmatprep.subr.bf16.mxu1 %v8064_v45  ;;  %v4488_v41 = vshrl.u32 %v10325_v32, 16  ;;  %v8077_v37 = vld [vmem:[%s11035_s5 + $0x208] sm:$0xff]  }
 0x5ed   : > { %v4418_v1 = vrot.slane %v4416_v0, 3  ;;  %v4421_v22 = vrot.slane %v4419_v8, 4  ;;  %v4504_v15 = vsel %vm3314_vm14, %v4431_v12, %v4503_v57  ;;  %v4404_v7 = vor.u32 %v4403_v3, %v4400_v44  ;;  %v8063_v12 = vld [vmem:[%s11035_s5 + $0x120] sm:$0xff]   ;;  %v8066_v44 = vld [vmem:[%s11035_s5 + $0x168] sm:$0xff]   ;;  %v8069_v8 = vld [vmem:[%s11035_s5 + $0x1b0] sm:$0xff]  }
 0x5ee   : > { %v10356_v46 = vor.u32 %v4412_v20, %v4409_v58  ;;  %7516 = vmatpush3.bf16.msra.mxu0 %v8059_v28  ;;  %v10360_v26 = vor.u32 %v4190_v4, %v4188_v29  ;;  %v4490_v18 = vrot.slane %v4488_v41, 3  ;;  %v4491_v45 = vshll.u32 %v10325_v32, 16 }
 0x5ef   : > { %v10363_v13 = vor.u32 %v4421_v22, %v4418_v1  ;;  %v10367_v59 = vsel %vm3314_vm14, %v10285_v2, %v4404_v7  ;;  %7517 = vmatprep.subr.bf16.mxu0 %v8062_v34  ;;  %7560 = vmatpush3.bf16.msra.mxu1 %v8065_v5  ;;  %v4452_v9 = vshrl.u32 %v10247_v52, 16  ;;  %v4455_v29 = vshll.u32 %v10247_v52, 16  ;;  %v8072_v34 = vld [vmem:[%s11035_s5 + $0x1f8] sm:$0xff]  }
 0x5f0   : > { %v10377_v28 = vsel %vm3314_vm14, %v10289_v48, %v10356_v46  ;;  %v4479_v21 = vshrl.u32 %v10360_v26, 16  ;;  %v4482_v2 = vshll.u32 %v10360_v26, 16  ;;  %v4493_v0 = vrot.slane %v4491_v45, 4  ;;  %7561 = vmatprep.subr.bf16.mxu1 %v8068_v42 }
 0x5f1   : > { %5050 = vmatprep.mubr.bf16.mxu0 %v10377_v28  ;;  %v10391_v52 = vsel %vm3314_vm14, %v10292_v11, %v10363_v13  ;;  %v4454_v48 = vrot.slane %v4452_v9, 3  ;;  %v4457_v57 = vrot.slane %v4455_v29, 4  ;;  %v4232_v3 = vrot.slane %v10164_v10, 5  ;;  %v8067_v11 = vld [vmem:[%s11035_s5 + $0x128] sm:$0xff]  }
 0x5f2   : > { %5116 = vmatmul.mubr.bf16.gmra.mrb[96].mxu1 %v10391_v52  ;;  %5051 = vmatmul.mubr.bf16.gmra.mrb[104].mxu0 %v10367_v59  ;;  %v4481_v5 = vrot.slane %v4479_v21, 3  ;;  %v4484_v58 = vrot.slane %v4482_v2, 4  ;;  %v4494_v20 = vor.u32 %v4493_v0, %v4490_v18  ;;  %v4233_v41 = vrot.slane %v10168_v51, 5  ;;  %v8070_v51 = vld [vmem:[%s11035_s5 + $0x170] sm:$0xff]  }
 0x5f3   : > { %5123 = vmatprep.mubr.bf16.mxu1 %v4504_v15  ;;  %7518 = vmatpush3.bf16.msra.mxu0 %v8063_v12  ;;  %v10403_v10 = vor.u32 %v4457_v57, %v4454_v48  ;;  %v4327_v42 = vshrl.u32 %v4232_v3, 16  ;;  %v4330_v1 = vshll.u32 %v4232_v3, 16  ;;  %v4219_v22 = vor.u32 %v10183_v39, %v10181_v14  ;;  %v8073_v12 = vld [vmem:[%s11035_s5 + $0x1b8] sm:$0xff]  }
 0x5f4   : > { %v4485_v45 = vor.u32 %v4484_v58, %v4481_v5  ;;  %7519 = vmatprep.subr.bf16.mxu0 %v8066_v44  ;;  %v4495_v18 = vsel %vm3314_vm14, %v10363_v13, %v4494_v20  ;;  %7562 = vmatpush3.bf16.msra.mxu1 %v8069_v8  ;;  %v4234_v15 = vsel %vm3237_vm9, %v4232_v3, %v4233_v41  ;;  %v4235_v9 = vrot.slane %v10234_v55, 5  ;;  %v8071_v55 = vld [vmem:[%s11035_s5 + $0x130] sm:$0xff]   ;;  %v8074_v5 = vld [vmem:[%s11035_s5 + $0x178] sm:$0xff]  }
 0x5f5   : > { %v10419_v14 = vsel %vm3314_vm14, %v4404_v7, %v10403_v10  ;;  %v4329_v39 = vrot.slane %v4327_v42, 3  ;;  %v4332_v29 = vrot.slane %v4330_v1, 4  ;;  %v4335_v21 = vshrl.u32 %v4234_v15, 16  ;;  %7563 = vmatprep.subr.bf16.mxu1 %v8072_v34 }
 0x5f6   : > { %v4486_v2 = vsel %vm3314_vm14, %v10356_v46, %v4485_v45  ;;  %v4338_v44 = vshll.u32 %v4234_v15, 16  ;;  %v4222_v0 = vor.u32 %v10197_v40, %v10227_v35  ;;  %v4310_v8 = vshrl.u32 %v4219_v22, 16 }
 0x5f7   : > { %5058 = vmatprep.mubr.bf16.mxu0 %v4486_v2  ;;  %7520 = vmatpush3.bf16.msra.mxu0 %v8067_v11  ;;  %v4333_v7 = vor.u32 %v4332_v29, %v4329_v39  ;;  %v4337_v48 = vrot.slane %v4335_v21, 3  ;;  %v4313_v57 = vshll.u32 %v4219_v22, 16  ;;  %v4236_v3 = vsel %vm3237_vm9, %v4233_v41, %v4235_v9 }
 0x5f8   : > { %7521 = vmatprep.subr.bf16.mxu0 %v8070_v51  ;;  %v4340_v34 = vrot.slane %v4338_v44, 4  ;;  %7564 = vmatpush3.bf16.msra.mxu1 %v8073_v12  ;;  %v4223_v40 = vsel %vm3220_vm0, %v4219_v22, %v4222_v0  ;;  %v4312_v35 = vrot.slane %v4310_v8, 3  ;;  %v4389_v58 = vshrl.u32 %v4236_v3, 16  ;;  %v8075_v22 = vld [vmem:[%s11035_s5 + $0x138] sm:$0xff]  }
 0x5f9   : > { %v4315_v20 = vrot.slane %v4313_v57, 4  ;;  %v4318_v11 = vshrl.u32 %v4223_v40, 16  ;;  %v4321_v42 = vshll.u32 %v4223_v40, 16  ;;  %v4392_v1 = vshll.u32 %v4236_v3, 16 }
 0x5fa   : > { %5124 = vmatmul.mubr.bf16.gmra.mrb[100].mxu1 %v4495_v18  ;;  %5059 = vmatmul.mubr.bf16.gmra.mrb[108].mxu0 %v10419_v14  ;;  %v4341_v45 = vor.u32 %v4340_v34, %v4337_v48  ;;  %v4391_v41 = vrot.slane %v4389_v58, 3  ;;  %v4240_v51 = vsel %vm1297_vm15, %v10360_v26, %v11098_v24  ;;  %v4224_v15 = vrot.slane %v4182_v19, 4  ;;  %v8076_v26 = vld [vmem:[%s11035_s5 + $0x200] sm:$0xff]  }
 0x5fb   : > { %5229 = vmatprep.mubr.bf16.mxu1 %v10308_v62  ;;  %7522 = vmatpush3.bf16.msra.mxu0 %v8071_v55  ;;  %v4316_v12 = vor.u32 %v4315_v20, %v4312_v35  ;;  %v4320_v18 = vrot.slane %v4318_v11, 3  ;;  %v4323_v39 = vrot.slane %v4321_v42, 4  ;;  %v4394_v29 = vrot.slane %v4392_v1, 4 }
 0x5fc   : > { %v4342_v21 = vsel %vm3314_vm14, %v4333_v7, %v4341_v45  ;;  %7523 = vmatprep.subr.bf16.mxu0 %v8074_v5  ;;  %v4461_v2 = vshrl.u32 %v4240_v51, 16  ;;  %v4464_v19 = vshll.u32 %v4240_v51, 16  ;;  %v4225_v62 = vrot.slane %v4178_v53, 5 }
 0x5fd   : > { %5164 = vmatprep.mubr.bf16.mxu0 %v4342_v21  ;;  %v4324_v44 = vor.u32 %v4323_v39, %v4320_v18  ;;  %v4395_v8 = vor.u32 %v4394_v29, %v4391_v41  ;;  %v4237_v55 = vrot.slane %v10303_v36, 5  ;;  %v4228_v48 = vrot.slane %v4190_v4, 4 }
 0x5fe   : > { %v4463_v57 = vrot.slane %v4461_v2, 3  ;;  %v4466_v7 = vrot.slane %v4464_v19, 4  ;;  %v4226_v3 = vor.u32 %v4225_v62, %v4224_v15  ;;  %v4229_v34 = vrot.slane %v4186_v49, 5 }
 0x5ff   : > { %7524 = vmatpush3.bf16.msra.mxu0 %v8075_v22  ;;  %v4325_v5 = vsel %vm3314_vm14, %v4316_v12, %v4324_v44  ;;  %v4396_v63 = vsel %vm3314_vm14, %v4341_v45, %v4395_v8  ;;  %v4238_v53 = vsel %vm3237_vm9, %v4235_v9, %v4237_v55  ;;  %v4239_v40 = vsel %vm3237_vm9, %v4237_v55, %v9936_v50 }
 0x600   : > { %7861 = vmatprep.subr.bf16.mxu0 %v8076_v26  ;;  %v10459_v36 = vor.u32 %v4466_v7, %v4463_v57  ;;  %v4227_v4 = vsel %vm3220_vm0, %v4222_v0, %v4226_v3  ;;  %v4443_v35 = vshrl.u32 %v4238_v53, 16  ;;  %v4446_v58 = vshll.u32 %v4238_v53, 16 }
 0x601   : > { %v4380_v49 = vshrl.u32 %v4227_v4, 16  ;;  %v4383_v20 = vshll.u32 %v4227_v4, 16  ;;  %v4230_v11 = vor.u32 %v4229_v34, %v4228_v48  ;;  %v4515_v42 = vshrl.u32 %v4239_v40, 16 }
 0x602   : > { %5230 = vmatmul.mubr.bf16.vlgmr.msra.gmra.mrb[104].mxu1 %v10296_v60  ;;  %5165 = vmatmul.mubr.bf16.vlgmr.msra.gmra.mrb[112].mxu0 %v4325_v5  ;;  %v4468_v9 = vsel %vm3314_vm14, %v10356_v46, %v10459_v36  ;;  %v4445_v1 = vrot.slane %v4443_v35, 3  ;;  %v4448_v45 = vrot.slane %v4446_v58, 4  ;;  %v4532_v0 = vshrl.u32 %v11098_v24, 16  ;;  %v8078_v46 = vld [vmem:[%s11035_s5 + $0x210] sm:$0xff]  }
 0x603   : > { %5237 = vmatprep.mubr.bf16.mxu1 %v10377_v28  ;;  %5172 = vmatprep.mubr.bf16.mxu0 %v4396_v63  ;;  %v4382_v41 = vrot.slane %v4380_v49, 3  ;;  %v4385_v51 = vrot.slane %v4383_v20, 4  ;;  %v4231_v15 = vsel %vm3220_vm0, %v4226_v3, %v4230_v11  ;;  %v4517_v22 = vrot.slane %v4515_v42, 3 }
 0x604   : > { %7862 = vmatpush3.bf16.msra.mxu0 %v8076_v26  ;;  %v4449_v12 = vor.u32 %v4448_v45, %v4445_v1  ;;  %v4434_v60 = vshrl.u32 %v4231_v15, 16  ;;  %v4437_v18 = vshll.u32 %v4231_v15, 16  ;;  %v4518_v39 = vshll.u32 %v4239_v40, 16 }
 0x605   : > { %7863 = vmatprep.subr.bf16.mxu0 %v8077_v37  ;;  %v4386_v29 = vor.u32 %v4385_v51, %v4382_v41  ;;  %v4535_v21 = vshll.u32 %v11098_v24, 16  ;;  %v4506_v28 = vshrl.u32 %v4230_v11, 16  ;;  %v4509_v2 = vshll.u32 %v4230_v11, 16  ;;  %v8080_v11 = vld [vmem:[%s11035_s5 + $0x220] sm:$0xff]  }
 0x606   : > { %v4450_v19 = vsel %vm3314_vm14, %v4395_v8, %v4449_v12  ;;  %v4436_v62 = vrot.slane %v4434_v60, 3  ;;  %v4439_v55 = vrot.slane %v4437_v18, 4  ;;  %v4520_v48 = vrot.slane %v4518_v39, 4  ;;  %v8079_v8 = vld [vmem:[%s11035_s5 + $0x218] sm:$0xff]  }
 0x607   : > { %v4387_v26 = vsel %vm3314_vm14, %v4324_v44, %v4386_v29  ;;  %v4508_v57 = vrot.slane %v4506_v28, 3  ;;  %v4511_v7 = vrot.slane %v4509_v2, 4  ;;  %v4241_v3 = vsel %vm1476_vm11, %v10325_v32, %v9874_v30 }
 0x608   : > { %7864 = vmatpush3.bf16.msra.mxu0 %v8077_v37  ;;  %v4440_v34 = vor.u32 %v4439_v55, %v4436_v62  ;;  %v4521_v5 = vor.u32 %v4520_v48, %v4517_v22  ;;  %v4470_v63 = vshrl.u32 %v4241_v3, 16  ;;  %v4473_v53 = vshll.u32 %v4241_v3, 16 }
 0x609   : > { %7865 = vmatprep.subr.bf16.mxu0 %v8078_v46  ;;  %v4534_v40 = vrot.slane %v4532_v0, 3  ;;  %v4537_v4 = vrot.slane %v4535_v21, 4  ;;  %v4512_v35 = vor.u32 %v4511_v7, %v4508_v57  ;;  %v4526_v42 = vshll.u32 %v10000_v33, 16 }
 0x60a   : > { %5238 = vmatmul.mubr.bf16.gmra.mrb[108].mxu1 %v10367_v59  ;;  %5173 = vmatmul.mubr.bf16.gmra.mrb[116].mxu0 %v4387_v26  ;;  %v4441_v44 = vsel %vm3314_vm14, %v4386_v29, %v4440_v34  ;;  %v4522_v32 = vsel %vm3314_vm14, %v4449_v12, %v4521_v5  ;;  %v4472_v58 = vrot.slane %v4470_v63, 3  ;;  %v4475_v37 = vrot.slane %v4473_v53, 4 }
 0x60b   : > { %5245 = vmatprep.mubr.bf16.mxu1 %v4468_v9  ;;  %5180 = vmatprep.mubr.bf16.mxu0 %v4450_v19  ;;  %v4513_v49 = vsel %vm3314_vm14, %v4440_v34, %v4512_v35  ;;  %v4523_v59 = vshrl.u32 %v10000_v33, 16  ;;  %v10493_v1 = vor.u32 %v4537_v4, %v4534_v40  ;;  %v8081_v9 = vld [vmem:[%s11035_s5 + $0x228] sm:$0xff]   ;;  %v4528_v41 = vrot.slane %v4526_v42, 4 }
 0x60c   : > { %7866 = vmatpush3.bf16.msra.mxu0 %v8078_v46  ;;  %v4476_v20 = vor.u32 %v4475_v37, %v4472_v58 }
 0x60d   : > { %7867 = vmatprep.subr.bf16.mxu0 %v8079_v8  ;;  %v4525_v0 = vrot.slane %v4523_v59, 3  ;;  %v4539_v51 = vsel %vm3314_vm14, %v10459_v36, %v10493_v1  ;;  %v8083_v36 = vld [vmem:[%s11035_s5 + $0x238] sm:$0xff]  }
 0x60e   : > { %v4477_v45 = vsel %vm3314_vm14, %v10363_v13, %v4476_v20  ;;  %v8082_v13 = vld [vmem:[%s11035_s5 + $0x230] sm:$0xff]   ;;  %v4540_v15 = vsel %vm3314_vm14, %v4476_v20, %v10030_v6 }
 0x60f   : > { %v10504_v33 = vor.u32 %v4528_v41, %v4525_v0 }
 0x610   : > { %7868 = vmatpush3.bf16.msra.mxu0 %v8079_v8 }
 0x611   : > { %7869 = vmatprep.subr.bf16.mxu0 %v8080_v11 }
 0x612   : > { %5246 = vmatmul.mubr.bf16.gmra.mrb[112].mxu1 %v10419_v14  ;;  %5181 = vmatmul.mubr.bf16.gmra.mrb[120].mxu0 %v4441_v44  ;;  %v4530_v14 = vsel %vm3314_vm14, %v10403_v10, %v10504_v33 }
 0x613   : > { %5253 = vmatprep.mubr.bf16.mxu1 %v4539_v51  ;;  %5188 = vmatprep.mubr.bf16.mxu0 %v4522_v32 }
 0x614   : > { %7870 = vmatpush3.bf16.msra.mxu0 %v8080_v11 }
 0x615   : > { %7871 = vmatprep.subr.bf16.mxu0 %v8081_v9 }
 0x618   : > { %7872 = vmatpush3.bf16.msra.mxu0 %v8081_v9 }
 0x619   : > { %7873 = vmatprep.subr.bf16.mxu0 %v8082_v13 }
 0x61a   : > { %5254 = vmatmul.mubr.bf16.gmra.mrb[116].mxu1 %v4530_v14  ;;  %5189 = vmatmul.mubr.bf16.gmra.mrb[124].mxu0 %v4513_v49 }
 0x61b   : > { %7877 = vmatprep.mubr.bf16.mxu0 %v10322_v56 }
 0x61c   : > { %7874 = vmatpush3.bf16.msra.mxu0 %v8082_v13 }
 0x61d   : > { %7875 = vmatprep.subr.bf16.mxu0 %v8083_v36 }
 0x620   : > { %7876 = vmatpush3.bf16.msra.mxu0 %v8083_v36 }
 0x623   : > { %7878 = vmatmul.mubr.bf16.vlgmr.msra.gmra.mrb[128].mxu0 %v10391_v52 }
 0x624   : > { %7881 = vmatprep.mubr.bf16.mxu0 %v4477_v45 }
 0x62b   : > { %7882 = vmatmul.mubr.bf16.gmra.mrb[132].mxu0 %v4540_v15 }
 0x6ac   : > { %v7485_v10 = vpop.f32.mrb[88].mxu1 }
 0x6ad   : > { %v7486_v22 = vpop.f32.mrb[89].mxu1 }
 0x6ae   : > { %v7487_v12 = vadd.f32 %v7486_v22, %v7485_v10  ;;  %v7488_v60 = vpop.f32.mrb[90].mxu1 }
 0x6af   : > { %v7489_v18 = vpop.f32.mrb[91].mxu1 }
 0x6b0   : > { %v7490_v39 = vadd.f32 %v7489_v18, %v7488_v60 }
 0x6b3   : > { %v7445_v29 = vpop.f32.mrb[96].mxu0 }
 0x6b4   : > { %v7446_v46 = vpop.f32.mrb[97].mxu0 }
 0x6b5   : > { %v7447_v21 = vadd.f32 %v7446_v46, %v7445_v29  ;;  %v7448_v56 = vpop.f32.mrb[98].mxu0  ;;  %v8085_v29 = vld [vmem:[%s11036_s6 + $0x80] sm:$0xff]  }
 0x6b6   : > { %v7449_v28 = vpop.f32.mrb[99].mxu0  ;;  %v8086_v46 = vld [vmem:[%s11036_s6 + $0x40] sm:$0xff]  }
 0x6b7   : > { %v10519_v2 = vadd.f32 %v7487_v12, %v7447_v21  ;;  %v7450_v19 = vadd.f32 %v7449_v28, %v7448_v56  ;;  %7601 = vmatprep.subr.bf16.mxu1 %v8086_v46 }
 0x6b9   : > { %v10521_v52 = vadd.f32 %v7490_v39, %v7450_v19  ;;  %v8084_v39 = vld [vmem:[%s11036_s6 + $0xc0] sm:$0xff]  }
 0x6ba   : > { %v8087_v19 = vld [vmem:[%s11036_s6] sm:$0xff]   ;;  %7641 = vmatprep.subr.bf16.mxu0 %v8084_v39 }
 0x6bb   : > { %7642 = vmatpush3.bf16.msra.mxu0 %v8085_v29  ;;  %7602 = vmatpush3.bf16.msra.mxu1 %v8087_v19 }
 0x6bc   : > { %v7491_v62 = vpop.f32.mrb[92].mxu1  ;;  %v7451_v55 = vpop.f32.mrb[100].mxu0 }
 0x6bd   : > { %v7492_v48 = vpop.f32.mrb[93].mxu1  ;;  %v7452_v26 = vpop.f32.mrb[101].mxu0 }
 0x6be   : > { %v7493_v57 = vadd.f32 %v7492_v48, %v7491_v62  ;;  %v7494_v7 = vpop.f32.mrb[94].mxu1  ;;  %v7453_v3 = vadd.f32 %v7452_v26, %v7451_v55  ;;  %v7454_v34 = vpop.f32.mrb[102].mxu0  ;;  %v8088_v62 = vld [vmem:[%s11036_s6 + $0xc8] sm:$0xff]  }
 0x6bf   : > { %v7495_v5 = vpop.f32.mrb[95].mxu1  ;;  %v7455_v63 = vpop.f32.mrb[103].mxu0  ;;  %v8090_v55 = vld [vmem:[%s11036_s6 + $0x48] sm:$0xff]   ;;  %7643 = vmatprep.subr.bf16.mxu0 %v8088_v62 }
 0x6c0   : > { %v10523_v53 = vadd.f32 %v7493_v57, %v7453_v3  ;;  %v7496_v8 = vadd.f32 %v7495_v5, %v7494_v7  ;;  %v7456_v40 = vadd.f32 %v7455_v63, %v7454_v34  ;;  %v8089_v26 = vld [vmem:[%s11036_s6 + $0x88] sm:$0xff]   ;;  %7603 = vmatprep.subr.bf16.mxu1 %v8090_v55  ;;  %v8092_v7 = vld [vmem:[%s11036_s6 + $0xd0] sm:$0xff]  }
 0x6c1   : > { %v8091_v57 = vld [vmem:[%s11036_s6 + $0x8] sm:$0xff]   ;;  %v8094_v3 = vld [vmem:[%s11036_s6 + $0x50] sm:$0xff]   ;;  %7644 = vmatpush3.bf16.msra.mxu0 %v8089_v26 }
 0x6c2   : > { %v10525_v4 = vadd.f32 %v7496_v8, %v7456_v40  ;;  %7604 = vmatpush3.bf16.msra.mxu1 %v8091_v57  ;;  %7645 = vmatprep.subr.bf16.mxu0 %v8092_v7  ;;  %v8104_v55 = vld [vmem:[%s11036_s6 + $0xe8] sm:$0xff]  }
 0x6c3   : > { %7605 = vmatprep.subr.bf16.mxu1 %v8094_v3  ;;  %v8106_v26 = vld [vmem:[%s11036_s6 + $0x68] sm:$0xff]  }
 0x6c5   : > { %v7497_v35 = vpop.f32.mrb[96].mxu1  ;;  %v7457_v44 = vpop.f32.mrb[104].mxu0 }
 0x6c6   : > { %v7498_v32 = vpop.f32.mrb[97].mxu1  ;;  %v7458_v58 = vpop.f32.mrb[105].mxu0 }
 0x6c7   : > { %v7499_v37 = vadd.f32 %v7498_v32, %v7497_v35  ;;  %v7500_v49 = vpop.f32.mrb[98].mxu1  ;;  %v7459_v20 = vadd.f32 %v7458_v58, %v7457_v44  ;;  %v7460_v11 = vpop.f32.mrb[106].mxu0  ;;  %v8093_v58 = vld [vmem:[%s11036_s6 + $0x90] sm:$0xff]  }
 0x6c8   : > { %v7501_v59 = vpop.f32.mrb[99].mxu1  ;;  %v7461_v42 = vpop.f32.mrb[107].mxu0  ;;  %7646 = vmatpush3.bf16.msra.mxu0 %v8093_v58 }
 0x6c9   : > { %v10527_v45 = vadd.f32 %v7499_v37, %v7459_v20  ;;  %v7502_v9 = vadd.f32 %v7501_v59, %v7500_v49  ;;  %v7462_v0 = vadd.f32 %v7461_v42, %v7460_v11  ;;  %v8095_v37 = vld [vmem:[%s11036_s6 + $0x10] sm:$0xff]   ;;  %v8096_v11 = vld [vmem:[%s11036_s6 + $0xd8] sm:$0xff]  }
 0x6ca   : > { %v8098_v59 = vld [vmem:[%s11036_s6 + $0x58] sm:$0xff]   ;;  %7606 = vmatpush3.bf16.msra.mxu1 %v8095_v37  ;;  %7647 = vmatprep.subr.bf16.mxu0 %v8096_v11 }
 0x6cb   : > { %v10529_v41 = vadd.f32 %v7502_v9, %v7462_v0  ;;  %7607 = vmatprep.subr.bf16.mxu1 %v8098_v59  ;;  %v8109_v59 = vld [vmem:[%s11036_s6 + $0xb0] sm:$0xff]  }
 0x6cd   : > { %v7503_v51 = vpop.f32.mrb[100].mxu1  ;;  %v7463_v13 = vpop.f32.mrb[108].mxu0 }
 0x6ce   : > { %v7504_v14 = vpop.f32.mrb[101].mxu1  ;;  %v7464_v36 = vpop.f32.mrb[109].mxu0 }
 0x6cf   : > { %v7505_v15 = vadd.f32 %v7504_v14, %v7503_v51  ;;  %v7506_v10 = vpop.f32.mrb[102].mxu1  ;;  %v7465_v22 = vadd.f32 %v7464_v36, %v7463_v13  ;;  %v7466_v12 = vpop.f32.mrb[110].mxu0  ;;  %v8097_v14 = vld [vmem:[%s11036_s6 + $0x98] sm:$0xff]  }
 0x6d0   : > { %v7507_v60 = vpop.f32.mrb[103].mxu1  ;;  %v7467_v18 = vpop.f32.mrb[111].mxu0  ;;  %v8099_v36 = vld [vmem:[%s11036_s6 + $0x18] sm:$0xff]   ;;  %7648 = vmatpush3.bf16.msra.mxu0 %v8097_v14 }
 0x6d1   : > { %v10540_v21 = vadd.f32 %v7505_v15, %v7465_v22  ;;  %v7508_v56 = vadd.f32 %v7507_v60, %v7506_v10  ;;  %v7468_v28 = vadd.f32 %v7467_v18, %v7466_v12  ;;  %7608 = vmatpush3.bf16.msra.mxu1 %v8099_v36  ;;  %v8114_v14 = vld [vmem:[%s11036_s6 + $0x78] sm:$0xff]  }
 0x6d3   : > { %v10551_v48 = vadd.f32 %v7508_v56, %v7468_v28  ;;  %v8101_v56 = vld [vmem:[%s11036_s6 + $0xa0] sm:$0xff]  }
 0x6d4   : > { %v8103_v28 = vld [vmem:[%s11036_s6 + $0x20] sm:$0xff]  }
 0x6d5   : > { %v7565_v34 = vpop.f32.mrb[104].mxu1  ;;  %v7525_v5 = vpop.f32.mrb[112].mxu0 }
 0x6d6   : > { %v7566_v63 = vpop.f32.mrb[105].mxu1  ;;  %v7526_v8 = vpop.f32.mrb[113].mxu0 }
 0x6d7   : > { %v7567_v40 = vadd.f32 %v7566_v63, %v7565_v34  ;;  %v7568_v35 = vpop.f32.mrb[106].mxu1  ;;  %v7527_v44 = vadd.f32 %v7526_v8, %v7525_v5  ;;  %v7528_v32 = vpop.f32.mrb[114].mxu0  ;;  %v8105_v63 = vld [vmem:[%s11036_s6 + $0xa8] sm:$0xff]  }
 0x6d8   : > { %v7569_v49 = vpop.f32.mrb[107].mxu1  ;;  %v7529_v20 = vpop.f32.mrb[115].mxu0  ;;  %v8107_v8 = vld [vmem:[%s11036_s6 + $0x28] sm:$0xff]  }
 0x6d9   : > { %v5167_v42 = vadd.f32 %v7527_v44, %v10519_v2  ;;  %v7570_v9 = vadd.f32 %v7569_v49, %v7568_v35  ;;  %v7530_v0 = vadd.f32 %v7529_v20, %v7528_v32  ;;  %v8100_v2 = vld [vmem:[%s11036_s6 + $0xe0] sm:$0xff]  }
 0x6da   : > { %7649 = vmatprep.subr.bf16.mxu0 %v8100_v2 }
 0x6db   : > { %v5170_v51 = vadd.f32 %v7530_v0, %v10521_v52  ;;  %v10579_v13 = vadd.f32 %v7567_v40, %v5167_v42  ;;  %v8102_v52 = vld [vmem:[%s11036_s6 + $0x60] sm:$0xff]   ;;  %7650 = vmatpush3.bf16.msra.mxu0 %v8101_v56  ;;  %v8111_v42 = vld [vmem:[%s11036_s6 + $0x30] sm:$0xff]  }
 0x6dc   : > { %7609 = vmatprep.subr.bf16.mxu1 %v8102_v52  ;;  %7651 = vmatprep.subr.bf16.mxu0 %v8104_v55 }
 0x6dd   : > { %v7571_v15 = vpop.f32.mrb[108].mxu1  ;;  %v7531_v10 = vpop.f32.mrb[116].mxu0  ;;  %v10593_v22 = vadd.f32 %v7570_v9, %v5170_v51  ;;  %7610 = vmatpush3.bf16.msra.mxu1 %v8103_v28  ;;  %v8112_v51 = vld [vmem:[%s11036_s6 + $0xf8] sm:$0xff]  }
 0x6de   : > { %v7572_v12 = vpop.f32.mrb[109].mxu1  ;;  %v7532_v60 = vpop.f32.mrb[117].mxu0  ;;  %7611 = vmatprep.subr.bf16.mxu1 %v8106_v26 }
 0x6df   : > { %v7573_v18 = vadd.f32 %v7572_v12, %v7571_v15  ;;  %v7574_v39 = vpop.f32.mrb[110].mxu1  ;;  %v7533_v29 = vadd.f32 %v7532_v60, %v7531_v10  ;;  %v7534_v46 = vpop.f32.mrb[118].mxu0  ;;  %7652 = vmatpush3.bf16.msra.mxu0 %v8105_v63  ;;  %v8113_v12 = vld [vmem:[%s11036_s6 + $0xb8] sm:$0xff]  }
 0x6e0   : > { %v7575_v19 = vpop.f32.mrb[111].mxu1  ;;  %v7535_v62 = vpop.f32.mrb[119].mxu0  ;;  %v8115_v60 = vld [vmem:[%s11036_s6 + $0x38] sm:$0xff]  }
 0x6e1   : > { %v5175_v57 = vadd.f32 %v7533_v29, %v10523_v53  ;;  %v7576_v7 = vadd.f32 %v7575_v19, %v7574_v39  ;;  %v7536_v3 = vadd.f32 %v7535_v62, %v7534_v46  ;;  %v8108_v53 = vld [vmem:[%s11036_s6 + $0xf0] sm:$0xff]   ;;  %7612 = vmatpush3.bf16.msra.mxu1 %v8107_v8 }
 0x6e2   : > { %7653 = vmatprep.subr.bf16.mxu0 %v8108_v53 }
 0x6e3   : > { %v5178_v34 = vadd.f32 %v7536_v3, %v10525_v4  ;;  %v10609_v5 = vadd.f32 %v7573_v18, %v5175_v57  ;;  %v8110_v4 = vld [vmem:[%s11036_s6 + $0x70] sm:$0xff]   ;;  %7654 = vmatpush3.bf16.msra.mxu0 %v8109_v59 }
 0x6e4   : > { %7613 = vmatprep.subr.bf16.mxu1 %v8110_v4  ;;  %7655 = vmatprep.subr.bf16.mxu0 %v8112_v51 }
 0x6e5   : > { %v7577_v40 = vpop.f32.mrb[112].mxu1  ;;  %v7537_v35 = vpop.f32.mrb[120].mxu0  ;;  %v5243_v44 = vadd.f32 %v7576_v7, %v5178_v34  ;;  %7614 = vmatpush3.bf16.msra.mxu1 %v8111_v42 }
 0x6e6   : > { %v7578_v32 = vpop.f32.mrb[113].mxu1  ;;  %v7538_v58 = vpop.f32.mrb[121].mxu0  ;;  %7615 = vmatprep.subr.bf16.mxu1 %v8114_v14 }
 0x6e7   : > { %v7579_v37 = vadd.f32 %v7578_v32, %v7577_v40  ;;  %v7580_v49 = vpop.f32.mrb[114].mxu1  ;;  %v7539_v20 = vadd.f32 %v7538_v58, %v7537_v35  ;;  %v7540_v11 = vpop.f32.mrb[122].mxu0  ;;  %7656 = vmatpush3.bf16.msra.mxu0 %v8113_v12 }
 0x6e8   : > { %v7581_v9 = vpop.f32.mrb[115].mxu1  ;;  %v7541_v0 = vpop.f32.mrb[123].mxu0 }
 0x6e9   : > { %v5183_v36 = vadd.f32 %v7539_v20, %v10527_v45  ;;  %v7582_v2 = vadd.f32 %v7581_v9, %v7580_v49  ;;  %v7542_v52 = vadd.f32 %v7541_v0, %v7540_v11  ;;  %v8116_v45 = vld [vmem:[%s11036_s6 + $0x1c0] sm:$0xff]   ;;  %7616 = vmatpush3.bf16.msra.mxu1 %v8115_v60 }
 0x6ea   : > { %7721 = vmatprep.subr.bf16.mxu0 %v8116_v45 }
 0x6eb   : > { %v5186_v15 = vadd.f32 %v7542_v52, %v10529_v41  ;;  %v5248_v10 = vadd.f32 %v7579_v37, %v5183_v36  ;;  %v8118_v41 = vld [vmem:[%s11036_s6 + $0x140] sm:$0xff]  }
 0x6ec   : > { %7681 = vmatprep.subr.bf16.mxu1 %v8118_v41 }
 0x6ed   : > { %v7583_v18 = vpop.f32.mrb[116].mxu1  ;;  %v7543_v39 = vpop.f32.mrb[124].mxu0  ;;  %v5251_v29 = vadd.f32 %v7582_v2, %v5186_v15 }
 0x6ee   : > { %v7584_v46 = vpop.f32.mrb[117].mxu1  ;;  %v7544_v56 = vpop.f32.mrb[125].mxu0 }
 0x6ef   : > { %v7585_v28 = vadd.f32 %v7584_v46, %v7583_v18  ;;  %v7586_v19 = vpop.f32.mrb[118].mxu1  ;;  %v7545_v62 = vadd.f32 %v7544_v56, %v7543_v39  ;;  %v7546_v55 = vpop.f32.mrb[126].mxu0 }
 0x6f0   : > { %v7587_v26 = vpop.f32.mrb[119].mxu1  ;;  %v7547_v57 = vpop.f32.mrb[127].mxu0 }
 0x6f1   : > { %v5191_v7 = vadd.f32 %v7545_v62, %v10540_v21  ;;  %v7588_v3 = vadd.f32 %v7587_v26, %v7586_v19  ;;  %v7548_v34 = vadd.f32 %v7547_v57, %v7546_v55 }
 0x6f3   : > { %v5194_v63 = vadd.f32 %v7548_v34, %v10551_v48  ;;  %v5256_v8 = vadd.f32 %v7585_v28, %v5191_v7 }
 0x6f5   : > { %v5259_v53 = vadd.f32 %v7588_v3, %v5194_v63 }
 0x6f6   : > { %v7879_v4 = vpop.f32.mrb[128].mxu0 }
 0x6f7   : > { %v5305_v40 = vadd.f32 %v7879_v4, %v10609_v5  ;;  %v5296_v35 = vpop.f32.mrb[129].mxu0 }
 0x6f8   : > { %v5297_v32 = vadd.f32 %v5296_v35, %v10579_v13  ;;  %v7880_v58 = vpop.f32.mrb[130].mxu0 }
 0x6f9   : > { %v5308_v37 = vadd.f32 %v7880_v58, %v5243_v44  ;;  %v5299_v49 = vpop.f32.mrb[131].mxu0 }
 0x6fa   : > { %v5300_v20 = vadd.f32 %v5299_v49, %v10593_v22 }
 0x6fc   : > { %v5327_v11 = vadd.f32 %v5300_v20, %v5297_v32 }
 0x6fe   : > { %v5328_v59 = vadd.f32 %v5327_v11, %v5305_v40  ;;  %v7883_v21 = vpop.f32.mrb[132].mxu0 }
 0x6ff   : > { %v5321_v42 = vadd.f32 %v7883_v21, %v5256_v8  ;;  %v5312_v9 = vpop.f32.mrb[133].mxu0 }
 0x700   : > { %v5313_v0 = vadd.f32 %v5312_v9, %v5248_v10  ;;  %v5329_v48 = vadd.f32 %v5328_v59, %v5308_v37  ;;  %v7884_v51 = vpop.f32.mrb[134].mxu0 }
 0x701   : > { %v5324_v14 = vadd.f32 %v7884_v51, %v5259_v53  ;;  %v5315_v36 = vpop.f32.mrb[135].mxu0 }
 0x702   : > { %v5330_v2 = vadd.f32 %v5329_v48, %v5313_v0  ;;  %v5316_v5 = vadd.f32 %v5315_v36, %v5251_v29 }
 0x704   : > { %v5331_v52 = vadd.f32 %v5330_v2, %v5316_v5 }
 0x706   : > { %v5332_v15 = vadd.f32 %v5331_v52, %v5321_v42 }
 0x708   : > { %v5333_v13 = vadd.f32 %v5332_v15, %v5324_v14 }
 0x70a   : > { %v5334_v12 = vrot.slane %v5333_v13, 4 }
 0x70c   : > { %v5335_v44 = vadd.f32 %v5334_v12, %v5333_v13 }
 0x70e   : > { %v5336_v60 = vrot.slane %v5335_v44, 2 }
 0x710   : > { %v5337_v45 = vadd.f32 %v5336_v60, %v5335_v44 }
 0x712   : > { %v5338_v22 = vrot.slane %v5337_v45, 1 }
 0x714   : > { %v5339_v41 = vadd.f32 %v5338_v22, %v5337_v45 }
 0x716   : > { %v5340_v18 = vmul.f32 0.015625, %v5339_v41 }
 0x718   : > { %v5341_v39 = vsub.f32 %v5297_v32, %v5340_v18  ;;  %v5342_v46 = vsub.f32 %v5300_v20, %v5340_v18  ;;  %v5343_v56 = vsub.f32 %v5305_v40, %v5340_v18  ;;  %v5344_v10 = vsub.f32 %v5308_v37, %v5340_v18 }
 0x719   : > { %v5345_v28 = vsub.f32 %v5313_v0, %v5340_v18  ;;  %v5346_v19 = vsub.f32 %v5316_v5, %v5340_v18  ;;  %v5347_v62 = vsub.f32 %v5321_v42, %v5340_v18  ;;  %v5348_v55 = vsub.f32 %v5324_v14, %v5340_v18 }
 0x71a   : > { %v5349_v26 = vmul.f32 %v5341_v39, %v5341_v39  ;;  %v5350_v29 = vmul.f32 %v5342_v46, %v5342_v46  ;;  %v5351_v57 = vmul.f32 %v5343_v56, %v5343_v56  ;;  %v5352_v3 = vmul.f32 %v5344_v10, %v5344_v10 }
 0x71b   : > { %v5353_v63 = vmul.f32 %v5345_v28, %v5345_v28  ;;  %v5354_v53 = vmul.f32 %v5346_v19, %v5346_v19  ;;  %v5355_v35 = vmul.f32 %v5347_v62, %v5347_v62  ;;  %v5356_v32 = vmul.f32 %v5348_v55, %v5348_v55 }
 0x71c   : > { %v5357_v7 = vadd.f32 %v5350_v29, %v5349_v26 }
 0x71e   : > { %v5358_v34 = vadd.f32 %v5357_v7, %v5351_v57 }
 0x720   : > { %v5359_v8 = vadd.f32 %v5358_v34, %v5352_v3 }
 0x722   : > { %v5360_v4 = vadd.f32 %v5359_v8, %v5353_v63 }
 0x724   : > { %v5361_v58 = vadd.f32 %v5360_v4, %v5354_v53 }
 0x726   : > { %v5362_v49 = vadd.f32 %v5361_v58, %v5355_v35 }
 0x728   : > { %v5363_v40 = vadd.f32 %v5362_v49, %v5356_v32 }
 0x72a   : > { %v5364_v37 = vrot.slane %v5363_v40, 4 }
 0x72c   : > { %v5365_v20 = vadd.f32 %v5364_v37, %v5363_v40 }
 0x72e   : > { %v5366_v11 = vrot.slane %v5365_v20, 2 }
 0x730   : > { %v5367_v59 = vadd.f32 %v5366_v11, %v5365_v20 }
 0x732   : > { %v5368_v21 = vrot.slane %v5367_v59, 1 }
 0x734   : > { %v5369_v42 = vadd.f32 %v5368_v21, %v5367_v59 }
 0x736   : > { %v5370_v9 = vmul.f32 0.015625, %v5369_v42 }
 0x738   : > { %v5371_v0 = vadd.f32 1e-05, %v5370_v9 }
 0x73a   : > { %8158 = vrsqrt.f32 %v5371_v0 }
 0x744   : > { %v8159_v48 = vpop.eup %8158 }
 0x745   : > { %v5373_v51 = vmul.f32 %v8159_v48, %v5341_v39  ;;  %v5374_v14 = vmul.f32 %v8159_v48, %v5342_v46  ;;  %v5375_v36 = vmul.f32 %v8159_v48, %v5343_v56  ;;  %v5376_v2 = vmul.f32 %v8159_v48, %v5344_v10 }
 0x746   : > { %v5377_v5 = vmul.f32 %v8159_v48, %v5345_v28  ;;  %v5378_v52 = vmul.f32 %v8159_v48, %v5346_v19  ;;  %v5379_v15 = vmul.f32 %v8159_v48, %v5347_v62  ;;  %v5380_v13 = vmul.f32 %v8159_v48, %v5348_v55 }
 0x747   : > { %vm5381_vm1 = vcmp.gt.f32.partialorder %v5373_v51, 0.0  ;;  %vm5382_vm2 = vcmp.gt.f32.partialorder %v5374_v14, 0.0  ;;  %vm5383_vm4 = vcmp.gt.f32.partialorder %v5375_v36, 0.0  ;;  %vm5384_vm3 = vcmp.gt.f32.partialorder %v5376_v2, 0.0 }
 0x748   : > { %vm5385_vm7 = vcmp.gt.f32.partialorder %v5377_v5, 0.0  ;;  %vm5386_vm8 = vcmp.gt.f32.partialorder %v5378_v52, 0.0  ;;  %vm5387_vm10 = vcmp.gt.f32.partialorder %v5379_v15, 0.0  ;;  %vm5388_vm6 = vcmp.gt.f32.partialorder %v5380_v13, 0.0 }
 0x749   : > { %v5389_v12 = vmul.f32 0.2, %v5373_v51  ;;  %v5390_v44 = vmul.f32 0.2, %v5374_v14  ;;  %v5391_v60 = vmul.f32 0.2, %v5375_v36 }
 0x74a   : > { %v5392_v45 = vmul.f32 0.2, %v5376_v2  ;;  %v5393_v22 = vmul.f32 0.2, %v5377_v5  ;;  %v5394_v41 = vmul.f32 0.2, %v5378_v52 }
 0x74b   : > { %v5395_v18 = vmul.f32 0.2, %v5379_v15  ;;  %v5396_v39 = vmul.f32 0.2, %v5380_v13  ;;  %v5397_v46 = vsel %vm5381_vm1, %v5373_v51, %v5389_v12  ;;  %v5398_v56 = vsel %vm5382_vm2, %v5374_v14, %v5390_v44 }
 0x74c   : > { %v5399_v10 = vsel %vm5383_vm4, %v5375_v36, %v5391_v60  ;;  %v5400_v28 = vsel %vm5384_vm3, %v5376_v2, %v5392_v45  ;;  %v5401_v19 = vsel %vm5385_vm7, %v5377_v5, %v5393_v22  ;;  %v5402_v62 = vsel %vm5386_vm8, %v5378_v52, %v5394_v41 }
 0x74d   : > { %v5403_v55 = vsel %vm5387_vm10, %v5379_v15, %v5395_v18  ;;  %v5404_v26 = vsel %vm5388_vm6, %v5380_v13, %v5396_v39  ;;  %v5405_v29 = vpack.c.bf16 %v5398_v56, %v5397_v46  ;;  %v10662_v57 = vpack.c.bf16 %v5400_v28, %v5399_v10  ;;  %v8117_v10 = vld [vmem:[%s11036_s6 + $0x180] sm:$0xff]  }
 0x74e   : > { %v10664_v7 = vpack.c.bf16 %v5402_v62, %v5401_v19  ;;  %v10666_v3 = vpack.c.bf16 %v5404_v26, %v5403_v55  ;;  %v8120_v26 = vld [vmem:[%s11036_s6 + $0x1c8] sm:$0xff]  }
 0x74f   : > { %v10669_v34 = vmul.bf16 %v5405_v29, %v9664_v25  ;;  %v10673_v63 = vmul.bf16 %v10662_v57, %v9707_v27  ;;  %v10676_v8 = vmul.bf16 %v5405_v29, %v9685_v47  ;;  %v10680_v53 = vmul.bf16 %v10662_v57, %v9713_v17 }
 0x750   : > { %v10684_v4 = vmul.bf16 %v10664_v7, %v9606_v38  ;;  %v5562_v35 = vshll.u32 %v5405_v29, 16  ;;  %v5566_v58 = vshrl.u32 %v5405_v29, 16  ;;  %v5570_v25 = vshll.u32 %v10662_v57, 16 }
 0x751   : > { %v5609_v32 = vrot.slane %v10669_v34, 4  ;;  %v5611_v27 = vrot.slane %v10673_v63, 4  ;;  %v5597_v49 = vrot.slane %v10676_v8, 1  ;;  %v5599_v47 = vrot.slane %v10680_v53, 1 }
 0x752   : > { %v5564_v40 = vrot.slane %v5562_v35, 1  ;;  %v10691_v37 = vrot.slane %v5570_v25, 1  ;;  %v10693_v17 = vrot.slane %v5566_v58, 4  ;;  %v10695_v20 = vrot.slane %v5562_v35, 5 }
 0x753   : > { %v5610_v38 = vsel %vm3200_vm5, %v9677_v23, %v5609_v32  ;;  %v5612_v11 = vsel %vm3200_vm5, %v5609_v32, %v5611_v27  ;;  %v5598_v59 = vsel %vm1476_vm11, %v9947_v43, %v5597_v49  ;;  %v5600_v21 = vsel %vm1476_vm11, %v5597_v49, %v5599_v47 }
 0x754   : > { %v5686_v42 = vshrl.u32 %v5610_v38, 16  ;;  %v5689_v9 = vshll.u32 %v5610_v38, 16  ;;  %v5694_v0 = vshrl.u32 %v5612_v11, 16  ;;  %v5697_v48 = vshll.u32 %v5612_v11, 16 }
 0x755   : > { %v5669_v51 = vshrl.u32 %v5598_v59, 16  ;;  %v5672_v14 = vshll.u32 %v5598_v59, 16  ;;  %v5677_v36 = vshrl.u32 %v5600_v21, 16  ;;  %v5680_v2 = vshll.u32 %v5600_v21, 16 }
 0x756   : > { %v5688_v5 = vrot.slane %v5686_v42, 3  ;;  %v5691_v52 = vrot.slane %v5689_v9, 4  ;;  %v5696_v23 = vrot.slane %v5694_v0, 3  ;;  %v5699_v15 = vrot.slane %v5697_v48, 4  ;;  %v8121_v9 = vld [vmem:[%s11036_s6 + $0x188] sm:$0xff]  }
 0x757   : > { %v5671_v13 = vrot.slane %v5669_v51, 3  ;;  %v5674_v12 = vrot.slane %v5672_v14, 4  ;;  %v5679_v44 = vrot.slane %v5677_v36, 3  ;;  %v5682_v43 = vrot.slane %v5680_v2, 4 }
 0x758   : > { %v5692_v60 = vor.u32 %v5691_v52, %v5688_v5  ;;  %v5700_v45 = vor.u32 %v5699_v15, %v5696_v23  ;;  %v5565_v22 = vsel %vm1297_vm15, %v11098_v24, %v5564_v40  ;;  %v5568_v41 = vor.u32 %v5566_v58, %v5564_v40 }
 0x759   : > { %v5675_v18 = vor.u32 %v5674_v12, %v5671_v13  ;;  %v10707_v39 = vor.u32 %v5682_v43, %v5679_v44  ;;  %v10709_v46 = vrot.slane %v5570_v25, 5  ;;  %v5652_v56 = vshrl.u32 %v5565_v22, 16 }
 0x75a   : > { %v5701_v28 = vsel %vm3314_vm14, %v5692_v60, %v5700_v45  ;;  %v5573_v19 = vsel %vm1297_vm15, %v5568_v41, %v10691_v37  ;;  %v5655_v62 = vshll.u32 %v5565_v22, 16  ;;  %v5613_v55 = vrot.slane %v10684_v4, 4 }
 0x75b   : > { %6477 = vmatprep.mubr.bf16.mxu0 %v5701_v28  ;;  %v5684_v29 = vsel %vm3314_vm14, %v5675_v18, %v10707_v39  ;;  %v5654_v35 = vrot.slane %v5652_v56, 3  ;;  %v5660_v58 = vshrl.u32 %v5573_v19, 16  ;;  %v5663_v25 = vshll.u32 %v5573_v19, 16 }
 0x75c   : > { %6478 = vmatmul.mubr.bf16.vlgmr.msra.gmra.mrb[136].mxu0 %v5684_v29  ;;  %v5657_v32 = vrot.slane %v5655_v62, 4  ;;  %v5614_v49 = vsel %vm3200_vm5, %v5611_v27, %v5613_v55  ;;  %v5643_v40 = vshrl.u32 %v10669_v34, 16  ;;  %v5646_v38 = vshll.u32 %v10669_v34, 16  ;;  %v8124_v27 = vld [vmem:[%s11036_s6 + $0x1d0] sm:$0xff]  }
 0x75d   : > { %v5662_v11 = vrot.slane %v5660_v58, 3  ;;  %v5665_v59 = vrot.slane %v5663_v25, 4  ;;  %v5764_v21 = vshrl.u32 %v5614_v49, 16  ;;  %v5767_v42 = vshll.u32 %v5614_v49, 16  ;;  %7722 = vmatpush3.bf16.msra.mxu0 %v8117_v10  ;;  %v8126_v49 = vld [vmem:[%s11036_s6 + $0x150] sm:$0xff]  }
 0x75e   : > { %v5658_v0 = vor.u32 %v5657_v32, %v5654_v35  ;;  %v5645_v48 = vrot.slane %v5643_v40, 3  ;;  %v5648_v51 = vrot.slane %v5646_v38, 4  ;;  %v5574_v14 = vshrl.u32 %v10662_v57, 16  ;;  %7723 = vmatprep.subr.bf16.mxu0 %v8120_v26  ;;  %v8119_v57 = vld [vmem:[%s11036_s6 + $0x100] sm:$0xff]   ;;  %v8129_v40 = vld [vmem:[%s11036_s6 + $0x198] sm:$0xff]  }
 0x75f   : > { %v10735_v34 = vor.u32 %v5665_v59, %v5662_v11  ;;  %v5766_v36 = vrot.slane %v5764_v21, 3  ;;  %v5769_v2 = vrot.slane %v5767_v42, 4  ;;  %v5578_v5 = vshll.u32 %v10664_v7, 16  ;;  %v8132_v21 = vld [vmem:[%s11036_s6 + $0x1e0] sm:$0xff]  }
 0x760   : > { %v5649_v52 = vor.u32 %v5648_v51, %v5645_v48  ;;  %v5576_v23 = vor.u32 %v5574_v14, %v10691_v37  ;;  %v10739_v15 = vrot.slane %v5574_v14, 4  ;;  %v10746_v13 = vmul.bf16 %v10664_v7, %v9616_v54  ;;  %v8122_v37 = vld [vmem:[%s11036_s6 + $0x148] sm:$0xff]   ;;  %v8125_v54 = vld [vmem:[%s11036_s6 + $0x190] sm:$0xff]  }
 0x761   : > { %v5667_v12 = vsel %vm3314_vm14, %v5658_v0, %v10735_v34  ;;  %v10750_v44 = vor.u32 %v5769_v2, %v5766_v36  ;;  %v5580_v43 = vrot.slane %v5578_v5, 1  ;;  %7724 = vmatpush3.bf16.msra.mxu0 %v8121_v9  ;;  %v10759_v60 = vmul.bf16 %v10666_v3, %v9813_v61  ;;  %v8128_v61 = vld [vmem:[%s11036_s6 + $0x1d8] sm:$0xff]  }
 0x762   : > { %6412 = vmatprep.mubr.bf16.mxu1 %v5667_v12  ;;  %v5650_v22 = vsel %vm3314_vm14, %v10154_v16, %v5649_v52  ;;  %v5601_v41 = vrot.slane %v10746_v13, 1  ;;  %7725 = vmatprep.subr.bf16.mxu0 %v8124_v27  ;;  %v5737_v18 = vshrl.u32 %v10673_v63, 16  ;;  %v5740_v56 = vshll.u32 %v10673_v63, 16  ;;  %v8123_v63 = vld [vmem:[%s11036_s6 + $0x108] sm:$0xff]  }
 0x763   : > { %v5771_v10 = vsel %vm3314_vm14, %v5700_v45, %v10750_v44  ;;  %6413 = vmatmul.mubr.bf16.vlgmr.msra.gmra.mrb[120].mxu1 %v5650_v22  ;;  %v5581_v28 = vsel %vm1297_vm15, %v5576_v23, %v5580_v43  ;;  %v5615_v19 = vrot.slane %v10759_v60, 4  ;;  %v5582_v16 = vshrl.u32 %v10664_v7, 16  ;;  %v8127_v23 = vld [vmem:[%s11036_s6 + $0x110] sm:$0xff]  }
 0x764   : > { %6485 = vmatprep.mubr.bf16.mxu0 %v5771_v10  ;;  %v5746_v62 = vshrl.u32 %v5581_v28, 16  ;;  %v5749_v26 = vshll.u32 %v5581_v28, 16  ;;  %7682 = vmatpush3.bf16.msra.mxu1 %v8119_v57  ;;  %v5602_v45 = vsel %vm1476_vm11, %v5599_v47, %v5601_v41  ;;  %v5739_v29 = vrot.slane %v5737_v18, 3  ;;  %v8136_v10 = vld [vmem:[%s11036_s6 + $0x1e8] sm:$0xff]  }
 0x765   : > { %7683 = vmatprep.subr.bf16.mxu1 %v8122_v37  ;;  %v5755_v35 = vshrl.u32 %v5602_v45, 16  ;;  %v5758_v58 = vshll.u32 %v5602_v45, 16  ;;  %v5616_v25 = vsel %vm3200_vm5, %v5613_v55, %v5615_v19  ;;  %7726 = vmatpush3.bf16.msra.mxu0 %v8125_v54  ;;  %v5742_v32 = vrot.slane %v5740_v56, 4  ;;  %v8130_v54 = vld [vmem:[%s11036_s6 + $0x158] sm:$0xff]  }
 0x766   : > { %v5748_v38 = vrot.slane %v5746_v62, 3  ;;  %v5751_v47 = vrot.slane %v5749_v26, 4  ;;  %v5818_v11 = vshrl.u32 %v5616_v25, 16  ;;  %v5821_v59 = vshll.u32 %v5616_v25, 16  ;;  %7727 = vmatprep.subr.bf16.mxu0 %v8128_v61  ;;  %v8131_v45 = vld [vmem:[%s11036_s6 + $0x118] sm:$0xff]  }
 0x767   : > { %v5757_v55 = vrot.slane %v5755_v35, 3  ;;  %v5760_v42 = vrot.slane %v5758_v58, 4  ;;  %v10797_v9 = vor.u32 %v5742_v32, %v5739_v29  ;;  %v5584_v0 = vor.u32 %v5582_v16, %v5580_v43  ;;  %v8134_v32 = vld [vmem:[%s11036_s6 + $0x160] sm:$0xff]  }
 0x768   : > { %v10801_v48 = vor.u32 %v5751_v47, %v5748_v38  ;;  %7684 = vmatpush3.bf16.msra.mxu1 %v8123_v63  ;;  %v5820_v51 = vrot.slane %v5818_v11, 3  ;;  %v5823_v14 = vrot.slane %v5821_v59, 4  ;;  %v5586_v27 = vshll.u32 %v10666_v3, 16  ;;  %v8140_v11 = vld [vmem:[%s11036_s6 + $0x1f0] sm:$0xff]  }
 0x769   : > { %v10804_v36 = vor.u32 %v5760_v42, %v5757_v55  ;;  %v10808_v2 = vsel %vm3314_vm14, %v5649_v52, %v10797_v9  ;;  %7685 = vmatprep.subr.bf16.mxu1 %v8126_v49  ;;  %7728 = vmatpush3.bf16.msra.mxu0 %v8129_v40  ;;  %v10815_v57 = vmul.bf16 %v10666_v3, %v9840_v31  ;;  %v5890_v12 = vshrl.u32 %v5615_v19, 16  ;;  %v8133_v31 = vld [vmem:[%s11036_s6 + $0x1a0] sm:$0xff]   ;;  %v8137_v49 = vld [vmem:[%s11036_s6 + $0x1a8] sm:$0xff]  }
 0x76a   : > { %v10820_v43 = vsel %vm3314_vm14, %v10735_v34, %v10801_v48  ;;  %v5824_v37 = vor.u32 %v5823_v14, %v5820_v51  ;;  %v5588_v52 = vrot.slane %v5586_v27, 1  ;;  %7729 = vmatprep.subr.bf16.mxu0 %v8132_v21  ;;  %v5893_v22 = vshll.u32 %v5615_v19, 16 }
 0x76b   : > { %6420 = vmatprep.mubr.bf16.mxu1 %v10820_v43  ;;  %v10834_v34 = vsel %vm3314_vm14, %v10707_v39, %v10804_v36  ;;  %v10837_v18 = vrot.slane %v10815_v57, 1  ;;  %v5892_v56 = vrot.slane %v5890_v12, 3  ;;  %v5791_v61 = vshrl.u32 %v10684_v4, 16 }
 0x76c   : > { %6486 = vmatmul.mubr.bf16.gmra.mrb[140].mxu0 %v10834_v34  ;;  %v5825_v28 = vsel %vm3314_vm14, %v10750_v44, %v5824_v37  ;;  %6421 = vmatmul.mubr.bf16.gmra.mrb[124].mxu1 %v10808_v2  ;;  %v5589_v39 = vsel %vm1297_vm15, %v5584_v0, %v5588_v52  ;;  %v5895_v19 = vrot.slane %v5893_v22, 4  ;;  %v5794_v62 = vshll.u32 %v10684_v4, 16 }
 0x76d   : > { %6493 = vmatprep.mubr.bf16.mxu0 %v5825_v28  ;;  %v5800_v26 = vshrl.u32 %v5589_v39, 16  ;;  %v5803_v63 = vshll.u32 %v5589_v39, 16  ;;  %7686 = vmatpush3.bf16.msra.mxu1 %v8127_v23  ;;  %v5604_v44 = vsel %vm1476_vm11, %v5601_v41, %v10837_v18  ;;  %v5793_v29 = vrot.slane %v5791_v61, 3  ;;  %v8138_v61 = vld [vmem:[%s11036_s6 + $0x168] sm:$0xff]   ;;  %v8141_v28 = vld [vmem:[%s11036_s6 + $0x1b0] sm:$0xff]  }
 0x76e   : > { %7687 = vmatprep.subr.bf16.mxu1 %v8130_v54  ;;  %v5809_v35 = vshrl.u32 %v5604_v44, 16  ;;  %v5812_v58 = vshll.u32 %v5604_v44, 16  ;;  %v5896_v25 = vor.u32 %v5895_v19, %v5892_v56  ;;  %7730 = vmatpush3.bf16.msra.mxu0 %v8133_v31  ;;  %v5796_v4 = vrot.slane %v5794_v62, 4  ;;  %v8144_v62 = vld [vmem:[%s11036_s6 + $0x1f8] sm:$0xff]  }
 0x76f   : > { %v5802_v40 = vrot.slane %v5800_v26, 3  ;;  %v5805_v38 = vrot.slane %v5803_v63, 4  ;;  %v5590_v47 = vshrl.u32 %v10666_v3, 16  ;;  %7731 = vmatprep.subr.bf16.mxu0 %v8136_v10  ;;  %v5881_v41 = vshrl.u32 %v10837_v18, 16  ;;  %v8149_v3 = vld [vmem:[%s11036_s6 + $0x208] sm:$0xff]  }
 0x770   : > { %v5811_v59 = vrot.slane %v5809_v35, 3  ;;  %v5814_v21 = vrot.slane %v5812_v58, 4  ;;  %v5897_v55 = vsel %vm3314_vm14, %v5824_v37, %v5896_v25  ;;  %v5797_v42 = vor.u32 %v5796_v4, %v5793_v29  ;;  %v8135_v37 = vld [vmem:[%s11036_s6 + $0x120] sm:$0xff]  }
 0x771   : > { %v10868_v0 = vor.u32 %v5805_v38, %v5802_v40  ;;  %7688 = vmatpush3.bf16.msra.mxu1 %v8131_v45  ;;  %v10872_v51 = vor.u32 %v5590_v47, %v5588_v52  ;;  %v5883_v14 = vrot.slane %v5881_v41, 3  ;;  %v5884_v23 = vshll.u32 %v10837_v18, 16 }
 0x772   : > { %v10875_v12 = vor.u32 %v5814_v21, %v5811_v59  ;;  %v10879_v54 = vsel %vm3314_vm14, %v10797_v9, %v5797_v42  ;;  %7689 = vmatprep.subr.bf16.mxu1 %v8134_v32  ;;  %7732 = vmatpush3.bf16.msra.mxu0 %v8137_v49  ;;  %v5845_v22 = vshrl.u32 %v10759_v60, 16  ;;  %v5848_v52 = vshll.u32 %v10759_v60, 16  ;;  %v8145_v49 = vld [vmem:[%s11036_s6 + $0x1b8] sm:$0xff]  }
 0x773   : > { %v10889_v31 = vsel %vm3314_vm14, %v10801_v48, %v10868_v0  ;;  %v5872_v56 = vshrl.u32 %v10872_v51, 16  ;;  %v5875_v9 = vshll.u32 %v10872_v51, 16  ;;  %v5886_v10 = vrot.slane %v5884_v23, 4  ;;  %7733 = vmatprep.subr.bf16.mxu0 %v8140_v11 }
 0x774   : > { %6428 = vmatprep.mubr.bf16.mxu1 %v10889_v31  ;;  %v10903_v60 = vsel %vm3314_vm14, %v10804_v36, %v10875_v12  ;;  %v5847_v48 = vrot.slane %v5845_v22, 3  ;;  %v5850_v39 = vrot.slane %v5848_v52, 4  ;;  %v5632_v19 = vrot.slane %v10676_v8, 5  ;;  %v8139_v36 = vld [vmem:[%s11036_s6 + $0x128] sm:$0xff]   ;;  %v8146_v52 = vld [vmem:[%s11036_s6 + $0x178] sm:$0xff]  }
 0x775   : > { %6494 = vmatmul.mubr.bf16.gmra.mrb[144].mxu0 %v10903_v60  ;;  %6429 = vmatmul.mubr.bf16.gmra.mrb[128].mxu1 %v10879_v54  ;;  %v5874_v26 = vrot.slane %v5872_v56, 3  ;;  %v5877_v63 = vrot.slane %v5875_v9, 4  ;;  %v5887_v45 = vor.u32 %v5886_v10, %v5883_v14  ;;  %v5633_v44 = vrot.slane %v10680_v53, 5  ;;  %v8142_v53 = vld [vmem:[%s11036_s6 + $0x170] sm:$0xff]  }
 0x776   : > { %6501 = vmatprep.mubr.bf16.mxu0 %v5897_v55  ;;  %7690 = vmatpush3.bf16.msra.mxu1 %v8135_v37  ;;  %v10915_v8 = vor.u32 %v5850_v39, %v5847_v48  ;;  %v5720_v29 = vshrl.u32 %v5632_v19, 16  ;;  %v5723_v35 = vshll.u32 %v5632_v19, 16  ;;  %v5619_v58 = vor.u32 %v10695_v20, %v10693_v17 }
 0x777   : > { %v5878_v25 = vor.u32 %v5877_v63, %v5874_v26  ;;  %7691 = vmatprep.subr.bf16.mxu1 %v8138_v61  ;;  %v5888_v4 = vsel %vm3314_vm14, %v10875_v12, %v5887_v45  ;;  %7734 = vmatpush3.bf16.msra.mxu0 %v8141_v28  ;;  %v5634_v32 = vsel %vm3237_vm9, %v5632_v19, %v5633_v44  ;;  %v5635_v40 = vrot.slane %v10746_v13, 5  ;;  %v8143_v13 = vld [vmem:[%s11036_s6 + $0x130] sm:$0xff]   ;;  %v8147_v26 = vld [vmem:[%s11036_s6 + $0x138] sm:$0xff]  }
 0x778   : > { %v10931_v17 = vsel %vm3314_vm14, %v5797_v42, %v10915_v8  ;;  %v5722_v20 = vrot.slane %v5720_v29, 3  ;;  %v5725_v38 = vrot.slane %v5723_v35, 4  ;;  %v5728_v41 = vshrl.u32 %v5634_v32, 16  ;;  %7735 = vmatprep.subr.bf16.mxu0 %v8144_v62 }
 0x779   : > { %v5879_v11 = vsel %vm3314_vm14, %v10868_v0, %v5878_v25  ;;  %v5731_v59 = vshll.u32 %v5634_v32, 16  ;;  %v5622_v21 = vor.u32 %v10709_v46, %v10739_v15  ;;  %v5703_v55 = vshrl.u32 %v5619_v58, 16 }
 0x77a   : > { %6436 = vmatprep.mubr.bf16.mxu1 %v5879_v11  ;;  %7692 = vmatpush3.bf16.msra.mxu1 %v8139_v36  ;;  %v5726_v42 = vor.u32 %v5725_v38, %v5722_v20  ;;  %v5730_v14 = vrot.slane %v5728_v41, 3  ;;  %v5706_v23 = vshll.u32 %v5619_v58, 16  ;;  %v5636_v37 = vsel %vm3237_vm9, %v5633_v44, %v5635_v40 }
 0x77b   : > { %7693 = vmatprep.subr.bf16.mxu1 %v8142_v53  ;;  %v5733_v22 = vrot.slane %v5731_v59, 4  ;;  %7736 = vmatpush3.bf16.msra.mxu0 %v8145_v49  ;;  %v5623_v46 = vsel %vm3220_vm0, %v5619_v58, %v5622_v21  ;;  %v5705_v15 = vrot.slane %v5703_v55, 3  ;;  %v5782_v56 = vshrl.u32 %v5636_v37, 16 }
 0x77c   : > { %v5708_v9 = vrot.slane %v5706_v23, 4  ;;  %v5711_v61 = vshrl.u32 %v5623_v46, 16  ;;  %v5714_v10 = vshll.u32 %v5623_v46, 16  ;;  %v5785_v28 = vshll.u32 %v5636_v37, 16 }
 0x77d   : > { %6502 = vmatmul.mubr.bf16.gmra.mrb[148].mxu0 %v5888_v4  ;;  %6437 = vmatmul.mubr.bf16.gmra.mrb[132].mxu1 %v10931_v17  ;;  %v5734_v48 = vor.u32 %v5733_v22, %v5730_v14  ;;  %v5784_v39 = vrot.slane %v5782_v56, 3  ;;  %v5640_v19 = vsel %vm1297_vm15, %v10872_v51, %v11098_v24  ;;  %v5624_v62 = vrot.slane %v5582_v16, 4  ;;  %v8148_v24 = vld [vmem:[%s11036_s6 + $0x200] sm:$0xff]  }
 0x77e   : > { %6607 = vmatprep.mubr.bf16.mxu0 %v10820_v43  ;;  %7694 = vmatpush3.bf16.msra.mxu1 %v8143_v13  ;;  %v5709_v63 = vor.u32 %v5708_v9, %v5705_v15  ;;  %v5713_v45 = vrot.slane %v5711_v61, 3  ;;  %v5716_v44 = vrot.slane %v5714_v10, 4  ;;  %v5787_v36 = vrot.slane %v5785_v28, 4 }
 0x77f   : > { %v5735_v29 = vsel %vm3314_vm14, %v5726_v42, %v5734_v48  ;;  %7695 = vmatprep.subr.bf16.mxu1 %v8146_v52  ;;  %v5854_v51 = vshrl.u32 %v5640_v19, 16  ;;  %v5857_v16 = vshll.u32 %v5640_v19, 16  ;;  %v5625_v43 = vrot.slane %v5578_v5, 5 }
 0x780   : > { %6542 = vmatprep.mubr.bf16.mxu1 %v5735_v29  ;;  %v5717_v35 = vor.u32 %v5716_v44, %v5713_v45  ;;  %v5788_v58 = vor.u32 %v5787_v36, %v5784_v39  ;;  %v5637_v25 = vrot.slane %v10815_v57, 5  ;;  %v5628_v4 = vrot.slane %v5590_v47, 4  ;;  %v8151_v29 = vld [vmem:[%s11036_s6 + $0x218] sm:$0xff]  }
 0x781   : > { %v5856_v53 = vrot.slane %v5854_v51, 3  ;;  %v5859_v32 = vrot.slane %v5857_v16, 4  ;;  %v5626_v49 = vor.u32 %v5625_v43, %v5624_v62  ;;  %v5629_v20 = vrot.slane %v5586_v27, 5 }
 0x782   : > { %7696 = vmatpush3.bf16.msra.mxu1 %v8147_v26  ;;  %v5718_v38 = vsel %vm3314_vm14, %v5709_v63, %v5717_v35  ;;  %v5789_v7 = vsel %vm3314_vm14, %v5734_v48, %v5788_v58  ;;  %v5638_v5 = vsel %vm3237_vm9, %v5635_v40, %v5637_v25  ;;  %v5639_v41 = vsel %vm3237_vm9, %v5637_v25, %v9936_v50  ;;  %v8153_v25 = vld [vmem:[%s11036_s6 + $0x228] sm:$0xff]  }
 0x783   : > { %7885 = vmatprep.subr.bf16.mxu1 %v8148_v24  ;;  %v10971_v57 = vor.u32 %v5859_v32, %v5856_v53  ;;  %v5627_v47 = vsel %vm3220_vm0, %v5622_v21, %v5626_v49  ;;  %v5836_v11 = vshrl.u32 %v5638_v5, 16  ;;  %v5839_v59 = vshll.u32 %v5638_v5, 16 }
 0x784   : > { %v5773_v27 = vshrl.u32 %v5627_v47, 16  ;;  %v5776_v55 = vshll.u32 %v5627_v47, 16  ;;  %v5630_v13 = vor.u32 %v5629_v20, %v5628_v4  ;;  %v5908_v42 = vshrl.u32 %v5639_v41, 16 }
 0x785   : > { %6608 = vmatmul.mubr.bf16.vlgmr.msra.gmra.mrb[152].mxu0 %v10808_v2  ;;  %6543 = vmatmul.mubr.bf16.vlgmr.msra.gmra.mrb[136].mxu1 %v5718_v38  ;;  %v5861_v50 = vsel %vm3314_vm14, %v10868_v0, %v10971_v57  ;;  %v5838_v40 = vrot.slane %v5836_v11, 3  ;;  %v5841_v14 = vrot.slane %v5839_v59, 4  ;;  %v5911_v2 = vshll.u32 %v5639_v41, 16  ;;  %v8150_v0 = vld [vmem:[%s11036_s6 + $0x210] sm:$0xff]  }
 0x786   : > { %6615 = vmatprep.mubr.bf16.mxu0 %v10889_v31  ;;  %6550 = vmatprep.mubr.bf16.mxu1 %v5789_v7  ;;  %v5775_v21 = vrot.slane %v5773_v27, 3  ;;  %v5778_v23 = vrot.slane %v5776_v55, 4  ;;  %v5631_v37 = vsel %vm3220_vm0, %v5626_v49, %v5630_v13  ;;  %v5910_v22 = vrot.slane %v5908_v42, 3 }
 0x787   : > { %7886 = vmatpush3.bf16.msra.mxu1 %v8148_v24  ;;  %v5842_v52 = vor.u32 %v5841_v14, %v5838_v40  ;;  %v5827_v46 = vshrl.u32 %v5631_v37, 16  ;;  %v5830_v15 = vshll.u32 %v5631_v37, 16  ;;  %v5899_v9 = vshrl.u32 %v5630_v13, 16 }
 0x788   : > { %7887 = vmatprep.subr.bf16.mxu1 %v8149_v3  ;;  %v5779_v56 = vor.u32 %v5778_v23, %v5775_v21  ;;  %v5902_v61 = vshll.u32 %v5630_v13, 16  ;;  %v5913_v48 = vrot.slane %v5911_v2, 4  ;;  %v5641_v26 = vsel %vm1476_vm11, %v10837_v18, %v9874_v30 }
 0x789   : > { %v5843_v31 = vsel %vm3314_vm14, %v5788_v58, %v5842_v52  ;;  %v5829_v10 = vrot.slane %v5827_v46, 3  ;;  %v5832_v28 = vrot.slane %v5830_v15, 4  ;;  %v5901_v19 = vrot.slane %v5899_v9, 3  ;;  %v8152_v58 = vld [vmem:[%s11036_s6 + $0x220] sm:$0xff]  }
 0x78a   : > { %v5780_v39 = vsel %vm3314_vm14, %v5717_v35, %v5779_v56  ;;  %v5904_v62 = vrot.slane %v5902_v61, 4  ;;  %v5914_v45 = vor.u32 %v5913_v48, %v5910_v22  ;;  %v5863_v44 = vshrl.u32 %v5641_v26, 16 }
 0x78b   : > { %7888 = vmatpush3.bf16.msra.mxu1 %v8149_v3  ;;  %v5833_v63 = vor.u32 %v5832_v28, %v5829_v10  ;;  %v5866_v36 = vshll.u32 %v5641_v26, 16  ;;  %v5917_v4 = vsel %vm3314_vm14, %v10971_v57, %v10493_v1  ;;  %v5916_v53 = vsel %vm3314_vm14, %v10915_v8, %v10504_v33 }
 0x78c   : > { %7889 = vmatprep.subr.bf16.mxu1 %v8150_v0  ;;  %v5905_v24 = vor.u32 %v5904_v62, %v5901_v19  ;;  %v5915_v16 = vsel %vm3314_vm14, %v5842_v52, %v5914_v45  ;;  %v5865_v43 = vrot.slane %v5863_v44, 3 }
 0x78d   : > { %6616 = vmatmul.mubr.bf16.gmra.mrb[156].mxu0 %v10879_v54  ;;  %6551 = vmatmul.mubr.bf16.gmra.mrb[140].mxu1 %v5780_v39  ;;  %v5834_v51 = vsel %vm3314_vm14, %v5779_v56, %v5833_v63  ;;  %v5868_v30 = vrot.slane %v5866_v36, 4 }
 0x78e   : > { %6623 = vmatprep.mubr.bf16.mxu0 %v5861_v50  ;;  %6558 = vmatprep.mubr.bf16.mxu1 %v5843_v31  ;;  %v5906_v18 = vsel %vm3314_vm14, %v5833_v63, %v5905_v24 }
 0x78f   : > { %7890 = vmatpush3.bf16.msra.mxu1 %v8150_v0  ;;  %v5869_v35 = vor.u32 %v5868_v30, %v5865_v43 }
 0x790   : > { %7891 = vmatprep.subr.bf16.mxu1 %v8151_v29 }
 0x791   : > { %v5870_v54 = vsel %vm3314_vm14, %v10875_v12, %v5869_v35  ;;  %v8154_v12 = vld [vmem:[%s11036_s6 + $0x230] sm:$0xff]   ;;  %v5918_v1 = vsel %vm3314_vm14, %v5869_v35, %v10030_v6 }
 0x793   : > { %7892 = vmatpush3.bf16.msra.mxu1 %v8151_v29 }
 0x794   : > { %7893 = vmatprep.subr.bf16.mxu1 %v8152_v58 }
 0x795   : > { %6624 = vmatmul.mubr.bf16.gmra.mrb[160].mxu0 %v10931_v17  ;;  %6559 = vmatmul.mubr.bf16.gmra.mrb[144].mxu1 %v5834_v51  ;;  %v8155_v17 = vld [vmem:[%s11036_s6 + $0x238] sm:$0xff]  }
 0x796   : > { %6631 = vmatprep.mubr.bf16.mxu0 %v5917_v4  ;;  %6566 = vmatprep.mubr.bf16.mxu1 %v5915_v16 }
 0x797   : > { %7894 = vmatpush3.bf16.msra.mxu1 %v8152_v58 }
 0x798   : > { %7895 = vmatprep.subr.bf16.mxu1 %v8153_v25 }
 0x79b   : > { %7896 = vmatpush3.bf16.msra.mxu1 %v8153_v25 }
 0x79c   : > { %7897 = vmatprep.subr.bf16.mxu1 %v8154_v12 }
 0x79d   : > { %6632 = vmatmul.mubr.bf16.gmra.mrb[164].mxu0 %v5916_v53  ;;  %6567 = vmatmul.mubr.bf16.gmra.mrb[148].mxu1 %v5906_v18 }
 0x79e   : > { %7901 = vmatprep.mubr.bf16.mxu1 %v10834_v34 }
 0x79f   : > { %7898 = vmatpush3.bf16.msra.mxu1 %v8154_v12 }
 0x7a0   : > { %7899 = vmatprep.subr.bf16.mxu1 %v8155_v17 }
 0x7a3   : > { %7900 = vmatpush3.bf16.msra.mxu1 %v8155_v17 }
 0x7a6   : > { %7902 = vmatmul.mubr.bf16.vlgmr.msra.gmra.mrb[152].mxu1 %v10903_v60 }
 0x7a7   : > { %7905 = vmatprep.mubr.bf16.mxu1 %v5870_v54 }
 0x7ae   : > { %7906 = vmatmul.mubr.bf16.gmra.mrb[156].mxu1 %v5918_v1 }
 0x82f   : > { %v7657_v33 = vpop.f32.mrb[136].mxu0 }
 0x830   : > { %v7658_v8 = vpop.f32.mrb[137].mxu0 }
 0x831   : > { %v7659_v32 = vadd.f32 %v7658_v8, %v7657_v33  ;;  %v7660_v49 = vpop.f32.mrb[138].mxu0 }
 0x832   : > { %v7661_v20 = vpop.f32.mrb[139].mxu0 }
 0x833   : > { %v7662_v38 = vadd.f32 %v7661_v20, %v7660_v49 }
 0x836   : > { %v7617_v7 = vpop.f32.mrb[120].mxu1 }
 0x837   : > { %v7618_v5 = vpop.f32.mrb[121].mxu1 }
 0x838   : > { %v7619_v41 = vadd.f32 %v7618_v5, %v7617_v7  ;;  %v7620_v34 = vpop.f32.mrb[122].mxu1 }
 0x839   : > { %v7621_v57 = vpop.f32.mrb[123].mxu1 }
 0x83a   : > { %v6480_v47 = vadd.f32 %v7659_v32, %v7619_v41  ;;  %v7622_v11 = vadd.f32 %v7621_v57, %v7620_v34 }
 0x83c   : > { %v6483_v59 = vadd.f32 %v7662_v38, %v7622_v11 }
 0x83f   : > { %v7663_v60 = vpop.f32.mrb[140].mxu0  ;;  %v7623_v3 = vpop.f32.mrb[124].mxu1 }
 0x840   : > { %v7664_v27 = vpop.f32.mrb[141].mxu0  ;;  %v7624_v55 = vpop.f32.mrb[125].mxu1 }
 0x841   : > { %v7665_v6 = vadd.f32 %v7664_v27, %v7663_v60  ;;  %v7666_v13 = vpop.f32.mrb[142].mxu0  ;;  %v7625_v42 = vadd.f32 %v7624_v55, %v7623_v3  ;;  %v7626_v50 = vpop.f32.mrb[126].mxu1 }
 0x842   : > { %v7667_v40 = vpop.f32.mrb[143].mxu0  ;;  %v7627_v14 = vpop.f32.mrb[127].mxu1 }
 0x843   : > { %v6488_v21 = vadd.f32 %v7665_v6, %v7625_v42  ;;  %v7668_v23 = vadd.f32 %v7667_v40, %v7666_v13  ;;  %v7628_v37 = vadd.f32 %v7627_v14, %v7626_v50 }
 0x845   : > { %v6491_v22 = vadd.f32 %v7668_v23, %v7628_v37 }
 0x848   : > { %v7669_v52 = vpop.f32.mrb[144].mxu0  ;;  %v7629_v46 = vpop.f32.mrb[128].mxu1 }
 0x849   : > { %v7670_v15 = vpop.f32.mrb[145].mxu0  ;;  %v7630_v2 = vpop.f32.mrb[129].mxu1 }
 0x84a   : > { %v7671_v56 = vadd.f32 %v7670_v15, %v7669_v52  ;;  %v7672_v0 = vpop.f32.mrb[146].mxu0  ;;  %v7631_v9 = vadd.f32 %v7630_v2, %v7629_v46  ;;  %v7632_v61 = vpop.f32.mrb[130].mxu1 }
 0x84b   : > { %v7673_v31 = vpop.f32.mrb[147].mxu0  ;;  %v7633_v10 = vpop.f32.mrb[131].mxu1 }
 0x84c   : > { %v6496_v28 = vadd.f32 %v7671_v56, %v7631_v9  ;;  %v7674_v48 = vadd.f32 %v7673_v31, %v7672_v0  ;;  %v7634_v39 = vadd.f32 %v7633_v10, %v7632_v61 }
 0x84e   : > { %v6499_v19 = vadd.f32 %v7674_v48, %v7634_v39 }
 0x850   : > { %v7675_v62 = vpop.f32.mrb[148].mxu0  ;;  %v7635_v26 = vpop.f32.mrb[132].mxu1 }
 0x851   : > { %v7676_v63 = vpop.f32.mrb[149].mxu0  ;;  %v7636_v45 = vpop.f32.mrb[133].mxu1 }
 0x852   : > { %v7677_v44 = vadd.f32 %v7676_v63, %v7675_v62  ;;  %v7678_v36 = vpop.f32.mrb[150].mxu0  ;;  %v7637_v29 = vadd.f32 %v7636_v45, %v7635_v26  ;;  %v7638_v24 = vpop.f32.mrb[134].mxu1 }
 0x853   : > { %v7679_v51 = vpop.f32.mrb[151].mxu0  ;;  %v7639_v16 = vpop.f32.mrb[135].mxu1 }
 0x854   : > { %v6504_v43 = vadd.f32 %v7677_v44, %v7637_v29  ;;  %v7680_v30 = vadd.f32 %v7679_v51, %v7678_v36  ;;  %v7640_v18 = vadd.f32 %v7639_v16, %v7638_v24 }
 0x856   : > { %v6507_v35 = vadd.f32 %v7680_v30, %v7640_v18 }
 0x858   : > { %v7737_v58 = vpop.f32.mrb[152].mxu0  ;;  %v7697_v54 = vpop.f32.mrb[136].mxu1 }
 0x859   : > { %v7738_v25 = vpop.f32.mrb[153].mxu0  ;;  %v7698_v4 = vpop.f32.mrb[137].mxu1 }
 0x85a   : > { %v7739_v12 = vadd.f32 %v7738_v25, %v7737_v58  ;;  %v7740_v53 = vpop.f32.mrb[154].mxu0  ;;  %v7699_v17 = vadd.f32 %v7698_v4, %v7697_v54  ;;  %v7700_v1 = vpop.f32.mrb[138].mxu1 }
 0x85b   : > { %v7741_v33 = vpop.f32.mrb[155].mxu0  ;;  %v7701_v8 = vpop.f32.mrb[139].mxu1 }
 0x85c   : > { %v6545_v32 = vadd.f32 %v7699_v17, %v6480_v47  ;;  %v7742_v49 = vadd.f32 %v7741_v33, %v7740_v53  ;;  %v7702_v20 = vadd.f32 %v7701_v8, %v7700_v1 }
 0x85e   : > { %v6548_v38 = vadd.f32 %v7702_v20, %v6483_v59  ;;  %v6610_v7 = vadd.f32 %v7739_v12, %v6545_v32 }
 0x860   : > { %v7743_v5 = vpop.f32.mrb[156].mxu0  ;;  %v7703_v41 = vpop.f32.mrb[140].mxu1  ;;  %v6613_v34 = vadd.f32 %v7742_v49, %v6548_v38 }
 0x861   : > { %v7744_v57 = vpop.f32.mrb[157].mxu0  ;;  %v7704_v11 = vpop.f32.mrb[141].mxu1 }
 0x862   : > { %v7745_v60 = vadd.f32 %v7744_v57, %v7743_v5  ;;  %v7746_v3 = vpop.f32.mrb[158].mxu0  ;;  %v7705_v27 = vadd.f32 %v7704_v11, %v7703_v41  ;;  %v7706_v55 = vpop.f32.mrb[142].mxu1 }
 0x863   : > { %v7747_v6 = vpop.f32.mrb[159].mxu0  ;;  %v7707_v13 = vpop.f32.mrb[143].mxu1 }
 0x864   : > { %v6553_v42 = vadd.f32 %v7705_v27, %v6488_v21  ;;  %v7748_v50 = vadd.f32 %v7747_v6, %v7746_v3  ;;  %v7708_v40 = vadd.f32 %v7707_v13, %v7706_v55 }
 0x866   : > { %v6556_v14 = vadd.f32 %v7708_v40, %v6491_v22  ;;  %v6618_v47 = vadd.f32 %v7745_v60, %v6553_v42 }
 0x868   : > { %v7749_v23 = vpop.f32.mrb[160].mxu0  ;;  %v7709_v37 = vpop.f32.mrb[144].mxu1  ;;  %v6621_v59 = vadd.f32 %v7748_v50, %v6556_v14 }
 0x869   : > { %v7750_v52 = vpop.f32.mrb[161].mxu0  ;;  %v7710_v46 = vpop.f32.mrb[145].mxu1 }
 0x86a   : > { %v7751_v15 = vadd.f32 %v7750_v52, %v7749_v23  ;;  %v7752_v2 = vpop.f32.mrb[162].mxu0  ;;  %v7711_v56 = vadd.f32 %v7710_v46, %v7709_v37  ;;  %v7712_v0 = vpop.f32.mrb[146].mxu1 }
 0x86b   : > { %v7753_v9 = vpop.f32.mrb[163].mxu0  ;;  %v7713_v61 = vpop.f32.mrb[147].mxu1 }
 0x86c   : > { %v6561_v31 = vadd.f32 %v7711_v56, %v6496_v28  ;;  %v7754_v10 = vadd.f32 %v7753_v9, %v7752_v2  ;;  %v7714_v48 = vadd.f32 %v7713_v61, %v7712_v0 }
 0x86e   : > { %v6564_v39 = vadd.f32 %v7714_v48, %v6499_v19  ;;  %v6626_v21 = vadd.f32 %v7751_v15, %v6561_v31 }
 0x870   : > { %v7755_v62 = vpop.f32.mrb[164].mxu0  ;;  %v7715_v22 = vpop.f32.mrb[148].mxu1  ;;  %v6629_v26 = vadd.f32 %v7754_v10, %v6564_v39 }
 0x871   : > { %v7756_v63 = vpop.f32.mrb[165].mxu0  ;;  %v7716_v45 = vpop.f32.mrb[149].mxu1 }
 0x872   : > { %v7757_v44 = vadd.f32 %v7756_v63, %v7755_v62  ;;  %v7758_v36 = vpop.f32.mrb[166].mxu0  ;;  %v7717_v29 = vadd.f32 %v7716_v45, %v7715_v22  ;;  %v7718_v24 = vpop.f32.mrb[150].mxu1 }
 0x873   : > { %v7759_v51 = vpop.f32.mrb[167].mxu0  ;;  %v7719_v16 = vpop.f32.mrb[151].mxu1 }
 0x874   : > { %v6569_v30 = vadd.f32 %v7717_v29, %v6504_v43  ;;  %v7760_v18 = vadd.f32 %v7759_v51, %v7758_v36  ;;  %v7720_v58 = vadd.f32 %v7719_v16, %v7718_v24 }
 0x876   : > { %v6572_v28 = vadd.f32 %v7720_v58, %v6507_v35  ;;  %v6634_v54 = vadd.f32 %v7757_v44, %v6569_v30 }
 0x878   : > { %v6637_v19 = vadd.f32 %v7760_v18, %v6572_v28 }
 0x879   : > { %v7903_v25 = vpop.f32.mrb[152].mxu1 }
 0x87a   : > { %v6683_v4 = vadd.f32 %v7903_v25, %v6618_v47  ;;  %v6674_v12 = vpop.f32.mrb[153].mxu1 }
 0x87b   : > { %v6675_v53 = vadd.f32 %v6674_v12, %v6610_v7  ;;  %v7904_v17 = vpop.f32.mrb[154].mxu1 }
 0x87c   : > { %6707 = vst [vmem:[%s278_s15 + $0x10] sm:$0xff] %v6683_v4  ;;  %v6686_v1 = vadd.f32 %v7904_v17, %v6621_v59  ;;  %v6677_v33 = vpop.f32.mrb[155].mxu1 }
 0x87d   : > { %6705 = vst [vmem:[%s278_s15] sm:$0xff] %v6675_v53  ;;  %v6678_v43 = vadd.f32 %v6677_v33, %v6613_v34 }
 0x87e   : > { %6708 = vst [vmem:[%s278_s15 + $0x18] sm:$0xff] %v6686_v1 }
 0x87f   : > { %6706 = vst [vmem:[%s278_s15 + $0x8] sm:$0xff] %v6678_v43 }
 0x881   : > { %v7907_v35 = vpop.f32.mrb[156].mxu1 }
 0x882   : > { %v6699_v8 = vadd.f32 %v7907_v35, %v6634_v54  ;;  %v6690_v32 = vpop.f32.mrb[157].mxu1 }
 0x883   : > { %v6691_v49 = vadd.f32 %v6690_v32, %v6626_v21  ;;  %v7908_v20 = vpop.f32.mrb[158].mxu1 }
 0x884   : > { %6711 = vst [vmem:[%s278_s15 + $0x30] sm:$0xff] %v6699_v8  ;;  %v6702_v38 = vadd.f32 %v7908_v20, %v6637_v19  ;;  %v6693_v5 = vpop.f32.mrb[159].mxu1 }
 0x885   : > { %6709 = vst [vmem:[%s278_s15 + $0x20] sm:$0xff] %v6691_v49  ;;  %v6694_v41 = vadd.f32 %v6693_v5, %v6629_v26 }
 0x886   : > { %6712 = vst [vmem:[%s278_s15 + $0x38] sm:$0xff] %v6702_v38 }
 0x887   : > { %6710 = vst [vmem:[%s278_s15 + $0x28] sm:$0xff] %v6694_v41 }
 0x888 PF: > { %s17_s24 = sadd.s32 1, %s8166_s24  }
 0x889   : > { %p14_p4 = scmp.ge.s32.totalorder %s17_s24, 4  }
 0x88b   :  { %16 = sbr.rel (!%p14_p4) target bundleno = 1 (0x1), region = 78 }

</bundles_post_ra>
